<compile_context>
chip_gen: v6e
topology: v6e:2x2x1
jax: 0.10.0
libtpu: 0.0.40
codegen_flags: <defaults>
</compile_context>

<pallas_src>
import functools

import jax
import jax.numpy as jnp
from jax.experimental import pallas as pl
from jax.experimental.pallas import tpu as pltpu

EPS = 1e-6


def _round_up(n, m):
    return ((n + m - 1) // m) * m


# --------------------------- in-kernel helpers ------------------------------

def _group_matrices(C, groups):
    """Channel<->group membership matrices built from iota."""
    cpg = C // groups
    cid = jax.lax.broadcasted_iota(jnp.int32, (C, groups), 0)
    gid = jax.lax.broadcasted_iota(jnp.int32, (C, groups), 1)
    c2g = ((cid >= gid * cpg) & (cid < (gid + 1) * cpg)).astype(jnp.float32)
    gid2 = jax.lax.broadcasted_iota(jnp.int32, (groups, C), 0)
    cid2 = jax.lax.broadcasted_iota(jnp.int32, (groups, C), 1)
    g2c = ((cid2 >= gid2 * cpg) & (cid2 < (gid2 + 1) * cpg)).astype(jnp.float32)
    return c2g, g2c, cpg


def _gn_silu(x, gamma, beta, groups, n_spatial):
    """GroupNorm(affine) + SiLU on a (P, C) f32 array.

    Rows outside the spatial interior must be exactly zero so plain row sums
    equal interior sums; n_spatial = H*W.  Stats stay in f32 (the dots below
    are tiny).  Group stats are batched: 2 dots per GN instead of 4.
    """
    C = x.shape[1]
    c2g, g2c, cpg = _group_matrices(C, groups)
    inv_n = 1.0 / float(n_spatial * cpg)
    s = jnp.sum(x, axis=0, keepdims=True)                         # (1, C)
    ss = jnp.sum(x * x, axis=0, keepdims=True)                    # (1, C)
    stats = jnp.concatenate([s, ss], axis=0)                      # (2, C)
    gstats = jnp.dot(stats, c2g, preferred_element_type=jnp.float32) * inv_n
    mean_g = gstats[0:1]                                          # (1, G)
    var_g = gstats[1:2] - mean_g * mean_g
    rstd_g = jax.lax.rsqrt(var_g + EPS)
    cstats = jnp.dot(jnp.concatenate([mean_g, rstd_g], axis=0), g2c,
                     preferred_element_type=jnp.float32)          # (2, C)
    h = (x - cstats[0:1]) * cstats[1:2] * gamma + beta
    return h * jax.nn.sigmoid(h)                                  # SiLU


def _conv3x3(buf_ref, h, w_ref, Wp, P):
    """3x3 / stride-1 / zero-pad conv, K-folded.

    h is the (P, C) f32 conv input in flattened-padded form (row stride Wp,
    exact zero border).  The three dx taps are packed into lanes via two XLU
    rolls + concat and stored once (bf16) into the scratch at sublane offset
    Wp; the conv is then 3 aligned dy-window reads and 3 MXU dots of K=3*C
    against w_ref[t] = conv weight row t reshaped to (3C, Cout).
    Output rows outside the interior are garbage and must be masked (with a
    select) by the caller.
    """
    C3 = buf_ref.shape[1]
    hcat = jnp.concatenate(
        [pltpu.roll(h, 1, 0),          # h[r-1]  (dx = -1)
         h,                            # h[r]    (dx =  0)
         pltpu.roll(h, P - 1, 0)],     # h[r+1]  (dx = +1)
        axis=-1)                                                  # (P, 3C)
    zeros_m = jnp.zeros((Wp, C3), buf_ref.dtype)
    buf_ref[pl.ds(0, Wp), :] = zeros_m                 # top margin (dy = -1)
    buf_ref[pl.ds(Wp + P, Wp), :] = zeros_m            # bottom margin (dy = +1)
    buf_ref[pl.ds(Wp, P), :] = hcat.astype(buf_ref.dtype)
    acc = None
    for t in range(3):                                 # dy = t - 1
        win = buf_ref[pl.ds(t * Wp, P), :]             # aligned (P, 3C) window
        part = jnp.dot(win, w_ref[t], preferred_element_type=jnp.float32)
        acc = part if acc is None else acc + part
    return acc                                                     # (P, Cout) f32


# ----------------------------- Pallas kernels --------------------------------

def resnet_kernel(H, W, Wp, groups, inv_scale,
                  mask_ref, hp_ref, res_ref, tc_ref,
                  g1_ref, be1_ref, w1_ref, wtc_ref, b1_ref,
                  g2_ref, be2_ref, w2_ref, b2_ref,
                  wsc_ref, bsc_ref,
                  o_ref, buf1, buf2):
    """Whole DualCondResnetBlock2D forward for one batch element, VMEM-resident."""
    P = (H + 2) * Wp
    hw = H * W
    keep = mask_ref[...] > 0.5                                    # (P, 1) bool

    # channel concat (torch cat dim=1) done in-kernel
    xb = jnp.concatenate([hp_ref[0], res_ref[0]], axis=-1)        # (P, Cin) bf16
    x = xb.astype(jnp.float32)

    # norm1 + SiLU; force exact zero border so conv1 sees zero padding
    h = _gn_silu(x, g1_ref[...], be1_ref[...], groups, hw)
    h = jnp.where(keep, h, 0.0)

    # conv1 (3x3, bf16 MXU) + bias + fused temb/cond projection epilogue
    h = _conv3x3(buf1, h, w1_ref, Wp, P)                          # (P, Cout) f32
    tc = tc_ref[0].astype(jnp.float32)                            # (1, Dt+Dc)
    tc = tc * jax.nn.sigmoid(tc)
    proj = jnp.dot(tc, wtc_ref[...], preferred_element_type=jnp.float32)
    h = h + b1_ref[...] + proj

    # norm2 + SiLU (interior stats via select-mask); dropout(p=0) == identity
    h = _gn_silu(jnp.where(keep, h, 0.0), g2_ref[...], be2_ref[...], groups, hw)
    h = jnp.where(keep, h, 0.0)

    # conv2 (3x3) + 1x1 shortcut + residual + 1/output_scale_factor
    h = _conv3x3(buf2, h, w2_ref, Wp, P) + b2_ref[...]
    sc = jnp.dot(xb, wsc_ref[...], preferred_element_type=jnp.float32) + bsc_ref[...]
    out = (h + sc) * inv_scale
    o_ref[0] = jnp.where(keep, out, 0.0).astype(o_ref.dtype)


def upsample_kernel(H, W, Wp, y_ref, w_ref, b_ref, o_ref, buf):
    """NN 2x upsample + 3x3 conv via sub-pixel decomposition, fully K-folded.

    All 4 taps of each of the 4 output parities are packed into K=4*C lanes
    (two rolls + concats), stored once, and each parity is ONE MXU dot from a
    shifted window.  Only interior low-res rows are computed/written, in a
    lane-dense (H*Wp, 4*Cout) parity-major layout.
    """
    P = (H + 2) * Wp
    hw_rows = H * Wp
    h = y_ref[0].astype(jnp.float32)                              # (P, C) zero-border
    hc = jnp.concatenate([pltpu.roll(h, 1, 0), h], axis=-1)       # [h[r-1], h[r]]
    s4 = jnp.concatenate([pltpu.roll(hc, Wp, 0), hc], axis=-1)    # (P, 4C)
    tail = buf.shape[0] - P
    buf[pl.ds(P, tail), :] = jnp.zeros((tail, buf.shape[1]), buf.dtype)
    buf[pl.ds(0, P), :] = s4.astype(buf.dtype)
    bias = b_ref[...]                                             # (1, Co)
    parts = []
    for par, off in enumerate((Wp, Wp + 1, 2 * Wp, 2 * Wp + 1)):  # (a,b) parities
        win = buf[pl.ds(off, hw_rows), :]                         # (H*Wp, 4C)
        r = jnp.dot(win, w_ref[par], preferred_element_type=jnp.float32) + bias
        parts.append(r)
    o_ref[0] = jnp.concatenate(parts, axis=-1).astype(o_ref.dtype)


# ----------------------------- wrappers ---------------------------------------

def pad_flat(x, Wp):
    """(B, H, W, C) -> flattened zero-padded (B, (H+2)*Wp, C), row stride Wp."""
    B, H, W, C = x.shape
    xp = jnp.pad(x, ((0, 0), (1, 1), (1, Wp - 1 - W), (0, 0)))
    return xp.reshape(B, (H + 2) * Wp, C)


def interior_mask(H, W, Wp):
    ys = (jnp.arange(H + 2) >= 1) & (jnp.arange(H + 2) <= H)
    xs = (jnp.arange(Wp) >= 1) & (jnp.arange(Wp) <= W)
    return (ys[:, None] & xs[None, :]).astype(jnp.float32).reshape(
        (H + 2) * Wp, 1)


def _compiler_params():
    return pltpu.CompilerParams(
        dimension_semantics=("parallel",),
        vmem_limit_bytes=64 * 1024 * 1024)


def dual_cond_resnet_block(hp, resp, temb, cond, p, H, W, Wp):
    """One fused pallas_call for the whole resnet block (grid over batch)."""
    B, P, Ch = hp.shape
    Cr = resp.shape[-1]
    Cin = Ch + Cr
    Cout = p["conv1_w_hwio"].shape[-1]
    groups = p["groups"]
    tc = jnp.concatenate([temb, cond], axis=-1)[:, None, :].astype(jnp.float32)
    Dtc = tc.shape[-1]
    mask = interior_mask(H, W, Wp)
    bias1 = (p["conv1_b"] + p["temb_b"] + p["cond_b"]).reshape(1, Cout)
    # K-folded bf16 conv weights: row t -> (3*Cin, Cout) with dx-major packing.
    w1f = p["conv1_w_hwio"].reshape(3, 3 * Cin, Cout).astype(jnp.bfloat16)
    w2f = p["conv2_w_hwio"].reshape(3, 3 * Cout, Cout).astype(jnp.bfloat16)
    wsc = p["sc_w"].astype(jnp.bfloat16)
    rows = P + 2 * Wp
    kernel = functools.partial(resnet_kernel, H, W, Wp, groups,
                               float(1.0 / p["output_scale_factor"]))
    out = pl.pallas_call(
        kernel,
        out_shape=jax.ShapeDtypeStruct((B, P, Cout), jnp.bfloat16),
        grid=(B,),
        in_specs=[
            pl.BlockSpec((P, 1), lambda b: (0, 0)),               # interior mask
            pl.BlockSpec((1, P, Ch), lambda b: (b, 0, 0)),        # hidden (padded-flat)
            pl.BlockSpec((1, P, Cr), lambda b: (b, 0, 0)),        # skip (padded-flat)
            pl.BlockSpec((1, 1, Dtc), lambda b: (b, 0, 0)),       # [temb, cond]
            pl.BlockSpec((1, Cin), lambda b: (0, 0)),             # gn1 gamma
            pl.BlockSpec((1, Cin), lambda b: (0, 0)),             # gn1 beta
            pl.BlockSpec((3, 3 * Cin, Cout), lambda b: (0, 0, 0)),  # conv1 w (folded)
            pl.BlockSpec((Dtc, Cout), lambda b: (0, 0)),          # [temb_w; cond_w]
            pl.BlockSpec((1, Cout), lambda b: (0, 0)),            # conv1_b+temb_b+cond_b
            pl.BlockSpec((1, Cout), lambda b: (0, 0)),            # gn2 gamma
            pl.BlockSpec((1, Cout), lambda b: (0, 0)),            # gn2 beta
            pl.BlockSpec((3, 3 * Cout, Cout), lambda b: (0, 0, 0)),  # conv2 w (folded)
            pl.BlockSpec((1, Cout), lambda b: (0, 0)),            # conv2 b
            pl.BlockSpec((Cin, Cout), lambda b: (0, 0)),          # shortcut w (1x1)
            pl.BlockSpec((1, Cout), lambda b: (0, 0)),            # shortcut b
        ],
        out_specs=pl.BlockSpec((1, P, Cout), lambda b: (b, 0, 0)),
        scratch_shapes=[pltpu.VMEM((rows, 3 * Cin), jnp.bfloat16),
                        pltpu.VMEM((rows, 3 * Cout), jnp.bfloat16)],
        compiler_params=_compiler_params(),
    )(mask, hp, resp, tc,
      p["gn1_gamma"].reshape(1, Cin), p["gn1_beta"].reshape(1, Cin),
      w1f, p["wtc"].astype(jnp.float32), bias1,
      p["gn2_gamma"].reshape(1, Cout), p["gn2_beta"].reshape(1, Cout),
      w2f, p["conv2_b"].reshape(1, Cout),
      wsc, p["sc_b"].reshape(1, Cout))
    return out


def _upsample_eff_weights(w):
    """(3,3,C,Co) conv kernel -> (4,4,C,Co) folded sub-pixel kernels.

    Parity a row-taps: a=0 -> low rows {y-1} (kernel row 0), {y} (rows 1,2);
                       a=1 -> {y} (rows 0,1), {y+1} (row 2).  Same for x.
    """
    row_sets = [([0], [1, 2]), ([0, 1], [2])]
    parities = []
    for a in range(2):
        for b in range(2):
            taps = []
            for rs in row_sets[a]:
                for cs in row_sets[b]:
                    taps.append(sum(w[r, c] for r in rs for c in cs))
            parities.append(jnp.stack(taps, axis=0))              # (4, C, Co)
    return jnp.stack(parities, axis=0)                            # (4, 4, C, Co)


def upsample_conv(yp, w_hwio, bias, H, W, Wp):
    """Upsample2D(use_conv=True): NN 2x upsample + 3x3 conv (sub-pixel form)."""
    B, P, C = yp.shape
    Co = w_hwio.shape[-1]
    w_eff = _upsample_eff_weights(w_hwio)                          # (4,4,C,Co) f32
    w_fold = w_eff.reshape(4, 4 * C, Co).astype(jnp.bfloat16)      # K-folded bf16
    rows = P + 8
    out = pl.pallas_call(
        functools.partial(upsample_kernel, H, W, Wp),
        out_shape=jax.ShapeDtypeStruct((B, H * Wp, 4 * Co), jnp.float32),
        grid=(B,),
        in_specs=[
            pl.BlockSpec((1, P, C), lambda b: (b, 0, 0)),
            pl.BlockSpec((4, 4 * C, Co), lambda b: (0, 0, 0)),
            pl.BlockSpec((1, Co), lambda b: (0, 0)),
        ],
        out_specs=pl.BlockSpec((1, H * Wp, 4 * Co), lambda b: (b, 0, 0)),
        scratch_shapes=[pltpu.VMEM((rows, 4 * C), jnp.bfloat16)],
        compiler_params=_compiler_params(),
    )(yp, w_fold, bias.reshape(1, Co).astype(jnp.float32))
    # (y, x, a, b, c) -> final interleaved (B, 2H, 2W, Co); only a slice +
    # transpose of the interior remains in XLA.
    out = out.reshape(B, H, Wp, 2, 2, Co)[:, :, 1:W + 1]
    return out.transpose(0, 1, 3, 2, 4, 5).reshape(B, 2 * H, 2 * W, Co)


# ----------------------------- module logic -----------------------------------

def dual_cond_up_block(hidden, res_hidden_states_tuple, temb, cond, params):
    """DualCondUpBlock2D.forward (eval mode, NHWC)."""
    B, H, W, _ = hidden.shape
    Wp = _round_up(W + 2, 8)
    res_tuple = tuple(res_hidden_states_tuple)
    hp = pad_flat(hidden, Wp).astype(jnp.bfloat16)                 # (B, P, C)
    for rp in params["resnets"]:
        res = res_tuple[-1]
        res_tuple = res_tuple[:-1]
        resp = pad_flat(res, Wp).astype(jnp.bfloat16)
        hp = dual_cond_resnet_block(hp, resp, temb, cond, rp, H, W, Wp)
    up = params["upsampler"]
    return upsample_conv(hp, up["conv_w_hwio"], up["conv_b"], H, W, Wp)


# ----------------------------- parameters -------------------------------------

def init_params(key, *, in_channels, prev_output_channel, out_channels,
                temb_channels, add_condition_dim, groups, num_layers=1,
                output_scale_factor=1.0):
    ks = iter(jax.random.split(key, 64))

    def nrm(shape, scale=0.05):
        return (scale * jax.random.normal(next(ks), shape)).astype(jnp.float32)

    resnets = []
    for i in range(num_layers):
        res_skip = in_channels if i == num_layers - 1 else out_channels
        rin = prev_output_channel if i == 0 else out_channels
        Cin = rin + res_skip
        Cout = out_channels
        temb_w = nrm((temb_channels, Cout))
        cond_w = nrm((add_condition_dim, Cout))
        # Cin != Cout here, so use_in_shortcut (1x1 conv shortcut) is active.
        resnets.append(dict(
            groups=groups,
            gn1_gamma=jnp.ones((Cin,), jnp.float32),
            gn1_beta=jnp.zeros((Cin,), jnp.float32),
            conv1_w_hwio=nrm((3, 3, Cin, Cout)),
            conv1_b=nrm((Cout,)),
            temb_w=temb_w, temb_b=nrm((Cout,)),
            cond_w=cond_w, cond_b=nrm((Cout,)),
            wtc=jnp.concatenate([temb_w, cond_w], axis=0),
            gn2_gamma=jnp.ones((Cout,), jnp.float32),
            gn2_beta=jnp.zeros((Cout,), jnp.float32),
            conv2_w_hwio=nrm((3, 3, Cout, Cout)),
            conv2_b=nrm((Cout,)),
            sc_w=nrm((Cin, Cout)), sc_b=nrm((Cout,)),
            output_scale_factor=output_scale_factor,
        ))
    upsampler = dict(conv_w_hwio=nrm((3, 3, out_channels, out_channels)),
                     conv_b=nrm((out_channels,)))
    return dict(resnets=resnets, upsampler=upsampler)


# ----------------------------- pure-JAX reference ------------------------------

def ref_forward(hidden, res_tuple, temb, cond, params, groups):
    def silu(v):
        return v * jax.nn.sigmoid(v)

    def gn(x, gamma, beta):
        B, H, W, C = x.shape
        xg = x.reshape(B, H, W, groups, C // groups)
        mean = xg.mean(axis=(1, 2, 4), keepdims=True)
        var = xg.var(axis=(1, 2, 4), keepdims=True)
        xg = (xg - mean) / jnp.sqrt(var + EPS)
        return xg.reshape(B, H, W, C) * gamma + beta

    def conv(x, w_hwio, b):
        y = jax.lax.conv_general_dilated(
            x, w_hwio, (1, 1), "SAME",
            dimension_numbers=("NHWC", "HWIO", "NHWC"))
        return y + b

    res_tuple = tuple(res_tuple)
    for p in params["resnets"]:
        res = res_tuple[-1]
        res_tuple = res_tuple[:-1]
        x = jnp.concatenate([hidden, res], axis=-1)
        h = silu(gn(x, p["gn1_gamma"], p["gn1_beta"]))
        h = conv(h, p["conv1_w_hwio"], p["conv1_b"])
        h = h + (silu(temb) @ p["temb_w"] + p["temb_b"])[:, None, None, :]
        h = h + (silu(cond) @ p["cond_w"] + p["cond_b"])[:, None, None, :]
        h = silu(gn(h, p["gn2_gamma"], p["gn2_beta"]))
        h = conv(h, p["conv2_w_hwio"], p["conv2_b"])
        sc = jnp.einsum("bhwc,cd->bhwd", x, p["sc_w"]) + p["sc_b"]
        hidden = (sc + h) / p["output_scale_factor"]
    up = params["upsampler"]
    hidden = jnp.repeat(jnp.repeat(hidden, 2, axis=1), 2, axis=2)
    return conv(hidden, up["conv_w_hwio"], up["conv_b"])


# ----------------------------- main ---------------------------------------------

if __name__ == "__main__":
    B = 2
    in_channels = 32          # skip-connection channels
    prev_output_channel = 32  # incoming hidden-state channels
    out_channels = 32
    temb_channels = 32
    add_condition_dim = 32
    groups = 8
    H = W = 8

    key = jax.random.PRNGKey(0)
    k_h, k_r, k_t, k_c, k_p = jax.random.split(key, 5)

    hidden = jax.random.normal(k_h, (B, H, W, prev_output_channel), jnp.float32)
    res_skip = jax.random.normal(k_r, (B, H, W, in_channels), jnp.float32)
    temb = jax.random.normal(k_t, (B, temb_channels), jnp.float32)
    cond = jax.random.normal(k_c, (B, add_condition_dim), jnp.float32)

    params = init_params(
        k_p, in_channels=in_channels, prev_output_channel=prev_output_channel,
        out_channels=out_channels, temb_channels=temb_channels,
        add_condition_dim=add_condition_dim, groups=groups, num_layers=1)

    out = dual_cond_up_block(hidden, (res_skip,), temb, cond, params)
    out = jax.block_until_ready(out)
    assert out.shape == (B, 2 * H, 2 * W, out_channels), out.shape

    ref = ref_forward(hidden, (res_skip,), temb, cond, params, groups)
    ref = jax.block_until_ready(ref)
    # bf16 MXU operands / bf16 inter-kernel activations -> looser tolerance
    # than the previous all-f32 version.
    assert jnp.allclose(out, ref, rtol=6e-2, atol=6e-2), (
        float(jnp.max(jnp.abs(out - ref))))

    print("KERNEL_OK")
</pallas_src>

<mosaic_0001>
module attributes {stable_mosaic.version = 11 : i64} {
  func.func @resnet_kernel(%arg0: i32, %arg1: memref<160x1xf32, #tpu.memory_space<vmem>>, %arg2: memref<1x160x32xbf16, #tpu.memory_space<vmem>>, %arg3: memref<1x160x32xbf16, #tpu.memory_space<vmem>>, %arg4: memref<1x1x64xf32, #tpu.memory_space<vmem>>, %arg5: memref<1x64xf32, #tpu.memory_space<vmem>>, %arg6: memref<1x64xf32, #tpu.memory_space<vmem>>, %arg7: memref<3x192x32xbf16, #tpu.memory_space<vmem>>, %arg8: memref<64x32xf32, #tpu.memory_space<vmem>>, %arg9: memref<1x32xf32, #tpu.memory_space<vmem>>, %arg10: memref<1x32xf32, #tpu.memory_space<vmem>>, %arg11: memref<1x32xf32, #tpu.memory_space<vmem>>, %arg12: memref<3x96x32xbf16, #tpu.memory_space<vmem>>, %arg13: memref<1x32xf32, #tpu.memory_space<vmem>>, %arg14: memref<64x32xbf16, #tpu.memory_space<vmem>>, %arg15: memref<1x32xf32, #tpu.memory_space<vmem>>, %arg16: memref<1x160x32xbf16, #tpu.memory_space<vmem>>, %arg17: memref<192x192xbf16, #tpu.memory_space<vmem>>, %arg18: memref<192x96xbf16, #tpu.memory_space<vmem>>) attributes {dimension_semantics = [#tpu.dimension_semantics<parallel>], iteration_bounds = array<i64: 2>, scalar_prefetch = 0 : i64, scratch_operands = 2 : i64, tpu.core_type = #tpu.core_type<tc>, window_params = [{pipeline_mode = #tpu.pipeline_mode<synchronous>, transform_indices = @transform_0, window_bounds = array<i64: 160, 1>}, {transform_indices = @transform_1, window_bounds = array<i64: 1, 160, 32>}, {transform_indices = @transform_2, window_bounds = array<i64: 1, 160, 32>}, {transform_indices = @transform_3, window_bounds = array<i64: 1, 1, 64>}, {pipeline_mode = #tpu.pipeline_mode<synchronous>, transform_indices = @transform_4, window_bounds = array<i64: 1, 64>}, {pipeline_mode = #tpu.pipeline_mode<synchronous>, transform_indices = @transform_5, window_bounds = array<i64: 1, 64>}, {pipeline_mode = #tpu.pipeline_mode<synchronous>, transform_indices = @transform_6, window_bounds = array<i64: 3, 192, 32>}, {pipeline_mode = #tpu.pipeline_mode<synchronous>, transform_indices = @transform_7, window_bounds = array<i64: 64, 32>}, {pipeline_mode = #tpu.pipeline_mode<synchronous>, transform_indices = @transform_8, window_bounds = array<i64: 1, 32>}, {pipeline_mode = #tpu.pipeline_mode<synchronous>, transform_indices = @transform_9, window_bounds = array<i64: 1, 32>}, {pipeline_mode = #tpu.pipeline_mode<synchronous>, transform_indices = @transform_10, window_bounds = array<i64: 1, 32>}, {pipeline_mode = #tpu.pipeline_mode<synchronous>, transform_indices = @transform_11, window_bounds = array<i64: 3, 96, 32>}, {pipeline_mode = #tpu.pipeline_mode<synchronous>, transform_indices = @transform_12, window_bounds = array<i64: 1, 32>}, {pipeline_mode = #tpu.pipeline_mode<synchronous>, transform_indices = @transform_13, window_bounds = array<i64: 64, 32>}, {pipeline_mode = #tpu.pipeline_mode<synchronous>, transform_indices = @transform_14, window_bounds = array<i64: 1, 32>}, {transform_indices = @transform_15, window_bounds = array<i64: 1, 160, 32>}]} {
    %c0 = arith.constant 0 : index
    %c0_0 = arith.constant 0 : index
    %0 = vector.load %arg1[%c0, %c0_0] : memref<160x1xf32, #tpu.memory_space<vmem>>, vector<160x1xf32>
    %cst = arith.constant 5.000000e-01 : f32
    %1 = vector.broadcast %cst : f32 to vector<160x1xf32>
    %2 = arith.cmpf ogt, %0, %1 : vector<160x1xf32>
    %c0_1 = arith.constant 0 : index
    %c0_2 = arith.constant 0 : index
    %c0_3 = arith.constant 0 : index
    %3 = vector.load %arg2[%c0_1, %c0_2, %c0_3] : memref<1x160x32xbf16, #tpu.memory_space<vmem>>, vector<1x160x32xbf16>
    %4 = vector.shape_cast %3 : vector<1x160x32xbf16> to vector<160x32xbf16>
    %c0_4 = arith.constant 0 : index
    %c0_5 = arith.constant 0 : index
    %c0_6 = arith.constant 0 : index
    %5 = vector.load %arg3[%c0_4, %c0_5, %c0_6] : memref<1x160x32xbf16, #tpu.memory_space<vmem>>, vector<1x160x32xbf16>
    %6 = vector.shape_cast %5 : vector<1x160x32xbf16> to vector<160x32xbf16>
    %7 = tpu.concatenate %4, %6 in 1 : vector<160x32xbf16>, vector<160x32xbf16> -> vector<160x64xbf16>
    %8 = arith.extf %7 : vector<160x64xbf16> to vector<160x64xf32>
    %c0_7 = arith.constant 0 : index
    %c0_8 = arith.constant 0 : index
    %9 = vector.load %arg5[%c0_7, %c0_8] : memref<1x64xf32, #tpu.memory_space<vmem>>, vector<1x64xf32>
    %c0_9 = arith.constant 0 : index
    %c0_10 = arith.constant 0 : index
    %10 = vector.load %arg6[%c0_9, %c0_10] : memref<1x64xf32, #tpu.memory_space<vmem>>, vector<1x64xf32>
    %11 = tpu.iota {dimensions = array<i32: 0>} : vector<64x8xi32>
    %12 = tpu.iota {dimensions = array<i32: 1>} : vector<64x8xi32>
    %c8_i32 = arith.constant 8 : i32
    %13 = vector.broadcast %c8_i32 : i32 to vector<64x8xi32>
    %14 = arith.muli %12, %13 : vector<64x8xi32>
    %15 = arith.cmpi sge, %11, %14 : vector<64x8xi32>
    %c1_i32 = arith.constant 1 : i32
    %16 = vector.broadcast %c1_i32 : i32 to vector<64x8xi32>
    %17 = arith.addi %12, %16 : vector<64x8xi32>
    %c8_i32_11 = arith.constant 8 : i32
    %18 = vector.broadcast %c8_i32_11 : i32 to vector<64x8xi32>
    %19 = arith.muli %17, %18 : vector<64x8xi32>
    %20 = arith.cmpi slt, %11, %19 : vector<64x8xi32>
    %21 = arith.andi %15, %20 : vector<64x8xi1>
    %22 = arith.extui %21 : vector<64x8xi1> to vector<64x8xi32>
    %23 = arith.sitofp %22 : vector<64x8xi32> to vector<64x8xf32>
    %24 = tpu.iota {dimensions = array<i32: 0>} : vector<8x64xi32>
    %25 = tpu.iota {dimensions = array<i32: 1>} : vector<8x64xi32>
    %c8_i32_12 = arith.constant 8 : i32
    %26 = vector.broadcast %c8_i32_12 : i32 to vector<8x64xi32>
    %27 = arith.muli %24, %26 : vector<8x64xi32>
    %28 = arith.cmpi sge, %25, %27 : vector<8x64xi32>
    %c1_i32_13 = arith.constant 1 : i32
    %29 = vector.broadcast %c1_i32_13 : i32 to vector<8x64xi32>
    %30 = arith.addi %24, %29 : vector<8x64xi32>
    %c8_i32_14 = arith.constant 8 : i32
    %31 = vector.broadcast %c8_i32_14 : i32 to vector<8x64xi32>
    %32 = arith.muli %30, %31 : vector<8x64xi32>
    %33 = arith.cmpi slt, %25, %32 : vector<8x64xi32>
    %34 = arith.andi %28, %33 : vector<8x64xi1>
    %35 = arith.extui %34 : vector<8x64xi1> to vector<8x64xi32>
    %36 = arith.sitofp %35 : vector<8x64xi32> to vector<8x64xf32>
    %cst_15 = arith.constant dense<0.000000e+00> : vector<64xf32>
    %37 = vector.multi_reduction <add>, %8, %cst_15 [0] : vector<160x64xf32> to vector<64xf32>
    %38 = vector.shape_cast %37 : vector<64xf32> to vector<1x64xf32>
    %39 = arith.mulf %8, %8 : vector<160x64xf32>
    %cst_16 = arith.constant dense<0.000000e+00> : vector<64xf32>
    %40 = vector.multi_reduction <add>, %39, %cst_16 [0] : vector<160x64xf32> to vector<64xf32>
    %41 = vector.shape_cast %40 : vector<64xf32> to vector<1x64xf32>
    %42 = tpu.concatenate %38, %41 in 0 : vector<1x64xf32>, vector<1x64xf32> -> vector<2x64xf32>
    %cst_17 = arith.constant dense<0.000000e+00> : vector<2x8xf32>
    %43 = tpu.matmul %42, %23, %cst_17 {dimension_numbers = #tpu.dot_dimension_numbers<[1], [0], [0], [1], [0, 0, 1, 1], [], []>} : vector<2x64xf32>, vector<64x8xf32>, vector<2x8xf32> -> vector<2x8xf32>
    %cst_18 = arith.constant 0.001953125 : f32
    %44 = vector.broadcast %cst_18 : f32 to vector<2x8xf32>
    %45 = arith.mulf %43, %44 : vector<2x8xf32>
    %46 = vector.extract_strided_slice %45 {offsets = [0, 0], sizes = [1, 8], strides = [1, 1]} : vector<2x8xf32> to vector<1x8xf32>
    %47 = vector.extract_strided_slice %45 {offsets = [1, 0], sizes = [1, 8], strides = [1, 1]} : vector<2x8xf32> to vector<1x8xf32>
    %48 = arith.mulf %46, %46 : vector<1x8xf32>
    %49 = arith.subf %47, %48 : vector<1x8xf32>
    %cst_19 = arith.constant 9.99999997E-7 : f32
    %50 = vector.broadcast %cst_19 : f32 to vector<1x8xf32>
    %51 = arith.addf %49, %50 : vector<1x8xf32>
    %52 = math.rsqrt %51 : vector<1x8xf32>
    %53 = tpu.concatenate %46, %52 in 0 : vector<1x8xf32>, vector<1x8xf32> -> vector<2x8xf32>
    %cst_20 = arith.constant dense<0.000000e+00> : vector<2x64xf32>
    %54 = tpu.matmul %53, %36, %cst_20 {dimension_numbers = #tpu.dot_dimension_numbers<[1], [0], [0], [1], [0, 0, 1, 1], [], []>} : vector<2x8xf32>, vector<8x64xf32>, vector<2x64xf32> -> vector<2x64xf32>
    %55 = vector.extract_strided_slice %54 {offsets = [0, 0], sizes = [1, 64], strides = [1, 1]} : vector<2x64xf32> to vector<1x64xf32>
    %56 = vector.broadcast %55 : vector<1x64xf32> to vector<160x64xf32>
    %57 = arith.subf %8, %56 : vector<160x64xf32>
    %58 = vector.extract_strided_slice %54 {offsets = [1, 0], sizes = [1, 64], strides = [1, 1]} : vector<2x64xf32> to vector<1x64xf32>
    %59 = vector.broadcast %58 : vector<1x64xf32> to vector<160x64xf32>
    %60 = arith.mulf %57, %59 : vector<160x64xf32>
    %61 = vector.broadcast %9 : vector<1x64xf32> to vector<160x64xf32>
    %62 = arith.mulf %60, %61 : vector<160x64xf32>
    %63 = vector.broadcast %10 : vector<1x64xf32> to vector<160x64xf32>
    %64 = arith.addf %62, %63 : vector<160x64xf32>
    %65 = arith.negf %64 : vector<160x64xf32>
    %66 = math.exp %65 : vector<160x64xf32>
    %cst_21 = arith.constant 1.000000e+00 : f32
    %67 = vector.broadcast %cst_21 : f32 to vector<160x64xf32>
    %68 = arith.addf %67, %66 : vector<160x64xf32>
    %69 = arith.divf %67, %68 : vector<160x64xf32>
    %70 = arith.mulf %64, %69 : vector<160x64xf32>
    %cst_22 = arith.constant 0.000000e+00 : f32
    %71 = vector.shape_cast %2 : vector<160x1xi1> to vector<160x1xi1>
    %72 = vector.broadcast %71 : vector<160x1xi1> to vector<160x64xi1>
    %73 = vector.broadcast %cst_22 : f32 to vector<160x64xf32>
    %74 = arith.select %72, %70, %73 : vector<160x64xi1>, vector<160x64xf32>
    %c1_i32_23 = arith.constant 1 : i32
    %75 = tpu.dynamic_rotate %74 by %c1_i32_23 dim 0 : vector<160x64xf32>, i32 -> vector<160x64xf32>
    %c159_i32 = arith.constant 159 : i32
    %76 = tpu.dynamic_rotate %74 by %c159_i32 dim 0 : vector<160x64xf32>, i32 -> vector<160x64xf32>
    %77 = tpu.concatenate %75, %74, %76 in 1 : vector<160x64xf32>, vector<160x64xf32>, vector<160x64xf32> -> vector<160x192xf32>
    %cst_24 = arith.constant 0.000000e+00 : bf16
    %78 = vector.broadcast %cst_24 : bf16 to vector<16x192xbf16>
    %c0_25 = arith.constant 0 : index
    %c0_26 = arith.constant 0 : index
    %79 = vector.load %arg17[%c0_25, %c0_26] : memref<192x192xbf16, #tpu.memory_space<vmem>>, vector<16x192xbf16>
    tpu.vector_store %arg17[%c0_25, %c0_26], %78 {strides = array<i32>} : memref<192x192xbf16, #tpu.memory_space<vmem>>, vector<16x192xbf16>,
    %c176 = arith.constant 176 : index
    %c0_27 = arith.constant 0 : index
    %80 = vector.load %arg17[%c176, %c0_27] : memref<192x192xbf16, #tpu.memory_space<vmem>>, vector<16x192xbf16>
    tpu.vector_store %arg17[%c176, %c0_27], %78 {strides = array<i32>} : memref<192x192xbf16, #tpu.memory_space<vmem>>, vector<16x192xbf16>,
    %81 = arith.truncf %77 : vector<160x192xf32> to vector<160x192xbf16>
    %c16 = arith.constant 16 : index
    %c0_28 = arith.constant 0 : index
    %82 = vector.load %arg17[%c16, %c0_28] : memref<192x192xbf16, #tpu.memory_space<vmem>>, vector<160x192xbf16>
    tpu.vector_store %arg17[%c16, %c0_28], %81 {strides = array<i32>} : memref<192x192xbf16, #tpu.memory_space<vmem>>, vector<160x192xbf16>,
    %c0_29 = arith.constant 0 : index
    %c0_30 = arith.constant 0 : index
    %83 = vector.load %arg17[%c0_29, %c0_30] : memref<192x192xbf16, #tpu.memory_space<vmem>>, vector<160x192xbf16>
    %c0_31 = arith.constant 0 : index
    %c0_32 = arith.constant 0 : index
    %c0_33 = arith.constant 0 : index
    %84 = vector.load %arg7[%c0_31, %c0_32, %c0_33] : memref<3x192x32xbf16, #tpu.memory_space<vmem>>, vector<1x192x32xbf16>
    %85 = vector.shape_cast %84 : vector<1x192x32xbf16> to vector<192x32xbf16>
    %cst_34 = arith.constant dense<0.000000e+00> : vector<160x32xf32>
    %86 = tpu.matmul %83, %85, %cst_34 {dimension_numbers = #tpu.dot_dimension_numbers<[1], [0], [0], [1], [0, 0, 1, 1], [], []>} : vector<160x192xbf16>, vector<192x32xbf16>, vector<160x32xf32> -> vector<160x32xf32>
    %c16_35 = arith.constant 16 : index
    %c0_36 = arith.constant 0 : index
    %87 = vector.load %arg17[%c16_35, %c0_36] : memref<192x192xbf16, #tpu.memory_space<vmem>>, vector<160x192xbf16>
    %c1 = arith.constant 1 : index
    %c0_37 = arith.constant 0 : index
    %c0_38 = arith.constant 0 : index
    %88 = vector.load %arg7[%c1, %c0_37, %c0_38] : memref<3x192x32xbf16, #tpu.memory_space<vmem>>, vector<1x192x32xbf16>
    %89 = vector.shape_cast %88 : vector<1x192x32xbf16> to vector<192x32xbf16>
    %cst_39 = arith.constant dense<0.000000e+00> : vector<160x32xf32>
    %90 = tpu.matmul %87, %89, %cst_39 {dimension_numbers = #tpu.dot_dimension_numbers<[1], [0], [0], [1], [0, 0, 1, 1], [], []>} : vector<160x192xbf16>, vector<192x32xbf16>, vector<160x32xf32> -> vector<160x32xf32>
    %91 = arith.addf %86, %90 : vector<160x32xf32>
    %c32 = arith.constant 32 : index
    %c0_40 = arith.constant 0 : index
    %92 = vector.load %arg17[%c32, %c0_40] : memref<192x192xbf16, #tpu.memory_space<vmem>>, vector<160x192xbf16>
    %c2 = arith.constant 2 : index
    %c0_41 = arith.constant 0 : index
    %c0_42 = arith.constant 0 : index
    %93 = vector.load %arg7[%c2, %c0_41, %c0_42] : memref<3x192x32xbf16, #tpu.memory_space<vmem>>, vector<1x192x32xbf16>
    %94 = vector.shape_cast %93 : vector<1x192x32xbf16> to vector<192x32xbf16>
    %cst_43 = arith.constant dense<0.000000e+00> : vector<160x32xf32>
    %95 = tpu.matmul %92, %94, %cst_43 {dimension_numbers = #tpu.dot_dimension_numbers<[1], [0], [0], [1], [0, 0, 1, 1], [], []>} : vector<160x192xbf16>, vector<192x32xbf16>, vector<160x32xf32> -> vector<160x32xf32>
    %96 = arith.addf %91, %95 : vector<160x32xf32>
    %c0_44 = arith.constant 0 : index
    %c0_45 = arith.constant 0 : index
    %c0_46 = arith.constant 0 : index
    %97 = vector.load %arg4[%c0_44, %c0_45, %c0_46] : memref<1x1x64xf32, #tpu.memory_space<vmem>>, vector<1x1x64xf32>
    %98 = vector.shape_cast %97 : vector<1x1x64xf32> to vector<1x64xf32>
    %99 = arith.negf %98 : vector<1x64xf32>
    %100 = math.exp %99 : vector<1x64xf32>
    %cst_47 = arith.constant 1.000000e+00 : f32
    %101 = vector.broadcast %cst_47 : f32 to vector<1x64xf32>
    %102 = arith.addf %101, %100 : vector<1x64xf32>
    %103 = arith.divf %101, %102 : vector<1x64xf32>
    %104 = arith.mulf %98, %103 : vector<1x64xf32>
    %c0_48 = arith.constant 0 : index
    %c0_49 = arith.constant 0 : index
    %105 = vector.load %arg8[%c0_48, %c0_49] : memref<64x32xf32, #tpu.memory_space<vmem>>, vector<64x32xf32>
    %cst_50 = arith.constant dense<0.000000e+00> : vector<1x32xf32>
    %106 = tpu.matmul %104, %105, %cst_50 {dimension_numbers = #tpu.dot_dimension_numbers<[1], [0], [0], [1], [0, 0, 1, 1], [], []>} : vector<1x64xf32>, vector<64x32xf32>, vector<1x32xf32> -> vector<1x32xf32>
    %c0_51 = arith.constant 0 : index
    %c0_52 = arith.constant 0 : index
    %107 = vector.load %arg9[%c0_51, %c0_52] : memref<1x32xf32, #tpu.memory_space<vmem>>, vector<1x32xf32>
    %108 = vector.broadcast %107 : vector<1x32xf32> to vector<160x32xf32>
    %109 = arith.addf %96, %108 : vector<160x32xf32>
    %110 = vector.broadcast %106 : vector<1x32xf32> to vector<160x32xf32>
    %111 = arith.addf %109, %110 : vector<160x32xf32>
    %cst_53 = arith.constant 0.000000e+00 : f32
    %112 = vector.shape_cast %2 : vector<160x1xi1> to vector<160x1xi1>
    %113 = vector.broadcast %112 : vector<160x1xi1> to vector<160x32xi1>
    %114 = vector.broadcast %cst_53 : f32 to vector<160x32xf32>
    %115 = arith.select %113, %111, %114 : vector<160x32xi1>, vector<160x32xf32>
    %c0_54 = arith.constant 0 : index
    %c0_55 = arith.constant 0 : index
    %116 = vector.load %arg10[%c0_54, %c0_55] : memref<1x32xf32, #tpu.memory_space<vmem>>, vector<1x32xf32>
    %c0_56 = arith.constant 0 : index
    %c0_57 = arith.constant 0 : index
    %117 = vector.load %arg11[%c0_56, %c0_57] : memref<1x32xf32, #tpu.memory_space<vmem>>, vector<1x32xf32>
    %118 = tpu.iota {dimensions = array<i32: 0>} : vector<32x8xi32>
    %119 = tpu.iota {dimensions = array<i32: 1>} : vector<32x8xi32>
    %c4_i32 = arith.constant 4 : i32
    %120 = vector.broadcast %c4_i32 : i32 to vector<32x8xi32>
    %121 = arith.muli %119, %120 : vector<32x8xi32>
    %122 = arith.cmpi sge, %118, %121 : vector<32x8xi32>
    %c1_i32_58 = arith.constant 1 : i32
    %123 = vector.broadcast %c1_i32_58 : i32 to vector<32x8xi32>
    %124 = arith.addi %119, %123 : vector<32x8xi32>
    %c4_i32_59 = arith.constant 4 : i32
    %125 = vector.broadcast %c4_i32_59 : i32 to vector<32x8xi32>
    %126 = arith.muli %124, %125 : vector<32x8xi32>
    %127 = arith.cmpi slt, %118, %126 : vector<32x8xi32>
    %128 = arith.andi %122, %127 : vector<32x8xi1>
    %129 = arith.extui %128 : vector<32x8xi1> to vector<32x8xi32>
    %130 = arith.sitofp %129 : vector<32x8xi32> to vector<32x8xf32>
    %131 = tpu.iota {dimensions = array<i32: 0>} : vector<8x32xi32>
    %132 = tpu.iota {dimensions = array<i32: 1>} : vector<8x32xi32>
    %c4_i32_60 = arith.constant 4 : i32
    %133 = vector.broadcast %c4_i32_60 : i32 to vector<8x32xi32>
    %134 = arith.muli %131, %133 : vector<8x32xi32>
    %135 = arith.cmpi sge, %132, %134 : vector<8x32xi32>
    %c1_i32_61 = arith.constant 1 : i32
    %136 = vector.broadcast %c1_i32_61 : i32 to vector<8x32xi32>
    %137 = arith.addi %131, %136 : vector<8x32xi32>
    %c4_i32_62 = arith.constant 4 : i32
    %138 = vector.broadcast %c4_i32_62 : i32 to vector<8x32xi32>
    %139 = arith.muli %137, %138 : vector<8x32xi32>
    %140 = arith.cmpi slt, %132, %139 : vector<8x32xi32>
    %141 = arith.andi %135, %140 : vector<8x32xi1>
    %142 = arith.extui %141 : vector<8x32xi1> to vector<8x32xi32>
    %143 = arith.sitofp %142 : vector<8x32xi32> to vector<8x32xf32>
    %cst_63 = arith.constant dense<0.000000e+00> : vector<32xf32>
    %144 = vector.multi_reduction <add>, %115, %cst_63 [0] : vector<160x32xf32> to vector<32xf32>
    %145 = vector.shape_cast %144 : vector<32xf32> to vector<1x32xf32>
    %146 = arith.mulf %115, %115 : vector<160x32xf32>
    %cst_64 = arith.constant dense<0.000000e+00> : vector<32xf32>
    %147 = vector.multi_reduction <add>, %146, %cst_64 [0] : vector<160x32xf32> to vector<32xf32>
    %148 = vector.shape_cast %147 : vector<32xf32> to vector<1x32xf32>
    %149 = tpu.concatenate %145, %148 in 0 : vector<1x32xf32>, vector<1x32xf32> -> vector<2x32xf32>
    %cst_65 = arith.constant dense<0.000000e+00> : vector<2x8xf32>
    %150 = tpu.matmul %149, %130, %cst_65 {dimension_numbers = #tpu.dot_dimension_numbers<[1], [0], [0], [1], [0, 0, 1, 1], [], []>} : vector<2x32xf32>, vector<32x8xf32>, vector<2x8xf32> -> vector<2x8xf32>
    %cst_66 = arith.constant 3.906250e-03 : f32
    %151 = vector.broadcast %cst_66 : f32 to vector<2x8xf32>
    %152 = arith.mulf %150, %151 : vector<2x8xf32>
    %153 = vector.extract_strided_slice %152 {offsets = [0, 0], sizes = [1, 8], strides = [1, 1]} : vector<2x8xf32> to vector<1x8xf32>
    %154 = vector.extract_strided_slice %152 {offsets = [1, 0], sizes = [1, 8], strides = [1, 1]} : vector<2x8xf32> to vector<1x8xf32>
    %155 = arith.mulf %153, %153 : vector<1x8xf32>
    %156 = arith.subf %154, %155 : vector<1x8xf32>
    %cst_67 = arith.constant 9.99999997E-7 : f32
    %157 = vector.broadcast %cst_67 : f32 to vector<1x8xf32>
    %158 = arith.addf %156, %157 : vector<1x8xf32>
    %159 = math.rsqrt %158 : vector<1x8xf32>
    %160 = tpu.concatenate %153, %159 in 0 : vector<1x8xf32>, vector<1x8xf32> -> vector<2x8xf32>
    %cst_68 = arith.constant dense<0.000000e+00> : vector<2x32xf32>
    %161 = tpu.matmul %160, %143, %cst_68 {dimension_numbers = #tpu.dot_dimension_numbers<[1], [0], [0], [1], [0, 0, 1, 1], [], []>} : vector<2x8xf32>, vector<8x32xf32>, vector<2x32xf32> -> vector<2x32xf32>
    %162 = vector.extract_strided_slice %161 {offsets = [0, 0], sizes = [1, 32], strides = [1, 1]} : vector<2x32xf32> to vector<1x32xf32>
    %163 = vector.broadcast %162 : vector<1x32xf32> to vector<160x32xf32>
    %164 = arith.subf %115, %163 : vector<160x32xf32>
    %165 = vector.extract_strided_slice %161 {offsets = [1, 0], sizes = [1, 32], strides = [1, 1]} : vector<2x32xf32> to vector<1x32xf32>
    %166 = vector.broadcast %165 : vector<1x32xf32> to vector<160x32xf32>
    %167 = arith.mulf %164, %166 : vector<160x32xf32>
    %168 = vector.broadcast %116 : vector<1x32xf32> to vector<160x32xf32>
    %169 = arith.mulf %167, %168 : vector<160x32xf32>
    %170 = vector.broadcast %117 : vector<1x32xf32> to vector<160x32xf32>
    %171 = arith.addf %169, %170 : vector<160x32xf32>
    %172 = arith.negf %171 : vector<160x32xf32>
    %173 = math.exp %172 : vector<160x32xf32>
    %cst_69 = arith.constant 1.000000e+00 : f32
    %174 = vector.broadcast %cst_69 : f32 to vector<160x32xf32>
    %175 = arith.addf %174, %173 : vector<160x32xf32>
    %176 = arith.divf %174, %175 : vector<160x32xf32>
    %177 = arith.mulf %171, %176 : vector<160x32xf32>
    %cst_70 = arith.constant 0.000000e+00 : f32
    %178 = vector.shape_cast %2 : vector<160x1xi1> to vector<160x1xi1>
    %179 = vector.broadcast %178 : vector<160x1xi1> to vector<160x32xi1>
    %180 = vector.broadcast %cst_70 : f32 to vector<160x32xf32>
    %181 = arith.select %179, %177, %180 : vector<160x32xi1>, vector<160x32xf32>
    %c1_i32_71 = arith.constant 1 : i32
    %182 = tpu.dynamic_rotate %181 by %c1_i32_71 dim 0 : vector<160x32xf32>, i32 -> vector<160x32xf32>
    %c159_i32_72 = arith.constant 159 : i32
    %183 = tpu.dynamic_rotate %181 by %c159_i32_72 dim 0 : vector<160x32xf32>, i32 -> vector<160x32xf32>
    %184 = tpu.concatenate %182, %181, %183 in 1 : vector<160x32xf32>, vector<160x32xf32>, vector<160x32xf32> -> vector<160x96xf32>
    %cst_73 = arith.constant 0.000000e+00 : bf16
    %185 = vector.broadcast %cst_73 : bf16 to vector<16x96xbf16>
    %c0_74 = arith.constant 0 : index
    %c0_75 = arith.constant 0 : index
    %186 = vector.load %arg18[%c0_74, %c0_75] : memref<192x96xbf16, #tpu.memory_space<vmem>>, vector<16x96xbf16>
    tpu.vector_store %arg18[%c0_74, %c0_75], %185 {strides = array<i32>} : memref<192x96xbf16, #tpu.memory_space<vmem>>, vector<16x96xbf16>,
    %c176_76 = arith.constant 176 : index
    %c0_77 = arith.constant 0 : index
    %187 = vector.load %arg18[%c176_76, %c0_77] : memref<192x96xbf16, #tpu.memory_space<vmem>>, vector<16x96xbf16>
    tpu.vector_store %arg18[%c176_76, %c0_77], %185 {strides = array<i32>} : memref<192x96xbf16, #tpu.memory_space<vmem>>, vector<16x96xbf16>,
    %188 = arith.truncf %184 : vector<160x96xf32> to vector<160x96xbf16>
    %c16_78 = arith.constant 16 : index
    %c0_79 = arith.constant 0 : index
    %189 = vector.load %arg18[%c16_78, %c0_79] : memref<192x96xbf16, #tpu.memory_space<vmem>>, vector<160x96xbf16>
    tpu.vector_store %arg18[%c16_78, %c0_79], %188 {strides = array<i32>} : memref<192x96xbf16, #tpu.memory_space<vmem>>, vector<160x96xbf16>,
    %c0_80 = arith.constant 0 : index
    %c0_81 = arith.constant 0 : index
    %190 = vector.load %arg18[%c0_80, %c0_81] : memref<192x96xbf16, #tpu.memory_space<vmem>>, vector<160x96xbf16>
    %c0_82 = arith.constant 0 : index
    %c0_83 = arith.constant 0 : index
    %c0_84 = arith.constant 0 : index
    %191 = vector.load %arg12[%c0_82, %c0_83, %c0_84] : memref<3x96x32xbf16, #tpu.memory_space<vmem>>, vector<1x96x32xbf16>
    %192 = vector.shape_cast %191 : vector<1x96x32xbf16> to vector<96x32xbf16>
    %cst_85 = arith.constant dense<0.000000e+00> : vector<160x32xf32>
    %193 = tpu.matmul %190, %192, %cst_85 {dimension_numbers = #tpu.dot_dimension_numbers<[1], [0], [0], [1], [0, 0, 1, 1], [], []>} : vector<160x96xbf16>, vector<96x32xbf16>, vector<160x32xf32> -> vector<160x32xf32>
    %c16_86 = arith.constant 16 : index
    %c0_87 = arith.constant 0 : index
    %194 = vector.load %arg18[%c16_86, %c0_87] : memref<192x96xbf16, #tpu.memory_space<vmem>>, vector<160x96xbf16>
    %c1_88 = arith.constant 1 : index
    %c0_89 = arith.constant 0 : index
    %c0_90 = arith.constant 0 : index
    %195 = vector.load %arg12[%c1_88, %c0_89, %c0_90] : memref<3x96x32xbf16, #tpu.memory_space<vmem>>, vector<1x96x32xbf16>
    %196 = vector.shape_cast %195 : vector<1x96x32xbf16> to vector<96x32xbf16>
    %cst_91 = arith.constant dense<0.000000e+00> : vector<160x32xf32>
    %197 = tpu.matmul %194, %196, %cst_91 {dimension_numbers = #tpu.dot_dimension_numbers<[1], [0], [0], [1], [0, 0, 1, 1], [], []>} : vector<160x96xbf16>, vector<96x32xbf16>, vector<160x32xf32> -> vector<160x32xf32>
    %198 = arith.addf %193, %197 : vector<160x32xf32>
    %c32_92 = arith.constant 32 : index
    %c0_93 = arith.constant 0 : index
    %199 = vector.load %arg18[%c32_92, %c0_93] : memref<192x96xbf16, #tpu.memory_space<vmem>>, vector<160x96xbf16>
    %c2_94 = arith.constant 2 : index
    %c0_95 = arith.constant 0 : index
    %c0_96 = arith.constant 0 : index
    %200 = vector.load %arg12[%c2_94, %c0_95, %c0_96] : memref<3x96x32xbf16, #tpu.memory_space<vmem>>, vector<1x96x32xbf16>
    %201 = vector.shape_cast %200 : vector<1x96x32xbf16> to vector<96x32xbf16>
    %cst_97 = arith.constant dense<0.000000e+00> : vector<160x32xf32>
    %202 = tpu.matmul %199, %201, %cst_97 {dimension_numbers = #tpu.dot_dimension_numbers<[1], [0], [0], [1], [0, 0, 1, 1], [], []>} : vector<160x96xbf16>, vector<96x32xbf16>, vector<160x32xf32> -> vector<160x32xf32>
    %203 = arith.addf %198, %202 : vector<160x32xf32>
    %c0_98 = arith.constant 0 : index
    %c0_99 = arith.constant 0 : index
    %204 = vector.load %arg13[%c0_98, %c0_99] : memref<1x32xf32, #tpu.memory_space<vmem>>, vector<1x32xf32>
    %205 = vector.broadcast %204 : vector<1x32xf32> to vector<160x32xf32>
    %206 = arith.addf %203, %205 : vector<160x32xf32>
    %c0_100 = arith.constant 0 : index
    %c0_101 = arith.constant 0 : index
    %207 = vector.load %arg14[%c0_100, %c0_101] : memref<64x32xbf16, #tpu.memory_space<vmem>>, vector<64x32xbf16>
    %cst_102 = arith.constant dense<0.000000e+00> : vector<160x32xf32>
    %208 = tpu.matmul %7, %207, %cst_102 {dimension_numbers = #tpu.dot_dimension_numbers<[1], [0], [0], [1], [0, 0, 1, 1], [], []>} : vector<160x64xbf16>, vector<64x32xbf16>, vector<160x32xf32> -> vector<160x32xf32>
    %c0_103 = arith.constant 0 : index
    %c0_104 = arith.constant 0 : index
    %209 = vector.load %arg15[%c0_103, %c0_104] : memref<1x32xf32, #tpu.memory_space<vmem>>, vector<1x32xf32>
    %210 = vector.broadcast %209 : vector<1x32xf32> to vector<160x32xf32>
    %211 = arith.addf %208, %210 : vector<160x32xf32>
    %212 = arith.addf %206, %211 : vector<160x32xf32>
    %cst_105 = arith.constant 1.000000e+00 : f32
    %213 = vector.broadcast %cst_105 : f32 to vector<160x32xf32>
    %214 = arith.mulf %212, %213 : vector<160x32xf32>
    %cst_106 = arith.constant 0.000000e+00 : f32
    %215 = vector.shape_cast %2 : vector<160x1xi1> to vector<160x1xi1>
    %216 = vector.broadcast %215 : vector<160x1xi1> to vector<160x32xi1>
    %217 = vector.broadcast %cst_106 : f32 to vector<160x32xf32>
    %218 = arith.select %216, %214, %217 : vector<160x32xi1>, vector<160x32xf32>
    %219 = arith.truncf %218 : vector<160x32xf32> to vector<160x32xbf16>
    %c0_107 = arith.constant 0 : index
    %c0_108 = arith.constant 0 : index
    %c0_109 = arith.constant 0 : index
    %220 = vector.load %arg16[%c0_107, %c0_108, %c0_109] : memref<1x160x32xbf16, #tpu.memory_space<vmem>>, vector<1x160x32xbf16>
    %221 = vector.shape_cast %220 : vector<1x160x32xbf16> to vector<160x32xbf16>
    %222 = vector.shape_cast %219 : vector<160x32xbf16> to vector<1x160x32xbf16>
    tpu.vector_store %arg16[%c0_107, %c0_108, %c0_109], %222 {strides = array<i32>} : memref<1x160x32xbf16, #tpu.memory_space<vmem>>, vector<1x160x32xbf16>,
    return
  }
  func.func @transform_0(%arg0: i32) -> (i32, i32) {
    %c0_i32 = arith.constant 0 : i32
    %c0_i32_0 = arith.constant 0 : i32
    %c0_i32_1 = arith.constant 0 : i32
    return %c0_i32, %c0_i32_0 : i32, i32
  }
  func.func @transform_1(%arg0: i32) -> (i32, i32, i32) {
    %c0_i32 = arith.constant 0 : i32
    %c0_i32_0 = arith.constant 0 : i32
    %c0_i32_1 = arith.constant 0 : i32
    return %arg0, %c0_i32, %c0_i32_0 : i32, i32, i32
  }
  func.func @transform_2(%arg0: i32) -> (i32, i32, i32) {
    %c0_i32 = arith.constant 0 : i32
    %c0_i32_0 = arith.constant 0 : i32
    %c0_i32_1 = arith.constant 0 : i32
    return %arg0, %c0_i32, %c0_i32_0 : i32, i32, i32
  }
  func.func @transform_3(%arg0: i32) -> (i32, i32, i32) {
    %c0_i32 = arith.constant 0 : i32
    %c0_i32_0 = arith.constant 0 : i32
    %c0_i32_1 = arith.constant 0 : i32
    return %arg0, %c0_i32, %c0_i32_0 : i32, i32, i32
  }
  func.func @transform_4(%arg0: i32) -> (i32, i32) {
    %c0_i32 = arith.constant 0 : i32
    %c0_i32_0 = arith.constant 0 : i32
    %c0_i32_1 = arith.constant 0 : i32
    return %c0_i32, %c0_i32_0 : i32, i32
  }
  func.func @transform_5(%arg0: i32) -> (i32, i32) {
    %c0_i32 = arith.constant 0 : i32
    %c0_i32_0 = arith.constant 0 : i32
    %c0_i32_1 = arith.constant 0 : i32
    return %c0_i32, %c0_i32_0 : i32, i32
  }
  func.func @transform_6(%arg0: i32) -> (i32, i32, i32) {
    %c0_i32 = arith.constant 0 : i32
    %c0_i32_0 = arith.constant 0 : i32
    %c0_i32_1 = arith.constant 0 : i32
    %c0_i32_2 = arith.constant 0 : i32
    return %c0_i32, %c0_i32_0, %c0_i32_1 : i32, i32, i32
  }
  func.func @transform_7(%arg0: i32) -> (i32, i32) {
    %c0_i32 = arith.constant 0 : i32
    %c0_i32_0 = arith.constant 0 : i32
    %c0_i32_1 = arith.constant 0 : i32
    return %c0_i32, %c0_i32_0 : i32, i32
  }
  func.func @transform_8(%arg0: i32) -> (i32, i32) {
    %c0_i32 = arith.constant 0 : i32
    %c0_i32_0 = arith.constant 0 : i32
    %c0_i32_1 = arith.constant 0 : i32
    return %c0_i32, %c0_i32_0 : i32, i32
  }
  func.func @transform_9(%arg0: i32) -> (i32, i32) {
    %c0_i32 = arith.constant 0 : i32
    %c0_i32_0 = arith.constant 0 : i32
    %c0_i32_1 = arith.constant 0 : i32
    return %c0_i32, %c0_i32_0 : i32, i32
  }
  func.func @transform_10(%arg0: i32) -> (i32, i32) {
    %c0_i32 = arith.constant 0 : i32
    %c0_i32_0 = arith.constant 0 : i32
    %c0_i32_1 = arith.constant 0 : i32
    return %c0_i32, %c0_i32_0 : i32, i32
  }
  func.func @transform_11(%arg0: i32) -> (i32, i32, i32) {
    %c0_i32 = arith.constant 0 : i32
    %c0_i32_0 = arith.constant 0 : i32
    %c0_i32_1 = arith.constant 0 : i32
    %c0_i32_2 = arith.constant 0 : i32
    return %c0_i32, %c0_i32_0, %c0_i32_1 : i32, i32, i32
  }
  func.func @transform_12(%arg0: i32) -> (i32, i32) {
    %c0_i32 = arith.constant 0 : i32
    %c0_i32_0 = arith.constant 0 : i32
    %c0_i32_1 = arith.constant 0 : i32
    return %c0_i32, %c0_i32_0 : i32, i32
  }
  func.func @transform_13(%arg0: i32) -> (i32, i32) {
    %c0_i32 = arith.constant 0 : i32
    %c0_i32_0 = arith.constant 0 : i32
    %c0_i32_1 = arith.constant 0 : i32
    return %c0_i32, %c0_i32_0 : i32, i32
  }
  func.func @transform_14(%arg0: i32) -> (i32, i32) {
    %c0_i32 = arith.constant 0 : i32
    %c0_i32_0 = arith.constant 0 : i32
    %c0_i32_1 = arith.constant 0 : i32
    return %c0_i32, %c0_i32_0 : i32, i32
  }
  func.func @transform_15(%arg0: i32) -> (i32, i32, i32) {
    %c0_i32 = arith.constant 0 : i32
    %c0_i32_0 = arith.constant 0 : i32
    %c0_i32_1 = arith.constant 0 : i32
    return %arg0, %c0_i32, %c0_i32_0 : i32, i32, i32
  }
}

</mosaic_0001>

<bundles_post_ra>
// kernel: tpu_custom_call.1
= control target key start
LH: loop header
LB: loop body
LE: loop exit
PB: predicated region body
PF: predicated region fallthrough
CT: control target
= control target key end

     0   :  { %s6327_s18 = smov 0   ;;  %s8947_s0 = inlined_call_operand.vmem [shape: f32[160,1], index: 0, kind: input, shape index: {}]   ;;  %s8948_s1 = inlined_call_operand.vmem [shape: bf16[2,160,32], index: 1, kind: input, shape index: {}]   ;;  %s8949_s2 = inlined_call_operand.vmem [shape: bf16[2,160,32], index: 2, kind: input, shape index: {}]   ;;  %s8950_s3 = inlined_call_operand.vmem [shape: f32[2,1,64], index: 3, kind: input, shape index: {}]   ;;  %s8951_s4 = inlined_call_operand.vmem [shape: f32[1,64], index: 4, kind: input, shape index: {}]   ;;  %s8952_s5 = inlined_call_operand.vmem [shape: f32[1,64], index: 5, kind: input, shape index: {}]   ;;  %s8953_s6 = inlined_call_operand.vmem [shape: bf16[3,192,32], index: 6, kind: input, shape index: {}]   ;;  %s8954_s7 = inlined_call_operand.vmem [shape: f32[64,32], index: 7, kind: input, shape index: {}]   ;;  %s8955_s8 = inlined_call_operand.vmem [shape: f32[1,32], index: 8, kind: input, shape index: {}]   ;;  %s8956_s9 = inlined_call_operand.vmem [shape: f32[1,32], index: 9, kind: input, shape index: {}]   ;;  %s8957_s10 = inlined_call_operand.vmem [shape: f32[1,32], index: 10, kind: input, shape index: {}]   ;;  %s8958_s11 = inlined_call_operand.vmem [shape: bf16[3,96,32], index: 11, kind: input, shape index: {}]   ;;  %s8959_s12 = inlined_call_operand.vmem [shape: f32[1,32], index: 12, kind: input, shape index: {}]   ;;  %s8960_s13 = inlined_call_operand.vmem [shape: bf16[64,32], index: 13, kind: input, shape index: {}]   ;;  %s8961_s14 = inlined_call_operand.vmem [shape: f32[1,32], index: 14, kind: input, shape index: {}]   ;;  %s8962_s15 = inlined_call_operand.vmem [shape: bf16[2,160,32], index: 15, kind: output, shape index: {}]  }
   0x1 LB: > { %s4990_s19 = sadd.s32 4294967295, %s6239_s18   ;;  %p4994_p0 = scmp.ge.s32.totalorder %s6239_s18, 1  ;;  %s6239_s18 = sphi %s6327_s18, %s25_s18  }
   0x2   : > { %p455_p1 = scmp.lt.s32.totalorder %s6239_s18, 3 }
   0x4   : > { %p456_p2 = pnand %p4994_p0, %p455_p1 }
   0x6   : > { %459 = sbr.rel (%p456_p2) target bundleno = 2068 (0x814), region = 80 }
   0xb   : > { %p511_p3 = scmp.lt.s32.totalorder %s4990_s19, 1  ;;  %s6241_s24 = smov 32   ;;  %v793_v10 = vlaneseq  ;;  %v8966_v18 = vmov 0.0   ;;  %v8964_v19 = vmov 1.0  }
   0xc   : > { %5573 = vmatprep.subr.mxu0 %v8966_v18 }
   0xd   : > { %s9363_s19 = smov (!%p511_p3, %s4990_s19), 1  ;;  %v6360_v11 = vand.u32 127, %v793_v10  ;;  %v6362_v12 = vshrl.u32 %v793_v10, 7 }
   0xe   : > { %s6338_s20 = smul.u32 80, %s9363_s19  ;;  %s523_s25 = scalar_lea.vmem %s8950_s3, %s9363_s19 }
   0xf   : > { %v6365_v13 = vadd.s32 1, %v6360_v11  ;;  %v801_v14 = vadd.s32 56, %v6362_v12  ;;  %v804_v15 = vmul.u32 8, %v6360_v11  ;;  %v800_v17 = vadd.s32 48, %v6362_v12 }
  0x10   : > { %s520_s23 = scalar_lea.vmem %s8949_s2, %s6338_s20  ;;  %s6352_s27 = scalar_lea.vmem %s8948_s1, %s6338_s20  ;;  %v799_v20 = vadd.s32 40, %v6362_v12  ;;  %v798_v21 = vadd.s32 32, %v6362_v12  ;;  %v6379_v22 = vadd.s32 24, %v6362_v12  ;;  %v6382_v23 = vadd.s32 16, %v6362_v12 }
  0x11   : > { %v5931_v0 = vld [vmem:[%s520_s23] sm:$0xff]   ;;  %v5932_v1 = vld [vmem:[%s520_s23 + $0x8] sm:$0xff]   ;;  %v5933_v2 = vld [vmem:[%s520_s23 + $0x10] sm:$0xff]   ;;  %v814_v16 = vmul.u32 8, %v6365_v13  ;;  %vm812_vm0 = vcmp.ge.s32.totalorder %v801_v14, %v804_v15  ;;  %vm811_vm3 = vcmp.ge.s32.totalorder %v800_v17, %v804_v15  ;;  %v6385_v24 = vadd.s32 8, %v6362_v12  ;;  %s8799_s17 = scalar_lea.vmem %s8962_s15, %s6338_s20 }
  0x12   : > { %710 = vrot.lane.b32.xlu0 %v5931_v0, %s6241_s24  ;;  %714 = vrot.lane.b32.xlu1 %v5933_v2, %s6241_s24  ;;  %v5934_v3 = vld [vmem:[%s520_s23 + $0x18] sm:$0xff]   ;;  %v5935_v4 = vld [vmem:[%s520_s23 + $0x20] sm:$0xff]   ;;  %vm810_vm6 = vcmp.ge.s32.totalorder %v799_v20, %v804_v15  ;;  %vm809_vm9 = vcmp.ge.s32.totalorder %v798_v21, %v804_v15  ;;  %vm808_vm11 = vcmp.ge.s32.totalorder %v6379_v22, %v804_v15 }
  0x13   : > { %v5936_v5 = vld [vmem:[%s520_s23 + $0x28] sm:$0xff]   ;;  %v5937_v6 = vld [vmem:[%s520_s23 + $0x30] sm:$0xff]   ;;  %v5938_v7 = vld [vmem:[%s520_s23 + $0x38] sm:$0xff]   ;;  %vm822_vm1 = vcmp.lt.s32.totalorder %v801_v14, %v814_v16  ;;  %vm821_vm4 = vcmp.lt.s32.totalorder %v800_v17, %v814_v16  ;;  %vm820_vm7 = vcmp.lt.s32.totalorder %v799_v20, %v814_v16  ;;  %vm819_vm10 = vcmp.lt.s32.totalorder %v798_v21, %v814_v16 }
  0x14   : > { %v5939_v8 = vld [vmem:[%s520_s23 + $0x40] sm:$0xff]   ;;  %v5940_v9 = vld [vmem:[%s520_s23 + $0x48] sm:$0xff]   ;;  %vm830_vm2 = vmand %vm812_vm0, %vm822_vm1  ;;  %vm818_vm12 = vcmp.lt.s32.totalorder %v6379_v22, %v814_v16  ;;  %vm807_vm14 = vcmp.ge.s32.totalorder %v6382_v23, %v804_v15  ;;  %vm817_vm15 = vcmp.lt.s32.totalorder %v6382_v23, %v814_v16  ;;  %vm806_vm0 = vcmp.ge.s32.totalorder %v6385_v24, %v804_v15  ;;  %s6246_s23 = smov 64  }
  0x15   : > { %5574 = vmatpush3.msk.msra.mxu0 %vm830_vm2, %v8964_v19  ;;  %vm829_vm5 = vmand %vm811_vm3, %vm821_vm4  ;;  %vm816_vm1 = vcmp.lt.s32.totalorder %v6385_v24, %v814_v16  ;;  %vm9032_vm2 = vmmov 0   ;;  %v5941_v25 = vld [vmem:[%s6352_s27] sm:$0xff]   ;;  %v5943_v26 = vld [vmem:[%s6352_s27 + $0x10] sm:$0xff]  }
  0x16   : > { %712 = vrot.lane.b32.xlu0 %v5932_v1, %s6241_s24  ;;  %716 = vrot.lane.b32.xlu1 %v5934_v3, %s6241_s24  ;;  %vm828_vm8 = vmand %vm810_vm6, %vm820_vm7  ;;  %vm805_vm6 = vcmp.ge.s32.totalorder %v6362_v12, %v804_v15  ;;  %vm815_vm7 = vcmp.lt.s32.totalorder %v6362_v12, %v814_v16  ;;  %v5942_v29 = vld [vmem:[%s6352_s27 + $0x8] sm:$0xff]   ;;  %v5944_v42 = vld [vmem:[%s6352_s27 + $0x18] sm:$0xff]  }
  0x17   : > { %5575 = vmatprep.subr.mxu0 %v8966_v18  ;;  %vm827_vm13 = vmand %vm809_vm9, %vm819_vm10  ;;  %5589 = vmatprep.mubr.msk.f32.mxu0 %vm9032_vm2, %v8966_v18  ;;  %vm8974_vm9 = vcmask 261120   ;;  %vm9029_vm10 = vcmask 523264   ;;  %v5945_v49 = vld [vmem:[%s6352_s27 + $0x20] sm:$0xff]   ;;  %v5946_v63 = vld [vmem:[%s6352_s27 + $0x28] sm:$0xff]  }
  0x18   : > { %5576 = vmatpush3.msk.msra.mxu0 %vm829_vm5, %v8964_v19  ;;  %vm826_vm3 = vmand %vm808_vm11, %vm818_vm12  ;;  %v5947_v14 = vld [vmem:[%s6352_s27 + $0x30] sm:$0xff]   ;;  %vm8973_vm11 = vcmask 1040384  }
  0x19   : > { %5577 = vmatprep.subr.mxu0 %v8966_v18  ;;  %vm825_vm4 = vmand %vm807_vm14, %vm817_vm15 }
  0x1a   : > { %718 = vrot.lane.b32.xlu0 %v5935_v4, %s6241_s24  ;;  %720 = vrot.lane.b32.xlu1 %v5936_v5, %s6241_s24  ;;  %vm824_vm5 = vmand %vm806_vm0, %vm816_vm1 }
  0x1b   : > { %5578 = vmatpush3.msk.msra.mxu0 %vm828_vm8, %v8964_v19  ;;  %vm823_vm8 = vmand %vm805_vm6, %vm815_vm7 }
  0x1c   : > { %5579 = vmatprep.subr.mxu0 %v8966_v18 }
  0x1d   : > { %5580 = vmatpush3.msk.msra.mxu0 %vm827_vm13, %v8964_v19 }
  0x1e   : > { %722 = vrot.lane.b32.xlu0 %v5937_v6, %s6241_s24  ;;  %724 = vrot.lane.b32.xlu1 %v5938_v7, %s6241_s24 }
  0x1f   : > { %5581 = vmatprep.subr.mxu0 %v8966_v18 }
  0x20   : > { %5582 = vmatpush3.msk.msra.mxu0 %vm826_vm3, %v8964_v19 }
  0x21   : > { %5583 = vmatprep.subr.mxu0 %v8966_v18 }
  0x22   : > { %726 = vrot.lane.b32.xlu0 %v5939_v8, %s6241_s24  ;;  %728 = vrot.lane.b32.xlu1 %v5940_v9, %s6241_s24 }
  0x23   : > { %5584 = vmatpush3.msk.msra.mxu0 %vm825_vm4, %v8964_v19 }
  0x24   : > { %5585 = vmatprep.subr.mxu0 %v8966_v18 }
  0x25   : > { %5586 = vmatpush3.msk.msra.mxu0 %vm824_vm5, %v8964_v19 }
  0x26   : > { %5587 = vmatprep.subr.mxu0 %v8966_v18 }
  0x27   : > { %5588 = vmatpush3.msk.msra.mxu0 %vm823_vm8, %v8964_v19 }
  0x28   : > { %5592 = vmatprep.subr.mxu0 %v8966_v18 }
  0x84   : > { %v711_v27 = vpop.permute.xlu0 %710  ;;  %v715_v32 = vpop.permute.xlu1 %714 }
  0x85   : > { %v6412_v28 = vsel %vm8974_vm9, %v5941_v25, %v711_v27  ;;  %v6422_v33 = vsel %vm8974_vm9, %v5943_v26, %v715_v32 }
  0x86   : > { %9047 = vst [vmem:[#allocation4_spill] sm:$0xff] %v6412_v28  ;;  %v6416_v30 = vunpack.c.l.bf16 %v6412_v28  ;;  %v6419_v31 = vunpack.c.h.bf16 %v6412_v28  ;;  %9048 = vst [vmem:[#allocation5_spill] sm:$0xff] %v6422_v33  ;;  %v6436_v40 = vunpack.c.l.bf16 %v6422_v33  ;;  %v6439_v41 = vunpack.c.h.bf16 %v6422_v33 }
  0x88   : > { %v856_v34 = vsel %vm9029_vm10, %v6416_v30, 0.0  ;;  %v857_v35 = vsel %vm9029_vm10, %v6419_v31, 0.0  ;;  %v901_v36 = vmul.f32 %v6416_v30, %v6416_v30  ;;  %v902_v37 = vmul.f32 %v6419_v31, %v6419_v31  ;;  %v713_v38 = vpop.permute.xlu0 %712  ;;  %v717_v47 = vpop.permute.xlu1 %716 }
  0x89   : > { %v6433_v39 = vsel %vm8974_vm9, %v5942_v29, %v713_v38  ;;  %v858_v48 = vadd.f32 %v857_v35, %v856_v34  ;;  %v905_v53 = vmul.f32 %v6436_v40, %v6436_v40  ;;  %v863_v57 = vsel %vm9029_vm10, %v6436_v40, 0.0 }
  0x8a   : > { %9049 = vst [vmem:[#allocation6_spill] sm:$0xff] %v6433_v39  ;;  %v921_v43 = vsel %vm9029_vm10, %v901_v36, 0.0  ;;  %v922_v44 = vsel %vm9029_vm10, %v902_v37, 0.0  ;;  %v6445_v45 = vunpack.c.l.bf16 %v6433_v39  ;;  %v6448_v46 = vunpack.c.h.bf16 %v6433_v39 }
  0x8b   : > { %v923_v55 = vadd.f32 %v922_v44, %v921_v43  ;;  %v6462_v58 = vsel %vm8974_vm9, %v5944_v42, %v717_v47  ;;  %v906_v61 = vmul.f32 %v6439_v41, %v6439_v41  ;;  %v928_v6 = vsel %vm9029_vm10, %v905_v53, 0.0  ;;  %v5948_v44 = vld [vmem:[%s6352_s27 + $0x38] sm:$0xff]  }
  0x8c   : > { %v859_v50 = vsel %vm9029_vm10, %v6445_v45, 0.0  ;;  %v903_v51 = vmul.f32 %v6445_v45, %v6445_v45  ;;  %v904_v52 = vmul.f32 %v6448_v46, %v6448_v46  ;;  %v719_v54 = vpop.permute.xlu0 %718  ;;  %9050 = vst [vmem:[#allocation7_spill] sm:$0xff] %v6462_v58  ;;  %v861_v59 = vsel %vm9029_vm10, %v6448_v46, 0.0  ;;  %v721_v4 = vpop.permute.xlu1 %720 }
  0x8d   : > { %v860_v56 = vadd.f32 %v859_v50, %v858_v48  ;;  %v6470_v62 = vunpack.c.l.bf16 %v6462_v58  ;;  %v6474_v2 = vunpack.c.h.bf16 %v6462_v58  ;;  %v6477_v3 = vsel %vm8974_vm9, %v5945_v49, %v719_v54 }
  0x8e   : > { %v924_v60 = vsel %vm9029_vm10, %v903_v51, 0.0  ;;  %9051 = vst [vmem:[#allocation8_spill] sm:$0xff] %v6477_v3  ;;  %v926_v5 = vsel %vm9029_vm10, %v904_v52, 0.0  ;;  %v6484_v10 = vunpack.c.l.bf16 %v6477_v3  ;;  %v865_v15 = vsel %vm9029_vm10, %v6439_v41, 0.0 }
  0x8f   : > { %v862_v0 = vadd.f32 %v861_v59, %v860_v56  ;;  %v925_v1 = vadd.f32 %v924_v60, %v923_v55  ;;  %v907_v7 = vmul.f32 %v6470_v62, %v6470_v62  ;;  %v867_v16 = vsel %vm9029_vm10, %v6470_v62, 0.0  ;;  %v5949_v59 = vld [vmem:[%s6352_s27 + $0x40] sm:$0xff]  }
  0x90   : > { %v6492_v17 = vsel %vm8974_vm9, %v5946_v63, %v721_v4  ;;  %v723_v20 = vpop.permute.xlu0 %722  ;;  %v930_v26 = vsel %vm9029_vm10, %v906_v61, 0.0  ;;  %v908_v27 = vmul.f32 %v6474_v2, %v6474_v2  ;;  %v6499_v32 = vunpack.c.h.bf16 %v6477_v3  ;;  %v725_v51 = vpop.permute.xlu1 %724 }
  0x91   : > { %v927_v8 = vadd.f32 %v926_v5, %v925_v1  ;;  %v864_v9 = vadd.f32 %v863_v57, %v862_v0  ;;  %9052 = vst [vmem:[#allocation9_spill] sm:$0xff] %v6492_v17  ;;  %v932_v29 = vsel %vm9029_vm10, %v907_v7, 0.0  ;;  %v909_v34 = vmul.f32 %v6484_v10, %v6484_v10 }
  0x92   : > { %v6504_v35 = vunpack.c.l.bf16 %v6492_v17  ;;  %v6507_v38 = vsel %vm8974_vm9, %v5947_v14, %v723_v20  ;;  %v869_v42 = vsel %vm9029_vm10, %v6474_v2, 0.0  ;;  %v871_v43 = vsel %vm9029_vm10, %v6484_v10, 0.0 }
  0x93   : > { %v866_v21 = vadd.f32 %v865_v15, %v864_v9  ;;  %v929_v25 = vadd.f32 %v928_v6, %v927_v8  ;;  %9053 = vst [vmem:[#allocation10_spill] sm:$0xff] %v6507_v38  ;;  %v934_v49 = vsel %vm9029_vm10, %v908_v27, 0.0  ;;  %v6516_v50 = vunpack.c.h.bf16 %v6492_v17 }
  0x94   : > { %v910_v52 = vmul.f32 %v6499_v32, %v6499_v32  ;;  %v936_v53 = vsel %vm9029_vm10, %v909_v34, 0.0  ;;  %v911_v54 = vmul.f32 %v6504_v35, %v6504_v35  ;;  %v6524_v55 = vunpack.c.l.bf16 %v6507_v38  ;;  %v727_v0 = vpop.permute.xlu0 %726  ;;  %v729_v27 = vpop.permute.xlu1 %728 }
  0x95   : > { %v931_v36 = vadd.f32 %v930_v26, %v929_v25  ;;  %v868_v37 = vadd.f32 %v867_v16, %v866_v21  ;;  %v873_v60 = vsel %vm9029_vm10, %v6499_v32, 0.0  ;;  %v875_v61 = vsel %vm9029_vm10, %v6504_v35, 0.0  ;;  %v5950_v21 = vld [vmem:[%s6352_s27 + $0x48] sm:$0xff]  }
  0x96   : > { %v6532_v63 = vsel %vm8974_vm9, %v5948_v44, %v725_v51  ;;  %v912_v5 = vmul.f32 %v6516_v50, %v6516_v50  ;;  %v6537_v6 = vunpack.c.h.bf16 %v6507_v38  ;;  %v938_v7 = vsel %vm9029_vm10, %v910_v52, 0.0 }
  0x97   : > { %v870_v47 = vadd.f32 %v869_v42, %v868_v37  ;;  %v933_v48 = vadd.f32 %v932_v29, %v931_v36  ;;  %9054 = vst [vmem:[#allocation11_spill] sm:$0xff] %v6532_v63  ;;  %v940_v8 = vsel %vm9029_vm10, %v911_v54, 0.0  ;;  %v913_v9 = vmul.f32 %v6524_v55, %v6524_v55 }
  0x98   : > { %v6544_v14 = vunpack.c.l.bf16 %v6532_v63  ;;  %v6547_v20 = vsel %vm8974_vm9, %v5949_v59, %v727_v0  ;;  %v877_v25 = vsel %vm9029_vm10, %v6516_v50, 0.0  ;;  %v879_v26 = vsel %vm9029_vm10, %v6524_v55, 0.0 }
  0x99   : > { %v935_v56 = vadd.f32 %v934_v49, %v933_v48  ;;  %v872_v57 = vadd.f32 %v871_v43, %v870_v47  ;;  %9055 = vst [vmem:[#allocation12_spill] sm:$0xff] %v6547_v20  ;;  %v942_v36 = vsel %vm9029_vm10, %v912_v5, 0.0  ;;  %v914_v37 = vmul.f32 %v6537_v6, %v6537_v6 }
  0x9a   : > { %v944_v42 = vsel %vm9029_vm10, %v913_v9, 0.0  ;;  %v6559_v43 = vunpack.c.h.bf16 %v6532_v63  ;;  %v915_v44 = vmul.f32 %v6544_v14, %v6544_v14  ;;  %v6564_v47 = vunpack.c.l.bf16 %v6547_v20 }
  0x9b   : > { %v874_v1 = vadd.f32 %v873_v60, %v872_v57  ;;  %v937_v4 = vadd.f32 %v936_v53, %v935_v56  ;;  %v6567_v51 = vsel %vm8974_vm9, %v5950_v21, %v729_v27  ;;  %v881_v52 = vsel %vm9029_vm10, %v6537_v6, 0.0 }
  0x9c   : > { %9056 = vst [vmem:[#allocation13_spill] sm:$0xff] %v6567_v51  ;;  %v883_v53 = vsel %vm9029_vm10, %v6544_v14, 0.0  ;;  %v946_v57 = vsel %vm9029_vm10, %v914_v37, 0.0  ;;  %v6575_v59 = vunpack.c.h.bf16 %v6547_v20  ;;  %v916_v60 = vmul.f32 %v6559_v43, %v6559_v43 }
  0x9d   : > { %v939_v15 = vadd.f32 %v938_v7, %v937_v4  ;;  %v876_v16 = vadd.f32 %v875_v61, %v874_v1  ;;  %v948_v61 = vsel %vm9029_vm10, %v915_v44, 0.0  ;;  %v917_v0 = vmul.f32 %v6564_v47, %v6564_v47 }
  0x9e   : > { %v6583_v1 = vunpack.c.l.bf16 %v6567_v51  ;;  %v885_v7 = vsel %vm9029_vm10, %v6559_v43, 0.0  ;;  %v950_v21 = vsel %vm9029_vm10, %v916_v60, 0.0 }
  0x9f   : > { %v878_v29 = vadd.f32 %v877_v25, %v876_v16  ;;  %v941_v34 = vadd.f32 %v940_v8, %v939_v15  ;;  %v887_v8 = vsel %vm9029_vm10, %v6564_v47, 0.0  ;;  %v918_v16 = vmul.f32 %v6575_v59, %v6575_v59 }
  0xa0   : > { %v952_v25 = vsel %vm9029_vm10, %v917_v0, 0.0  ;;  %v919_v27 = vmul.f32 %v6583_v1, %v6583_v1  ;;  %v891_v37 = vsel %vm9029_vm10, %v6583_v1, 0.0 }
  0xa1   : > { %v943_v48 = vadd.f32 %v942_v36, %v941_v34  ;;  %v880_v49 = vadd.f32 %v879_v26, %v878_v29  ;;  %v6594_v26 = vunpack.c.h.bf16 %v6567_v51  ;;  %v889_v36 = vsel %vm9029_vm10, %v6575_v59, 0.0 }
  0xa3   : > { %v882_v54 = vadd.f32 %v881_v52, %v880_v49  ;;  %v945_v56 = vadd.f32 %v944_v42, %v943_v48  ;;  %v954_v48 = vsel %vm9029_vm10, %v918_v16, 0.0  ;;  %v920_v49 = vmul.f32 %v6594_v26, %v6594_v26 }
  0xa4   : > { %v956_v52 = vsel %vm9029_vm10, %v919_v27, 0.0 }
  0xa5   : > { %v947_v4 = vadd.f32 %v946_v57, %v945_v56  ;;  %v884_v5 = vadd.f32 %v883_v53, %v882_v54  ;;  %v893_v56 = vsel %vm9029_vm10, %v6594_v26, 0.0 }
  0xa7   : > { %v886_v9 = vadd.f32 %v885_v7, %v884_v5  ;;  %v949_v15 = vadd.f32 %v948_v61, %v947_v4  ;;  %v958_v61 = vsel %vm9029_vm10, %v920_v49, 0.0  ;;  %v532_v49 = vld [vmem:[%s8947_s0 + $0x10] sm:$0xff] }
  0xa8   : > { %vm552_vm0 = vcmp.gt.f32.partialorder %v532_v49, 0.5 }
  0xa9   : > { %v951_v29 = vadd.f32 %v950_v21, %v949_v15  ;;  %v888_v34 = vadd.f32 %v887_v8, %v886_v9 }
  0xab   : > { %v890_v42 = vadd.f32 %v889_v36, %v888_v34  ;;  %v953_v44 = vadd.f32 %v952_v25, %v951_v29 }
  0xad   : > { %v955_v53 = vadd.f32 %v954_v48, %v953_v44  ;;  %v892_v54 = vadd.f32 %v891_v37, %v890_v42  ;;  %v6614_v37 = vadd.s32 1, %v6362_v12  ;;  %v847_v42 = vmul.u32 8, %v6362_v12  ;;  %v531_v48 = vld [vmem:[%s8947_s0 + $0x8] sm:$0xff] }
  0xae   : > { %vm551_vm15 = vcmp.gt.f32.partialorder %v531_v48, 0.5 }
  0xaf   : > { %v894_v57 = vadd.f32 %v893_v56, %v892_v54  ;;  %v957_v60 = vadd.f32 %v956_v52, %v955_v53  ;;  %9057 = vst [vmem:[#allocation14_spill] sm:$0xff] %v6614_v37  ;;  %v850_v44 = vmul.u32 8, %v6614_v37  ;;  %vm848_vm12 = vcmp.ge.s32.totalorder %v6360_v11, %v847_v42  ;;  %v530_v53 = vld [vmem:[%s8947_s0] sm:$0xff]  ;;  %v533_v54 = vld [vmem:[%s8947_s0 + $0x18] sm:$0xff] }
  0xb0   : > { %v8968_v52 = vmov 0   ;;  %vm550_vm1 = vcmp.gt.f32.partialorder %v530_v53, 0.5  ;;  %vm553_vm3 = vcmp.gt.f32.partialorder %v533_v54, 0.5  ;;  %v542_v42 = vld [vmem:[%s8947_s0 + $0x60] sm:$0xff]  ;;  %v549_v53 = vld [vmem:[%s8947_s0 + $0x98] sm:$0xff]  ;;  %v544_v54 = vld [vmem:[%s8947_s0 + $0x70] sm:$0xff] }
  0xb1   : > { %v895_v0 = vrot.slane %v894_v57, 4  ;;  %v959_v4 = vadd.f32 %v958_v61, %v957_v60  ;;  %vm851_vm13 = vcmp.lt.s32.totalorder %v6360_v11, %v850_v44  ;;  %5780 = vset.pattern.permute.xlu1 %v8968_v52  ;;  %5779 = vset.pattern.permute.xlu0 %v8968_v52  ;;  %v1365_v56 = vsel %vm551_vm15, 1, %v8968_v52  ;;  %v535_v61 = vld [vmem:[%s8947_s0 + $0x28] sm:$0xff] }
  0xb2   : > { %vm852_vm14 = vmand %vm848_vm12, %vm851_vm13  ;;  %2076 = vmatprep.subr.bf16.mxu1 %v8968_v52  ;;  %1388 = vperm.xlu1 %5780, %v1365_v56   ;;  %v1364_v60 = vsel %vm550_vm1, 1, %v8968_v52  ;;  %vm555_vm5 = vcmp.gt.f32.partialorder %v535_v61, 0.5  ;;  %v543_v44 = vld [vmem:[%s8947_s0 + $0x68] sm:$0xff]  ;;  %vm562_vm15 = vcmp.gt.f32.partialorder %v542_v42, 0.5  ;;  %vm569_vm1 = vcmp.gt.f32.partialorder %v549_v53, 0.5  ;;  %v546_v61 = vld [vmem:[%s8947_s0 + $0x80] sm:$0xff] }
  0xb3   : > { %v896_v5 = vadd.f32 %v895_v0, %v894_v57  ;;  %v960_v7 = vrot.slane %v959_v4, 4  ;;  %v534_v57 = vld [vmem:[%s8947_s0 + $0x20] sm:$0xff]  ;;  %v1366_v0 = vsel %vm552_vm0, 1, %v8968_v52  ;;  %1385 = vperm.xlu0 %5779, %v1364_v60   ;;  %vm563_vm0 = vcmp.gt.f32.partialorder %v543_v44, 0.5  ;;  %v545_v60 = vld [vmem:[%s8947_s0 + $0x78] sm:$0xff] }
  0xb4   : > { %vm554_vm4 = vcmp.gt.f32.partialorder %v534_v57, 0.5  ;;  %v1376_v56 = vsel %vm562_vm15, 1, %v8968_v52  ;;  %v1377_v57 = vsel %vm563_vm0, 1, %v8968_v52  ;;  %v5953_v53 = vld [vmem:[%s8953_s6 + $0x98] sm:$0xff]  }
  0xb5   : > { %v897_v8 = vrot.slane %v896_v5, 2  ;;  %v961_v9 = vadd.f32 %v960_v7, %v959_v4  ;;  %v1367_v4 = vsel %vm553_vm3, 1, %v8968_v52  ;;  %v537_v7 = vld [vmem:[%s8947_s0 + $0x38] sm:$0xff]  ;;  %vm564_vm3 = vcmp.gt.f32.partialorder %v544_v54, 0.5  ;;  %v5952_v54 = vld [vmem:[%s8953_s6 + $0x30] sm:$0xff]   ;;  %2077 = vmatpush1.bf16.msra.mxu1 %v5953_v53 }
  0xb6   : > { %1391 = vperm.xlu1 %5780, %v1366_v0   ;;  %vm557_vm7 = vcmp.gt.f32.partialorder %v537_v7, 0.5  ;;  %v1383_v0 = vsel %vm569_vm1, 1, %v8968_v52  ;;  %2078 = vmatprep.subr.bf16.mxu1 %v8968_v52 }
  0xb7   : > { %v898_v15 = vadd.f32 %v897_v8, %v896_v5  ;;  %v962_v16 = vrot.slane %v961_v9, 2  ;;  %v536_v5 = vld [vmem:[%s8947_s0 + $0x30] sm:$0xff]  ;;  %v1368_v8 = vsel %vm554_vm4, 1, %v8968_v52  ;;  %1394 = vperm.xlu0 %5779, %v1367_v4   ;;  %vm565_vm4 = vcmp.gt.f32.partialorder %v545_v60, 0.5  ;;  %v5957_v60 = vld [vmem:[%s8953_s6 + $0x88] sm:$0xff]  }
  0xb8   : > { %vm556_vm6 = vcmp.gt.f32.partialorder %v536_v5, 0.5  ;;  %v1378_v4 = vsel %vm564_vm3, 1, %v8968_v52  ;;  %v547_v5 = vld [vmem:[%s8947_s0 + $0x88] sm:$0xff]  ;;  %v1379_v7 = vsel %vm565_vm4, 1, %v8968_v52 }
  0xb9   : > { %v899_v21 = vrot.slane %v898_v15, 1  ;;  %v963_v25 = vadd.f32 %v962_v16, %v961_v9  ;;  %v1369_v9 = vsel %vm555_vm5, 1, %v8968_v52  ;;  %v539_v16 = vld [vmem:[%s8947_s0 + $0x48] sm:$0xff]  ;;  %vm566_vm5 = vcmp.gt.f32.partialorder %v546_v61, 0.5  ;;  %v6008_v61 = vld [vmem:[%s8953_s6 + $0x118] sm:$0xff]  }
  0xba   : > { %1397 = vperm.xlu1 %5780, %v1368_v8   ;;  %vm559_vm12 = vcmp.gt.f32.partialorder %v539_v16, 0.5  ;;  %v1380_v8 = vsel %vm566_vm5, 1, %v8968_v52 }
  0xbb   : > { %v964_v27 = vrot.slane %v963_v25, 1  ;;  %v900_v29 = vadd.f32 %v899_v21, %v898_v15  ;;  %v538_v15 = vld [vmem:[%s8947_s0 + $0x40] sm:$0xff]  ;;  %v1370_v21 = vsel %vm556_vm6, 1, %v8968_v52  ;;  %1400 = vperm.xlu0 %5779, %v1369_v9   ;;  %vm567_vm6 = vcmp.gt.f32.partialorder %v547_v5, 0.5  ;;  %v548_v9 = vld [vmem:[%s8947_s0 + $0x90] sm:$0xff]  ;;  %v5958_v5 = vld [vmem:[%s8953_s6 + $0x18] sm:$0xff]  }
  0xbc   : > { %vm558_vm8 = vcmp.gt.f32.partialorder %v538_v15, 0.5  ;;  %v1381_v15 = vsel %vm567_vm6, 1, %v8968_v52 }
  0xbd   : > { %v965_v34 = vadd.f32 %v964_v27, %v963_v25  ;;  %v1371_v25 = vsel %vm557_vm7, 1, %v8968_v52  ;;  %v540_v27 = vld [vmem:[%s8947_s0 + $0x50] sm:$0xff]  ;;  %vm568_vm7 = vcmp.gt.f32.partialorder %v548_v9, 0.5 }
  0xbe   : > { %1403 = vperm.xlu1 %5780, %v1370_v21   ;;  %vm560_vm13 = vcmp.gt.f32.partialorder %v540_v27, 0.5  ;;  %v1382_v16 = vsel %vm568_vm7, 1, %v8968_v52  ;;  %v5963_v9 = vld [vmem:[%s8953_s6 + $0x70] sm:$0xff]  }
  0xbf   : > { %v967_v36 = vsel %vm8973_vm11, %v900_v29, %v965_v34  ;;  %v541_v29 = vld [vmem:[%s8947_s0 + $0x58] sm:$0xff]  ;;  %v1372_v34 = vsel %vm558_vm8, 1, %v8968_v52  ;;  %1406 = vperm.xlu0 %5779, %v1371_v25   ;;  %v1374_v48 = vsel %vm560_vm13, 1, %v8968_v52  ;;  %vm8972_vm8 = vcmask 64512  }
  0xc0   : > { %5590 = vmatmul.mubr.msk.f32.vlgmr.msra.gmra.mxu0 %vm9029_vm10, %v967_v36  ;;  %v1373_v36 = vsel %vm559_vm12, 1, %v8968_v52  ;;  %vm1666_vm12 = vcmask 1043456   ;;  %vm1667_vm13 = vcmask 523268  }
  0xc1   : > { %5594 = vmatprep.mubr.msk.f32.mxu0 %vm9032_vm2, %v8966_v18  ;;  %5593 = vmatpush3.msk.msra.mxu0 %vm852_vm14, %v8964_v19  ;;  %vm561_vm14 = vcmp.gt.f32.partialorder %v541_v29, 0.5 }
  0xc2   : > { %2273 = vmatprep.subr.bf16.mxu0 %v8968_v52  ;;  %1409 = vperm.xlu1 %5780, %v1372_v34   ;;  %v1375_v49 = vsel %vm561_vm14, 1, %v8968_v52  ;;  %vm6727_vm14 = vmor %vm1667_vm13, %vm1666_vm12 }
  0xc3   : > { %1412 = vperm.xlu0 %5779, %v1373_v36   ;;  %1669 = vst.msk [vmem:[#allocation2] sm:$0xff] %vm6727_vm14, %v8968_v52  ;;  %1670 = vst.msk [vmem:[#allocation2 + $0x8] sm:$0xff] %vm6727_vm14, %v8968_v52 }
  0xc4   : > { %1671 = vst.msk [vmem:[#allocation2 + $0xb0] sm:$0xff] %vm6727_vm14, %v8968_v52  ;;  %1672 = vst.msk [vmem:[#allocation2 + $0xb8] sm:$0xff] %vm6727_vm14, %v8968_v52 }
  0xc6   : > { %1415 = vperm.xlu1 %5780, %v1374_v48  }
  0xc7   : > { %1418 = vperm.xlu0 %5779, %v1375_v49   ;;  %v5951_v49 = vld [vmem:[%s8953_s6 + $0x38] sm:$0xff]  }
  0xca   : > { %1421 = vperm.xlu1 %5780, %v1376_v56   ;;  %v5955_v56 = vld [vmem:[%s8953_s6 + $0x90] sm:$0xff]  }
  0xcb   : > { %1424 = vperm.xlu0 %5779, %v1377_v57   ;;  %v5954_v57 = vld [vmem:[%s8953_s6 + $0x28] sm:$0xff]   ;;  %2079 = vmatpush1.bf16.msra.mxu1 %v5955_v56 }
  0xcc   : > { %2080 = vmatprep.subr.bf16.mxu1 %v8968_v52 }
  0xce   : > { %1442 = vperm.xlu1 %5780, %v1383_v0   ;;  %v5956_v0 = vld [vmem:[%s8953_s6 + $0x20] sm:$0xff]  }
  0xcf   : > { %1427 = vperm.xlu0 %5779, %v1378_v4   ;;  %2081 = vmatpush1.bf16.msra.mxu1 %v5957_v60  ;;  %v5959_v4 = vld [vmem:[%s8953_s6 + $0x80] sm:$0xff]  }
  0xd0   : > { %2082 = vmatprep.subr.bf16.mxu1 %v8968_v52 }
  0xd2   : > { %1430 = vperm.xlu1 %5780, %v1379_v7   ;;  %v5961_v7 = vld [vmem:[%s8953_s6 + $0x78] sm:$0xff]  }
  0xd3   : > { %1433 = vperm.xlu0 %5779, %v1380_v8   ;;  %2083 = vmatpush1.bf16.msra.mxu1 %v5959_v4  ;;  %v5960_v8 = vld [vmem:[%s8953_s6 + $0x10] sm:$0xff]  }
  0xd4   : > { %2084 = vmatprep.subr.bf16.mxu1 %v8968_v52 }
  0xd6   : > { %1436 = vperm.xlu1 %5780, %v1381_v15   ;;  %v5962_v15 = vld [vmem:[%s8953_s6 + $0x8] sm:$0xff]  }
  0xd7   : > { %2085 = vmatpush1.bf16.msra.mxu1 %v5961_v7 }
  0xd8   : > { %2086 = vmatprep.subr.bf16.mxu1 %v8968_v52 }
  0xda   : > { %1439 = vperm.xlu1 %5780, %v1382_v16   ;;  %v5965_v16 = vld [vmem:[%s8953_s6 + $0x68] sm:$0xff]  }
  0xdb   : > { %2087 = vmatpush1.bf16.msra.mxu1 %v5963_v9 }
  0xdc   : > { %2088 = vmatprep.subr.bf16.mxu1 %v8968_v52 }
  0xdf   : > { %2089 = vmatpush1.bf16.msra.mxu1 %v5965_v16 }
  0xe0   : > { %2090 = vmatprep.subr.bf16.mxu1 %v8968_v52 }
 0x12d   : > { %v6814_v60 = vpop.permute.xlu1 %1388 }
 0x12e   : > { %9060 = vst [vmem:[#allocation15_spill] sm:$0xff] %v6814_v60  ;;  %vm1445_vm15 = vcmp.eq.s32.totalorder %v6814_v60, 1 }
 0x180   : > { %v1037_v21 = vpop.f32.mrf.mxu0 }
 0x181   : > { %v1041_v25 = vmul.f32 0.001953125, %v1037_v21  ;;  %v5964_v21 = vld [vmem:[%s8953_s6] sm:$0xff]  }
 0x182   : > { %v5591_v27 = vpop.f32.mrf.mxu0 }
 0x183   : > { %v1042_v29 = vmul.f32 %v1041_v25, %v1041_v25  ;;  %v6784_v27 = vsub.s32 0, %v6362_v12 }
 0x185   : > { %v1044_v34 = vrot.slane %v1042_v29, 7  ;;  %v8963_v29 = vsub.s32 1, %v6362_v12 }
 0x187   : > { %v1046_v36 = vsub.f32 %v1041_v25, %v1044_v34 }
 0x189   : > { %v1047_v42 = vadd.f32 1e-06, %v1046_v36  ;;  %v5966_v36 = vld [vmem:[%s8953_s6 + $0x58] sm:$0xff]  }
 0x18b   : > { %6065 = vrsqrt.f32 %v1047_v42 }
 0x198   : > { %v6066_v44 = vpop.eup %6065 }
 0x199   : > { %v1049_v48 = vsel %vm8973_vm11, %v1041_v25, %v6066_v44  ;;  %v5967_v25 = vld [vmem:[%s8953_s6 + $0x60] sm:$0xff]  }
 0x19a   : > { %5595 = vmatmul.mubr.msk.f32.vlgmr.msra.gmra.mxu0 %vm8972_vm8, %v1049_v48  ;;  %2091 = vmatpush1.bf16.msra.mxu1 %v5967_v25 }
 0x19b   : > { %2274 = vmatpush1.bf16.msra.mxu0 %v5951_v49  ;;  %2100 = vmatprep.subr.bf16.mxu1 %v8968_v52 }
 0x19c   : > { %2275 = vmatprep.subr.bf16.mxu0 %v8968_v52 }
 0x19f   : > { %2276 = vmatpush1.bf16.msra.mxu0 %v5952_v54 }
 0x1a0   : > { %2277 = vmatprep.subr.bf16.mxu0 %v8968_v52 }
 0x1a3   : > { %2278 = vmatpush1.bf16.msra.mxu0 %v5954_v57  ;;  %v6812_v57 = vld [vmem:[%s8951_s4] ss:$0 sm:$0xff] }
 0x1a4   : > { %2279 = vmatprep.subr.bf16.mxu0 %v8968_v52 }
 0x1a7   : > { %2280 = vmatpush1.bf16.msra.mxu0 %v5956_v0 }
 0x1a8   : > { %2281 = vmatprep.subr.bf16.mxu0 %v8968_v52 }
 0x1ab   : > { %2282 = vmatpush1.bf16.msra.mxu0 %v5958_v5 }
 0x1ac   : > { %2283 = vmatprep.subr.bf16.mxu0 %v8968_v52 }
 0x1af   : > { %2284 = vmatpush1.bf16.msra.mxu0 %v5960_v8 }
 0x1b0   : > { %2285 = vmatprep.subr.bf16.mxu0 %v8968_v52 }
 0x1b3   : > { %2286 = vmatpush1.bf16.msra.mxu0 %v5962_v15 }
 0x1b4   : > { %2287 = vmatprep.subr.bf16.mxu0 %v8968_v52 }
 0x1b7   : > { %2288 = vmatpush1.bf16.msra.mxu0 %v5964_v21 }
 0x1b8   : > { %2297 = vmatprep.subr.bf16.mxu0 %v8968_v52 }
 0x1bb   : > { %2298 = vmatpush2.bf16.msra.mxu0 %v5966_v36 }
 0x1bc   : > { %2299 = vmatprep.subr.bf16.mxu0 %v8968_v52 }
 0x25a   : > { %v1120_v34 = vpop.f32.mrf.mxu0 }
 0x25b   : > { %v6793_v42 = vrot.slane %v1120_v34, %v6784_v27  ;;  %v6799_v44 = vrot.slane %v1120_v34, %v8963_v29 }
 0x25c   : > { %v5596_v48 = vpop.f32.mrf.mxu0 }
 0x25d   : > { %v1129_v49 = vsub.f32 %v6419_v31, %v6793_v42  ;;  %v1130_v53 = vsub.f32 %v6445_v45, %v6793_v42  ;;  %v1132_v54 = vsub.f32 %v6436_v40, %v6793_v42  ;;  %v1128_v56 = vsub.f32 %v6416_v30, %v6793_v42  ;;  %v5968_v30 = vld [vmem:[%s8953_s6 + $0x50] sm:$0xff]  }
 0x25e   : > { %v1134_v0 = vsub.f32 %v6470_v62, %v6793_v42  ;;  %v1131_v31 = vsub.f32 %v6448_v46, %v6793_v42  ;;  %v1136_v45 = vsub.f32 %v6484_v10, %v6793_v42  ;;  %v1133_v40 = vsub.f32 %v6439_v41, %v6793_v42  ;;  %v6835_v46 = vld [vmem:[%s8952_s5] ss:$0 sm:$0xff]  ;;  %2300 = vmatpush2.bf16.msra.mxu0 %v5968_v30 }
 0x25f   : > { %v1153_v4 = vmul.f32 %v6799_v44, %v1129_v49  ;;  %v1154_v5 = vmul.f32 %v6799_v44, %v1130_v53  ;;  %v1156_v62 = vmul.f32 %v6799_v44, %v1132_v54  ;;  %v1152_v7 = vmul.f32 %v6799_v44, %v1128_v56  ;;  %2301 = vmatprep.subr.bf16.mxu0 %v8968_v52 }
 0x260   : > { %v1158_v41 = vmul.f32 %v6799_v44, %v1134_v0  ;;  %v1155_v10 = vmul.f32 %v6799_v44, %v1131_v31  ;;  %v1160_v8 = vmul.f32 %v6799_v44, %v1136_v45  ;;  %v1157_v9 = vmul.f32 %v6799_v44, %v1133_v40  ;;  %v6862_v31 = vpop.permute.xlu1 %1391 }
 0x261   : > { %v1179_v15 = vmul.f32 %v6812_v57, %v1153_v4  ;;  %v1180_v16 = vmul.f32 %v6812_v57, %v1154_v5  ;;  %v1182_v21 = vmul.f32 %v6812_v57, %v1156_v62  ;;  %v1178_v25 = vmul.f32 %v6812_v57, %v1152_v7  ;;  %9061 = vst [vmem:[#allocation16_spill] sm:$0xff] %v6862_v31 }
 0x262   : > { %v1184_v34 = vmul.f32 %v6812_v57, %v1158_v41  ;;  %v1181_v36 = vmul.f32 %v6812_v57, %v1155_v10  ;;  %v1186_v48 = vmul.f32 %v6812_v57, %v1160_v8  ;;  %v1183_v49 = vmul.f32 %v6812_v57, %v1157_v9 }
 0x263   : > { %v6850_v53 = vadd.f32 %v6835_v46, %v1179_v15  ;;  %v6853_v54 = vadd.f32 %v6835_v46, %v1180_v16  ;;  %v6856_v56 = vadd.f32 %v6835_v46, %v1182_v21  ;;  %v6859_v0 = vadd.f32 %v6835_v46, %v1178_v25 }
 0x264   : > { %v6865_v45 = vadd.f32 %v6835_v46, %v1184_v34  ;;  %v6868_v40 = vadd.f32 %v6835_v46, %v1181_v36  ;;  %v6871_v30 = vadd.f32 %v6835_v46, %v1186_v48  ;;  %v6874_v4 = vadd.f32 %v6835_v46, %v1183_v49 }
 0x265   : > { %v5041_v5 = vmul.f32 -1.442695, %v6850_v53  ;;  %v5042_v62 = vmul.f32 -1.442695, %v6853_v54  ;;  %v5044_v7 = vmul.f32 -1.442695, %v6856_v56  ;;  %v1138_v41 = vsub.f32 %v6504_v35, %v6793_v42 }
 0x266   : > { %v5040_v10 = vmul.f32 -1.442695, %v6859_v0  ;;  %v5046_v8 = vmul.f32 -1.442695, %v6865_v45  ;;  %v5043_v9 = vmul.f32 -1.442695, %v6868_v40  ;;  %v1135_v15 = vsub.f32 %v6474_v2, %v6793_v42 }
 0x267   : > { %6067 = vpow2.f32 %v5041_v5  ;;  %v5048_v16 = vmul.f32 -1.442695, %v6871_v30  ;;  %v5045_v21 = vmul.f32 -1.442695, %v6874_v4  ;;  %v1162_v25 = vmul.f32 %v6799_v44, %v1138_v41  ;;  %v6899_v5 = vpop.permute.xlu1 %1397 }
 0x268   : > { %6069 = vpow2.f32 %v5042_v62  ;;  %v1159_v34 = vmul.f32 %v6799_v44, %v1135_v15  ;;  %v1140_v35 = vsub.f32 %v6524_v55, %v6793_v42  ;;  %v1137_v36 = vsub.f32 %v6499_v32, %v6793_v42  ;;  %9062 = vst [vmem:[#allocation17_spill] sm:$0xff] %v6899_v5  ;;  %v6904_v15 = vpop.permute.xlu0 %1385 }
 0x269   : > { %6071 = vpow2.f32 %v5044_v7  ;;  %v1188_v48 = vmul.f32 %v6812_v57, %v1162_v25  ;;  %v1147_v2 = vsub.f32 %v6594_v26, %v6793_v42  ;;  %v1139_v49 = vsub.f32 %v6516_v50, %v6793_v42  ;;  %9063 = vst [vmem:[#allocation18_spill] sm:$0xff] %v6904_v15 }
 0x26a   : > { %6073 = vpow2.f32 %v5040_v10  ;;  %v1185_v62 = vmul.f32 %v6812_v57, %v1159_v34  ;;  %v1164_v41 = vmul.f32 %v6799_v44, %v1140_v35  ;;  %v1161_v55 = vmul.f32 %v6799_v44, %v1137_v36 }
 0x26b   : > { %6075 = vpow2.f32 %v5046_v8  ;;  %v6907_v32 = vadd.f32 %v6835_v46, %v1188_v48  ;;  %v1171_v26 = vmul.f32 %v6799_v44, %v1147_v2  ;;  %v1163_v7 = vmul.f32 %v6799_v44, %v1139_v49 }
 0x26c   : > { %6077 = vpow2.f32 %v5043_v9  ;;  %v6912_v50 = vadd.f32 %v6835_v46, %v1185_v62  ;;  %v1190_v10 = vmul.f32 %v6812_v57, %v1164_v41  ;;  %v1187_v25 = vmul.f32 %v6812_v57, %v1161_v55  ;;  %v6934_v62 = vpop.permute.xlu1 %1403  ;;  %v6938_v55 = vpop.permute.xlu0 %1394 }
 0x26d   : > { %6079 = vpow2.f32 %v5048_v16  ;;  %v5050_v34 = vmul.f32 -1.442695, %v6907_v32  ;;  %v1197_v8 = vmul.f32 %v6812_v57, %v1171_v26  ;;  %v1189_v35 = vmul.f32 %v6812_v57, %v1163_v7  ;;  %9064 = vst [vmem:[#allocation19_spill] sm:$0xff] %v6934_v62  ;;  %9065 = vst [vmem:[#allocation20_spill] sm:$0xff] %v6938_v55 }
 0x26e   : > { %6081 = vpow2.f32 %v5045_v21  ;;  %v5047_v36 = vmul.f32 -1.442695, %v6912_v50  ;;  %v6921_v48 = vadd.f32 %v6835_v46, %v1190_v10  ;;  %v6924_v9 = vadd.f32 %v6835_v46, %v1187_v25 }
 0x26f   : > { %6083 = vpow2.f32 %v5050_v34  ;;  %v6927_v2 = vadd.f32 %v6835_v46, %v1197_v8  ;;  %v6930_v16 = vadd.f32 %v6835_v46, %v1189_v35  ;;  %v1143_v49 = vsub.f32 %v6559_v43, %v6793_v42 }
 0x270   : > { %6085 = vpow2.f32 %v5047_v36  ;;  %v5052_v21 = vmul.f32 -1.442695, %v6921_v48  ;;  %v5049_v41 = vmul.f32 -1.442695, %v6924_v9  ;;  %v1141_v25 = vsub.f32 %v6537_v6, %v6793_v42  ;;  %v6948_v18 = vpop.permute.xlu1 %1409 }
 0x271   : > { %v5059_v26 = vmul.f32 -1.442695, %v6927_v2  ;;  %v5051_v7 = vmul.f32 -1.442695, %v6930_v16  ;;  %v1167_v10 = vmul.f32 %v6799_v44, %v1143_v49  ;;  %v1145_v43 = vsub.f32 %v6575_v59, %v6793_v42  ;;  %9066 = vst [vmem:[#allocation21_spill] sm:$0xff] %v6948_v18 }
 0x272   : > { %6087 = vpow2.f32 %v5052_v21  ;;  %v1165_v49 = vmul.f32 %v6799_v44, %v1141_v25  ;;  %vm8977_vm0 = vcmp.eq.s32.totalorder %v6862_v31, 1  ;;  %vm8975_vm1 = vcmp.eq.s32.totalorder %v6899_v5, 1 }
 0x273   : > { %6089 = vpow2.f32 %v5049_v41  ;;  %v1193_v36 = vmul.f32 %v6812_v57, %v1167_v10  ;;  %v6951_v41 = vpop.permute.xlu0 %1400  ;;  %v1169_v59 = vmul.f32 %v6799_v44, %v1145_v43  ;;  %v1146_v10 = vsub.f32 %v6583_v1, %v6793_v42 }
 0x274   : > { %v6068_v34 = vpop.eup %6067  ;;  %6091 = vpow2.f32 %v5059_v26  ;;  %9067 = vst [vmem:[#allocation22_spill] sm:$0xff] %v6951_v41  ;;  %v1142_v26 = vsub.f32 %v6544_v14, %v6793_v42  ;;  %v1191_v14 = vmul.f32 %v6812_v57, %v1165_v49  ;;  %vm8978_vm3 = vcmp.eq.s32.totalorder %v6904_v15, 1 }
 0x275   : > { %v6070_v8 = vpop.eup %6069  ;;  %v1285_v35 = vadd.f32 1.0, %v6068_v34  ;;  %6093 = vpow2.f32 %v5051_v7  ;;  %vm1450_vm4 = vcmp.eq.s32.totalorder %v6934_v62, 1  ;;  %vm1447_vm5 = vcmp.eq.s32.totalorder %v6938_v55, 1 }
 0x276   : > { %v6072_v29 = vpop.eup %6071  ;;  %v1286_v19 = vadd.f32 1.0, %v6070_v8  ;;  %v1144_v8 = vsub.f32 %v6564_v47, %v6793_v42  ;;  %v1166_v1 = vmul.f32 %v6799_v44, %v1142_v26  ;;  %v6966_v42 = vpop.permute.xlu1 %1415  ;;  %v6975_v26 = vadd.f32 %v6835_v46, %v1191_v14 }
 0x277   : > { %v6074_v21 = vpop.eup %6073  ;;  %6095 = vrcp.f32 %v1285_v35  ;;  %v1288_v6 = vadd.f32 1.0, %v6072_v29  ;;  %v6961_v29 = vadd.f32 %v6835_v46, %v1193_v36  ;;  %9068 = vst [vmem:[#allocation23_spill] sm:$0xff] %v6966_v42  ;;  %v1170_v36 = vmul.f32 %v6799_v44, %v1146_v10  ;;  %v6970_v49 = vpop.permute.xlu0 %1406 }
 0x278   : > { %v6076_v34 = vpop.eup %6075  ;;  %6097 = vrcp.f32 %v1286_v19  ;;  %v1284_v7 = vadd.f32 1.0, %v6074_v21  ;;  %v1195_v21 = vmul.f32 %v6812_v57, %v1169_v59  ;;  %9069 = vst [vmem:[#allocation24_spill] sm:$0xff] %v6970_v49  ;;  %vm9038_vm6 = vcmp.eq.s32.totalorder %v6948_v18, 1 }
 0x279   : > { %v6078_v25 = vpop.eup %6077  ;;  %6099 = vrcp.f32 %v1288_v6  ;;  %v1290_v35 = vadd.f32 1.0, %v6076_v34  ;;  %v1168_v6 = vmul.f32 %v6799_v44, %v1144_v8  ;;  %vm1449_vm7 = vcmp.eq.s32.totalorder %v6951_v41, 1 }
 0x27a   : > { %v6080_v52 = vpop.eup %6079  ;;  %6101 = vrcp.f32 %v1284_v7  ;;  %v1287_v43 = vadd.f32 1.0, %v6078_v25  ;;  %v6979_v44 = vadd.f32 %v6835_v46, %v1195_v21  ;;  %v1196_v25 = vmul.f32 %v6812_v57, %v1170_v36  ;;  %v6987_v21 = vpop.permute.xlu1 %1421 }
 0x27b   : > { %v6082_v39 = vpop.eup %6081  ;;  %6103 = vrcp.f32 %v1290_v35  ;;  %v1292_v19 = vadd.f32 1.0, %v6080_v52  ;;  %v5055_v52 = vmul.f32 -1.442695, %v6961_v29  ;;  %v1194_v35 = vmul.f32 %v6812_v57, %v1168_v6  ;;  %9070 = vst [vmem:[#allocation25_spill] sm:$0xff] %v6987_v21 }
 0x27c   : > { %v6084_v28 = vpop.eup %6083  ;;  %6105 = vrcp.f32 %v1287_v43  ;;  %v1289_v47 = vadd.f32 1.0, %v6082_v39  ;;  %v5057_v36 = vmul.f32 -1.442695, %v6979_v44  ;;  %vm9036_vm12 = vcmp.eq.s32.totalorder %v6966_v42, 1 }
 0x27d   : > { %v6086_v34 = vpop.eup %6085  ;;  %6107 = vrcp.f32 %v1292_v19  ;;  %v1294_v7 = vadd.f32 1.0, %v6084_v28  ;;  %v1192_v28 = vmul.f32 %v6812_v57, %v1166_v1  ;;  %vm1451_vm13 = vcmp.eq.s32.totalorder %v6970_v49, 1 }
 0x27e   : > { %6109 = vrcp.f32 %v1289_v47  ;;  %v1291_v59 = vadd.f32 1.0, %v6086_v34  ;;  %v5053_v47 = vmul.f32 -1.442695, %v6975_v26  ;;  %v6990_v34 = vpop.permute.xlu0 %1412  ;;  %vm9009_vm8 = vcmp.eq.s32.totalorder %v6987_v21, 1 }
 0x27f   : > { %v6088_v39 = vpop.eup %6087  ;;  %6111 = vrcp.f32 %v1294_v7  ;;  %9071 = vst [vmem:[#allocation26_spill] sm:$0xff] %v6990_v34  ;;  %v6994_v6 = vadd.f32 %v6835_v46, %v1192_v28  ;;  %vm9037_vm11 = vcmp.eq.s32.totalorder %v6990_v34, 1 }
 0x280   : > { %v6090_v10 = vpop.eup %6089  ;;  %6113 = vrcp.f32 %v1291_v59  ;;  %v1296_v8 = vadd.f32 1.0, %v6088_v39  ;;  %v7001_v59 = vadd.f32 %v6835_v46, %v1194_v35 }
 0x281   : > { %v6092_v43 = vpop.eup %6091  ;;  %v1293_v14 = vadd.f32 1.0, %v6090_v10  ;;  %6115 = vpow2.f32 %v5055_v52  ;;  %v6998_v52 = vadd.f32 %v6835_v46, %v1196_v25  ;;  %v7016_v35 = vmul.f32 -1.442695, %v6994_v6 }
 0x282   : > { %v6094_v19 = vpop.eup %6093  ;;  %6117 = vrcp.f32 %v1296_v8  ;;  %v1303_v1 = vadd.f32 1.0, %v6092_v43 }
 0x283   : > { %6119 = vrcp.f32 %v1293_v14  ;;  %v1295_v57 = vadd.f32 1.0, %v6094_v19  ;;  %v7024_v19 = vpop.permute.xlu1 %1442 }
 0x284   : > { %v6096_v7 = vpop.eup %6095  ;;  %6121 = vrcp.f32 %v1303_v1  ;;  %9072 = vst [vmem:[#allocation27_spill] sm:$0xff] %v7024_v19  ;;  %v7027_v1 = vmul.f32 -1.442695, %v6998_v52  ;;  %vm9007_vm9 = vcmp.eq.s32.totalorder %v7024_v19, 1 }
 0x285   : > { %v6098_v39 = vpop.eup %6097  ;;  %v1345_v10 = vmul.f32 %v6096_v7, %v6850_v53  ;;  %6123 = vrcp.f32 %v1295_v57 }
 0x286   : > { %v6100_v28 = vpop.eup %6099  ;;  %v1346_v8 = vmul.f32 %v6098_v39, %v6853_v54  ;;  %6125 = vpow2.f32 %v5053_v47  ;;  %v7040_v39 = vpop.permute.xlu0 %1418 }
 0x287   : > { %v6102_v25 = vpop.eup %6101  ;;  %v7011_v46 = vsel %vm1445_vm15, %v1345_v10, 0.0  ;;  %v1348_v53 = vmul.f32 %v6100_v28, %v6856_v56  ;;  %6127 = vpow2.f32 %v5057_v36  ;;  %v7030_v56 = vmul.f32 -1.442695, %v7001_v59  ;;  %9073 = vst [vmem:[#allocation28_spill] sm:$0xff] %v7040_v39 }
 0x288   : > { %v6104_v43 = vpop.eup %6103  ;;  %v7020_v54 = vsel %vm8977_vm0, %v1346_v8, 0.0  ;;  %v1344_v14 = vmul.f32 %v6102_v25, %v6859_v0  ;;  %vm9030_vm0 = vcmp.lt.s32.totalorder %v6362_v12, 1  ;;  %6129 = vpow2.f32 %v7016_v35 }
 0x289   : > { %v6106_v47 = vpop.eup %6105  ;;  %v7036_v7 = vsel %vm8975_vm1, %v1348_v53, 0.0  ;;  %v1350_v0 = vmul.f32 %v6104_v43, %v6865_v45  ;;  %vm9010_vm1 = vcmp.eq.s32.totalorder %v7040_v39, 1  ;;  %v9096_v34 = vrot.slane %v7020_v54, 7 }
 0x28a   : > { %v6108_v10 = vpop.eup %6107  ;;  %v7046_v25 = vsel %vm8978_vm3, %v1344_v14, 0.0  ;;  %v1347_v57 = vmul.f32 %v6106_v47, %v6868_v40  ;;  %vm9031_vm3 = vcmp.lt.s32.totalorder %v6362_v12, 7  ;;  %v9081_v33 = vrot.slane %v7036_v7, 1  ;;  %v7334_v41 = vpop.permute.xlu0 %1424 }
 0x28b   : > { %v6110_v53 = vpop.eup %6109  ;;  %v7054_v36 = vsel %vm1450_vm4, %v1350_v0, 0.0  ;;  %v1352_v28 = vmul.f32 %v6108_v10, %v6871_v30  ;;  %v9085_v37 = vrot.slane %v7046_v25, 7  ;;  %9116 = vst [vmem:[#allocation29_spill] sm:$0xff] %v7334_v41 }
 0x28c   : > { %v6112_v8 = vpop.eup %6111  ;;  %v7061_v40 = vsel %vm1447_vm5, %v1347_v57, 0.0  ;;  %v1349_v47 = vmul.f32 %v6110_v53, %v6874_v4  ;;  %v5973_v57 = vld [vmem:[#allocation2 + $0x4] ss:$8 sps:$4 sm:$0xff]  }
 0x28d   : > { %v6114_v45 = vpop.eup %6113  ;;  %v7070_v10 = vsel %vm9038_vm6, %v1352_v28, 0.0  ;;  %v1354_v14 = vmul.f32 %v6112_v8, %v6907_v32  ;;  %5160 = vmatprep.mubr.msk.bf16.mxu0 %vm9029_vm10, %v5973_v57  ;;  %v9082_v57 = vrot.slane %v7020_v54, 1  ;;  %v9095_v42 = vrot.slane %v7061_v40, 7 }
 0x28e   : > { %v6116_v51 = vpop.eup %6115  ;;  %v7077_v53 = vsel %vm1449_vm7, %v1349_v47, 0.0  ;;  %v1351_v43 = vmul.f32 %v6114_v45, %v6912_v50  ;;  %v5969_v45 = vld [vmem:[%s8953_s6 + $0xb8] sm:$0xff]   ;;  %v9090_v21 = vrot.slane %v7070_v10, 7 }
 0x28f   : > { %v6118_v0 = vpop.eup %6117  ;;  %v7084_v28 = vsel %vm9036_vm12, %v1354_v14, 0.0  ;;  %v1299_v32 = vadd.f32 1.0, %v6116_v51  ;;  %v1530_v4 = vrot.slane %v7077_v53, 1  ;;  %v5970_v14 = vld [vmem:[%s8953_s6 + $0x48] sm:$0xff]   ;;  %v5791_v38 = vpack.i.bf16 %v7077_v53, %v7036_v7  ;;  %2101 = vmatpush2.bf16.msra.mxu1 %v5969_v45 }
 0x290   : > { %v6120_v8 = vpop.eup %6119  ;;  %v7090_v47 = vsel %vm1451_vm13, %v1351_v43, 0.0  ;;  %v1356_v50 = vmul.f32 %v6118_v0, %v6921_v48  ;;  %2302 = vmatpush2.bf16.msra.mxu0 %v5970_v14 }
 0x291   : > { %v6122_v51 = vpop.eup %6121  ;;  %v1353_v43 = vmul.f32 %v6120_v8, %v6924_v9  ;;  %v1532_v30 = vrot.slane %v7090_v47, 1  ;;  %6131 = vrcp.f32 %v1299_v32  ;;  %5792 = vrot.lane.b32.xlu1 %v5791_v38, %s6246_s23  ;;  %v5781_v38 = vpack.i.bf16 %v7011_v46, %v7046_v25 }
 0x292   : > { %v6124_v63 = vpop.eup %6123  ;;  %v7105_v48 = vsel %vm9009_vm8, %v1356_v50, 0.0  ;;  %v1363_v0 = vmul.f32 %v6122_v51, %v6927_v2  ;;  %v9074_v50 = vmov 0   ;;  %v5786_v51 = vpack.i.bf16 %v7061_v40, %v7020_v54 }
 0x293   : > { %v6126_v20 = vpop.eup %6125  ;;  %v1473_v9 = vsel %vm9037_vm11, %v1353_v43, 0.0  ;;  %v1355_v8 = vmul.f32 %v6124_v63, %v6930_v16  ;;  %2102 = vmatprep.subr.bf16.mxu1 %v9074_v50  ;;  %2303 = vmatprep.subr.bf16.mxu0 %v9074_v50  ;;  %v5971_v63 = vld [vmem:[%s8953_s6 + $0xb0] sm:$0xff]   ;;  %v5972_v16 = vld [vmem:[%s8953_s6 + $0x40] sm:$0xff]   ;;  %v9092_v39 = vrot.slane %v7090_v47, 7 }
 0x294   : > { %v6128_v2 = vpop.eup %6127  ;;  %v7121_v45 = vsel %vm9007_vm9, %v1363_v0, 0.0  ;;  %v1297_v14 = vadd.f32 1.0, %v6126_v20  ;;  %v1493_v32 = vrot.slane %v1473_v9, 7  ;;  %v1534_v43 = vrot.slane %v1473_v9, 1  ;;  %2103 = vmatpush2.bf16.msra.mxu1 %v5971_v63  ;;  %2304 = vmatpush2.bf16.msra.mxu0 %v5972_v16 }
 0x295   : > { %v1475_v0 = vsel %vm9010_vm1, %v1355_v8, 0.0  ;;  %v1301_v35 = vadd.f32 1.0, %v6128_v2  ;;  %v5801_v58 = vpack.i.bf16 %v1473_v9, %v7070_v10  ;;  %2104 = vmatprep.subr.bf16.mxu1 %v9074_v50  ;;  %v9075_v8 = vmov 0.0   ;;  %5782 = vrot.lane.b32.xlu0 %v5781_v38, %s6246_s23 }
 0x296   : > { %6133 = vrcp.f32 %v1297_v14  ;;  %v1495_v17 = vrot.slane %v1475_v0, 7  ;;  %v1536_v3 = vrot.slane %v1475_v0, 1  ;;  %5597 = vmatprep.subr.mxu0 %v9075_v8  ;;  %v5796_v2 = vpack.i.bf16 %v7090_v47, %v7054_v36 }
 0x297   : > { %6135 = vpow2.f32 %v7027_v1  ;;  %v9076_v14 = vrot.slane %v7054_v36, 1  ;;  %v9077_v9 = vrot.slane %v7077_v53, 7  ;;  %v9078_v16 = vrot.slane %v7036_v7, 7  ;;  %5802 = vrot.lane.b32.xlu1 %v5801_v58, %s6246_s23 }
 0x298   : > { %6137 = vpow2.f32 %v7030_v56  ;;  %v9080_v38 = vrot.slane %v7061_v40, 7  ;;  %v9083_v56 = vrot.slane %v7011_v46, 1  ;;  %vm9008_vm9 = vcmp.eq.s32.totalorder %v7334_v41, 1 }
 0x299   : > { %v7149_v63 = vsel %vm9031_vm3, %v1530_v4, %v9076_v14  ;;  %v7157_v20 = vsel %vm9030_vm0, %v9078_v16, %v9077_v9  ;;  %v9079_v1 = vmov %v9078_v16  ;;  %v7174_v9 = vsel %vm9031_vm3, %v9081_v33, %v1530_v4  ;;  %5787 = vrot.lane.b32.xlu0 %v5786_v51, %s6246_s23 }
 0x29a   : > { %v7168_v14 = vsel %vm9030_vm0, %v9080_v38, %v9079_v1  ;;  %v7182_v58 = vsel %vm9031_vm3, %v9083_v56, %v9082_v57  ;;  %v9084_v16 = vrot.slane %v7011_v46, 7  ;;  %v9086_v38 = vmov %v9085_v37 }
 0x29b   : > { %v9087_v33 = vrot.slane %v7121_v45, 7  ;;  %v9088_v19 = vmov %v9083_v56  ;;  %v9089_v57 = vrot.slane %v7046_v25, 1  ;;  %6139 = vrcp.f32 %v1301_v35 }
 0x29c   : > { %v7190_v1 = vsel %vm9030_vm0, %v9085_v37, %v9084_v16  ;;  %v7212_v37 = vsel %vm9030_vm0, %v9090_v21, %v1493_v32  ;;  %v9091_v16 = vmov %v9090_v21 }
 0x29d   : > { %v7198_v4 = vsel %vm9030_vm0, %v9087_v33, %v9086_v38  ;;  %v7206_v56 = vsel %vm9031_vm3, %v9089_v57, %v9088_v19  ;;  %v7220_v38 = vsel %vm9030_vm0, %v9092_v39, %v9091_v16  ;;  %v9093_v33 = vrot.slane %v7084_v28, 1  ;;  %5797 = vrot.lane.b32.xlu0 %v5796_v2, %s6246_s23  ;;  %v7343_v2 = vpop.permute.xlu1 %1430 }
 0x29e   : > { %v9094_v57 = vrot.slane %v7070_v10, 1  ;;  %v7240_v39 = vsel %vm9030_vm0, %v9096_v34, %v9095_v42  ;;  %v9097_v16 = vmov %v9096_v34  ;;  %v9102_v34 = vrot.slane %v7020_v54, 1  ;;  %9117 = vst [vmem:[#allocation30_spill] sm:$0xff] %v7343_v2 }
 0x29f   : > { %v7226_v19 = vsel %vm9031_vm3, %v1534_v43, %v9093_v33  ;;  %v9098_v33 = vrot.slane %v7011_v46, 7  ;;  %v9103_v46 = vrot.slane %v7105_v48, 7 }
 0x2a0   : > { %v7232_v21 = vsel %vm9031_vm3, %v9094_v57, %v1534_v43  ;;  %v9099_v43 = vrot.slane %v7036_v7, 1  ;;  %v9100_v57 = vrot.slane %v7061_v40, 1  ;;  %v9104_v7 = vrot.slane %v7090_v47, 7 }
 0x2a1   : > { %v7249_v18 = vsel %vm9030_vm0, %v9098_v33, %v9097_v16  ;;  %v7271_v16 = vsel %vm9030_vm0, %v1495_v17, %v9103_v46  ;;  %v9105_v33 = vrot.slane %v7054_v36, 7  ;;  %v9107_v40 = vrot.slane %v7077_v53, 7 }
 0x2a2   : > { %v7257_v49 = vsel %vm9031_vm3, %v9100_v57, %v9099_v43  ;;  %v9101_v42 = vmov %v9100_v57  ;;  %v9109_v47 = vrot.slane %v7054_v36, 1 }
 0x2a3   : > { %v7265_v51 = vsel %vm9031_vm3, %v9102_v34, %v9101_v42  ;;  %v7279_v43 = vsel %vm9030_vm0, %v9105_v33, %v9104_v7  ;;  %v9106_v54 = vmov %v9105_v33  ;;  %v9108_v42 = vrot.slane %v7070_v10, 1 }
 0x2a4   : > { %v7287_v57 = vsel %vm9030_vm0, %v9107_v40, %v9106_v54  ;;  %v7299_v46 = vsel %vm9031_vm3, %v9109_v47, %v1532_v30  ;;  %v9110_v7 = vrot.slane %v7084_v28, 7  ;;  %v9112_v54 = vrot.slane %v7105_v48, 1  ;;  %v1814_v47 = vld [vmem:[#allocation2 + $0x8] sm:$0xff] }
 0x2a5   : > { %v7293_v34 = vsel %vm9031_vm3, %v1532_v30, %v9108_v42  ;;  %v9113_v30 = vrot.slane %v7084_v28, 1  ;;  %v1813_v42 = vld [vmem:[#allocation2] sm:$0xff] }
 0x2a6   : > { %v7305_v53 = vsel %vm9030_vm0, %v9110_v7, %v1495_v17  ;;  %v9111_v33 = vmov %v9110_v7  ;;  %v7317_v36 = vsel %vm9031_vm3, %v1536_v3, %v9112_v54  ;;  %v6130_v17 = vpop.eup %6129  ;;  %v9114_v7 = vrot.slane %v7046_v25, 1  ;;  %v5975_v25 = vld [vmem:[%s8953_s6 + $0xa8] sm:$0xff]  }
 0x2a7   : > { %v7311_v10 = vsel %vm9030_vm0, %v1493_v32, %v9111_v33  ;;  %v7323_v40 = vsel %vm9031_vm3, %v9113_v30, %v1536_v3  ;;  %v9115_v32 = vrot.slane %v7121_v45, 1  ;;  %v6132_v62 = vpop.eup %6131  ;;  %v1298_v54 = vadd.f32 1.0, %v6130_v17  ;;  %2105 = vmatpush2.bf16.msra.mxu1 %v5975_v25 }
 0x2a8   : > { %v5806_v3 = vpack.i.bf16 %v1475_v0, %v7084_v28  ;;  %v5146_v30 = vcombine.low %v1813_v42, %v1814_v47  ;;  %v6134_v5 = vpop.eup %6133  ;;  %2106 = vmatprep.subr.bf16.mxu1 %v9074_v50 }
 0x2a9   : > { %v7331_v33 = vsel %vm9031_vm3, %v9115_v32, %v9114_v7  ;;  %6141 = vrcp.f32 %v1298_v54  ;;  %v1357_v7 = vmul.f32 %v6134_v5, %v6975_v26  ;;  %v6136_v35 = vpop.eup %6135  ;;  %v9118_v26 = vrot.slane %v7105_v48, 7 }
 0x2aa   : > { %5807 = vrot.lane.b32.xlu0 %v5806_v3, %s6246_s23  ;;  %2306 = vmatmul.mubr.bf16.vlgmr.msra.gmra.mxu0 %v5146_v30  ;;  %v6138_v28 = vpop.eup %6137  ;;  %v1302_v17 = vadd.f32 1.0, %v6136_v35  ;;  %v9119_v3 = vrot.slane %v7105_v48, 1  ;;  %v1359_v30 = vmul.f32 %v6132_v62, %v6961_v29 }
 0x2ab   : > { %v1477_v0 = vsel %vm9008_vm9, %v1357_v7, 0.0  ;;  %v1300_v32 = vadd.f32 1.0, %v6138_v28  ;;  %vm9017_vm9 = vcmp.eq.s32.totalorder %v7343_v2, 1  ;;  %v7364_v7 = vpop.permute.xlu1 %1436  ;;  %v6140_v35 = vpop.eup %6139 }
 0x2ac   : > { %v1497_v42 = vrot.slane %v1477_v0, 7  ;;  %v1538_v47 = vrot.slane %v1477_v0, 1  ;;  %6143 = vrcp.f32 %v1302_v17  ;;  %v5811_v5 = vpack.i.bf16 %v1477_v0, %v7105_v48  ;;  %9120 = vst [vmem:[#allocation31_spill] sm:$0xff] %v7364_v7  ;;  %v7366_v28 = vpop.permute.xlu0 %1427 }
 0x2ad   : > { %6145 = vrcp.f32 %v1300_v32  ;;  %9121 = vst [vmem:[#allocation32_spill] sm:$0xff] %v7366_v28  ;;  %v1479_v0 = vsel %vm9017_vm9, %v1359_v30, 0.0  ;;  %vm9035_vm8 = vcmp.eq.s32.totalorder %v7366_v28, 1  ;;  %v1361_v48 = vmul.f32 %v6140_v35, %v6979_v44  ;;  %v5976_v44 = vld [vmem:[%s8953_s6 + $0xa0] sm:$0xff]  }
 0x2ae   : > { %v7353_v54 = vsel %vm9030_vm0, %v9118_v26, %v1497_v42  ;;  %v7359_v25 = vsel %vm9031_vm3, %v9119_v3, %v1538_v47  ;;  %5812 = vrot.lane.b32.xlu1 %v5811_v5, %s6246_s23  ;;  %v1499_v62 = vrot.slane %v1479_v0, 7  ;;  %v1540_v29 = vrot.slane %v1479_v0, 1  ;;  %2107 = vmatpush2.bf16.msra.mxu1 %v5976_v44 }
 0x2af   : > { %vm9018_vm1 = vcmp.eq.s32.totalorder %v7364_v7, 1  ;;  %v7374_v5 = vpop.permute.xlu1 %1439  ;;  %2623 = vmatprep.subr.bf16.mxu1 %v9074_v50  ;;  %v9124_v44 = vrot.slane %v7121_v45, 7 }
 0x2b0   : > { %9122 = vst [vmem:[#allocation33_spill] sm:$0xff] %v7374_v5  ;;  %v7378_v2 = vpop.permute.xlu0 %1433  ;;  %v1481_v55 = vsel %vm9018_vm1, %v1361_v48, 0.0  ;;  %vm9033_vm9 = vcmp.eq.s32.totalorder %v7374_v5, 1 }
 0x2b1   : > { %9123 = vst [vmem:[#allocation34_spill] sm:$0xff] %v7378_v2  ;;  %vm9034_vm1 = vcmp.eq.s32.totalorder %v7378_v2, 1 }
 0x2b6   : > { %v6142_v17 = vpop.eup %6141 }
 0x2b7   : > { %v1358_v32 = vmul.f32 %v6142_v17, %v6994_v6 }
 0x2b9   : > { %v1478_v26 = vsel %vm9035_vm8, %v1358_v32, 0.0  ;;  %v6144_v6 = vpop.eup %6143 }
 0x2ba   : > { %v1498_v3 = vrot.slane %v1478_v26, 7  ;;  %v1539_v41 = vrot.slane %v1478_v26, 1  ;;  %v5816_v30 = vpack.i.bf16 %v1479_v0, %v1478_v26  ;;  %v6146_v32 = vpop.eup %6145  ;;  %v1362_v26 = vmul.f32 %v6144_v6, %v6998_v52 }
 0x2bb   : > { %v1360_v7 = vmul.f32 %v6146_v32, %v7001_v59 }
 0x2bc   : > { %5817 = vrot.lane.b32.xlu0 %v5816_v30, %s6246_s23  ;;  %v7389_v35 = vsel %vm9031_vm3, %v1538_v47, %v1539_v41  ;;  %v7393_v17 = vsel %vm9030_vm0, %v1498_v3, %v1499_v62  ;;  %v7397_v0 = vsel %vm9030_vm0, %v1497_v42, %v1498_v3  ;;  %v7401_v48 = vsel %vm9031_vm3, %v1539_v41, %v1540_v29 }
 0x2bd   : > { %v1501_v47 = vrot.slane %v1481_v55, 7  ;;  %v1542_v30 = vrot.slane %v1481_v55, 1  ;;  %v1482_v42 = vsel %vm9033_vm9, %v1362_v26, 0.0  ;;  %v1480_v41 = vsel %vm9034_vm1, %v1360_v7, 0.0 }
 0x2be   : > { %v1502_v3 = vrot.slane %v1482_v42, 7  ;;  %v1543_v28 = vrot.slane %v1482_v42, 1  ;;  %v5826_v31 = vpack.i.bf16 %v7121_v45, %v1482_v42  ;;  %v1500_v52 = vrot.slane %v1480_v41, 7 }
 0x2bf   : > { %v1541_v6 = vrot.slane %v1480_v41, 1  ;;  %v5821_v15 = vpack.i.bf16 %v1481_v55, %v1480_v41  ;;  %v9125_v26 = vrot.slane %v7121_v45, 1  ;;  %v2765_v41 = vld [vmem:[%s8954_s7 + $0x8] sm:$0xff] }
 0x2c0   : > { %5827 = vrot.lane.b32.xlu0 %v5826_v31, %s6246_s23  ;;  %v7415_v59 = vsel %vm9031_vm3, %v1542_v30, %v1543_v28  ;;  %v7421_v32 = vsel %vm9030_vm0, %v1502_v3, %v9124_v44  ;;  %v7425_v7 = vsel %vm9030_vm0, %v1501_v47, %v1502_v3  ;;  %v7436_v31 = vsel %vm9030_vm0, %v1500_v52, %v1501_v47  ;;  %v2767_v47 = vld [vmem:[%s8954_s7 + $0x18] sm:$0xff] }
 0x2c1   : > { %v7431_v55 = vsel %vm9031_vm3, %v1543_v28, %v9125_v26  ;;  %5822 = vrot.lane.b32.xlu1 %v5821_v15, %s6246_s23  ;;  %v7440_v42 = vsel %vm9030_vm0, %v1499_v62, %v1500_v52  ;;  %v7444_v3 = vsel %vm9031_vm3, %v1541_v6, %v1542_v30  ;;  %v7448_v45 = vsel %vm9031_vm3, %v1540_v29, %v1541_v6  ;;  %v2771_v15 = vld [vmem:[%s8954_s7 + $0x38] sm:$0xff]  ;;  %v2770_v28 = vld [vmem:[%s8954_s7 + $0x30] sm:$0xff]  ;;  %v2769_v62 = vld [vmem:[%s8954_s7 + $0x28] sm:$0xff] }
 0x2c2   : > { %5598 = vmatpush3.msra.mxu0 %v2771_v15  ;;  %v2768_v29 = vld [vmem:[%s8954_s7 + $0x20] sm:$0xff]  ;;  %v2766_v30 = vld [vmem:[%s8954_s7 + $0x10] sm:$0xff] }
 0x2c3   : > { %5599 = vmatprep.subr.mxu0 %v9075_v8  ;;  %v2764_v52 = vld [vmem:[%s8954_s7] sm:$0xff] }
 0x2c4   : > { %5600 = vmatpush3.msra.mxu0 %v2770_v28 }
 0x2c5   : > { %5601 = vmatprep.subr.mxu0 %v9075_v8 }
 0x2c6   : > { %5602 = vmatpush3.msra.mxu0 %v2769_v62 }
 0x2c7   : > { %5603 = vmatprep.subr.mxu0 %v9075_v8 }
 0x2c8   : > { %5604 = vmatpush3.msra.mxu0 %v2768_v29 }
 0x2c9   : > { %5605 = vmatprep.subr.mxu0 %v9075_v8 }
 0x2ca   : > { %5606 = vmatpush3.msra.mxu0 %v2767_v47 }
 0x2cb   : > { %5607 = vmatprep.subr.mxu0 %v9075_v8 }
 0x2cc   : > { %5608 = vmatpush3.msra.mxu0 %v2766_v30 }
 0x2cd   : > { %5609 = vmatprep.subr.mxu0 %v9075_v8 }
 0x2ce   : > { %5610 = vmatpush3.msra.mxu0 %v2765_v41 }
 0x2cf   : > { %5611 = vmatprep.subr.mxu0 %v9075_v8 }
 0x2d0   : > { %5612 = vmatpush3.msra.mxu0 %v2764_v52 }
 0x2d1   : > { %5616 = vmatprep.subr.mxu0 %v9075_v8 }
 0x303   : > { %v5793_v6 = vpop.permute.xlu1 %5792 }
 0x304   : > { %v5795_v44 = vunpack.i.h.bf16 %v5793_v6  ;;  %v5794_v26 = vunpack.i.l.bf16 %v5793_v6 }
 0x306   : > { %v1650_v15 = vsel %vm9029_vm10, %v7168_v14, %v5794_v26  ;;  %v1651_v28 = vsel %vm9029_vm10, %v7157_v20, %v5795_v44 }
 0x307   : > { %v5428_v62 = vpack.c.bf16 %v7174_v9, %v1650_v15  ;;  %v5429_v29 = vpack.c.bf16 %v7149_v63, %v1651_v28  ;;  %v5783_v47 = vpop.permute.xlu0 %5782 }
 0x308   : > { %v5785_v30 = vunpack.i.h.bf16 %v5783_v47  ;;  %v5784_v41 = vunpack.i.l.bf16 %v5783_v47  ;;  %v5980_v47 = vld [vmem:[%s8953_s6 + $0xf8] sm:$0xff]  }
 0x309   : > { %v5803_v5 = vpop.permute.xlu1 %5802  ;;  %1797 = vst.msk [vmem:[#allocation2 + $0x30] sm:$0xff] %vm6727_vm14, %v5428_v62  ;;  %1798 = vst.msk [vmem:[#allocation2 + $0x38] sm:$0xff] %vm6727_vm14, %v5429_v29 }
 0x30a   : > { %v5805_v52 = vunpack.i.h.bf16 %v5803_v5  ;;  %v5804_v6 = vunpack.i.l.bf16 %v5803_v5  ;;  %v1646_v14 = vsel %vm9029_vm10, %v7198_v4, %v5784_v41  ;;  %v1647_v20 = vsel %vm9029_vm10, %v7190_v1, %v5785_v30 }
 0x30b   : > { %v5424_v63 = vpack.c.bf16 %v7206_v56, %v1646_v14  ;;  %v5425_v9 = vpack.c.bf16 %v7182_v58, %v1647_v20  ;;  %v5788_v15 = vpop.permute.xlu0 %5787 }
 0x30c   : > { %v1655_v44 = vsel %vm9029_vm10, %v7212_v37, %v5805_v52  ;;  %v1654_v26 = vsel %vm9029_vm10, %v7220_v38, %v5804_v6  ;;  %v5790_v62 = vunpack.i.h.bf16 %v5788_v15  ;;  %v5789_v4 = vunpack.i.l.bf16 %v5788_v15  ;;  %v5987_v15 = vld [vmem:[%s8953_s6 + $0xe8] sm:$0xff]  }
 0x30d   : > { %v5433_v28 = vpack.c.bf16 %v7226_v19, %v1655_v44  ;;  %v5432_v5 = vpack.c.bf16 %v7232_v21, %v1654_v26  ;;  %1793 = vst.msk [vmem:[#allocation2 + $0x10] sm:$0xff] %vm6727_vm14, %v5424_v63  ;;  %1794 = vst.msk [vmem:[#allocation2 + $0x18] sm:$0xff] %vm6727_vm14, %v5425_v9 }
 0x30e   : > { %v1649_v58 = vsel %vm9029_vm10, %v7240_v39, %v5790_v62  ;;  %v1648_v1 = vsel %vm9029_vm10, %v7249_v18, %v5789_v4 }
 0x30f   : > { %1802 = vst.msk [vmem:[#allocation2 + $0x58] sm:$0xff] %vm6727_vm14, %v5433_v28  ;;  %1801 = vst.msk [vmem:[#allocation2 + $0x50] sm:$0xff] %vm6727_vm14, %v5432_v5  ;;  %v5427_v56 = vpack.c.bf16 %v7257_v49, %v1649_v58  ;;  %v5426_v37 = vpack.c.bf16 %v7265_v51, %v1648_v1  ;;  %v5798_v38 = vpop.permute.xlu0 %5797  ;;  %v5995_v5 = vld [vmem:[%s8953_s6 + $0xd8] sm:$0xff]  }
 0x310   : > { %v5800_v19 = vunpack.i.h.bf16 %v5798_v38  ;;  %v5799_v21 = vunpack.i.l.bf16 %v5798_v38  ;;  %v7588_v62 = vld [vmem:[#allocation2 + $0x30] ss:$8 sps:$4 sm:$0xff]  }
 0x311   : > { %1796 = vst.msk [vmem:[#allocation2 + $0x28] sm:$0xff] %vm6727_vm14, %v5427_v56  ;;  %1795 = vst.msk [vmem:[#allocation2 + $0x20] sm:$0xff] %vm6727_vm14, %v5426_v37 }
 0x312   : > { %v1653_v29 = vsel %vm9029_vm10, %v7279_v43, %v5800_v19  ;;  %v1652_v39 = vsel %vm9029_vm10, %v7287_v57, %v5799_v21 }
 0x313   : > { %v5431_v18 = vpack.c.bf16 %v7293_v34, %v1653_v29  ;;  %v5430_v49 = vpack.c.bf16 %v7299_v46, %v1652_v39 }
 0x314   : > { %v5977_v52 = vld [vmem:[#allocation2 + $0x10] ss:$8 sps:$4 sm:$0xff]   ;;  %v5979_v43 = vld [vmem:[#allocation2 + $0x14] ss:$8 sps:$4 sm:$0xff]  }
 0x315   : > { %1800 = vst.msk [vmem:[#allocation2 + $0x48] sm:$0xff] %vm6727_vm14, %v5431_v18  ;;  %1799 = vst.msk [vmem:[#allocation2 + $0x40] sm:$0xff] %vm6727_vm14, %v5430_v49  ;;  %5136 = vmatprep.mubr.msk.bf16.mxu1 %vm9029_vm10, %v5979_v43  ;;  %5161 = vmatprep.mubr.msk.bf16.mxu0 %vm9029_vm10, %v5979_v43 }
 0x316   : > { %2109 = vmatmul.mubr.bf16.vlgmr.msra.gmra.mxu1 %v5977_v52  ;;  %2314 = vmatmul.mubr.bf16.gmra.mxu0 %v5977_v52  ;;  %v6012_v52 = vld [vmem:[%s8953_s6 + $0x110] sm:$0xff]  }
 0x317   : > { %2624 = vmatpush1.bf16.msra.mxu1 %v5980_v47 }
 0x318   : > { %v7543_v14 = vld [vmem:[#allocation2 + $0x24] ss:$8 sps:$4 sm:$0xff]   ;;  %2625 = vmatprep.subr.bf16.mxu1 %v9074_v50  ;;  %v7563_v26 = vld [vmem:[#allocation2 + $0x20] ss:$8 sps:$4 sm:$0xff]  }
 0x319   : > { %5137 = vmatprep.mubr.msk.bf16.mxu1 %vm9029_vm10, %v7543_v14  ;;  %5162 = vmatprep.mubr.msk.bf16.mxu0 %vm9029_vm10, %v7543_v14 }
 0x31c   : > { %v5808_v51 = vpop.permute.xlu0 %5807  ;;  %v7594_v1 = vld [vmem:[#allocation2 + $0x44] ss:$8 sps:$4 sm:$0xff]  }
 0x31d   : > { %v5810_v30 = vunpack.i.h.bf16 %v5808_v51  ;;  %v5809_v41 = vunpack.i.l.bf16 %v5808_v51 }
 0x31e   : > { %2117 = vmatmul.mubr.bf16.gmra.mxu1 %v7563_v26  ;;  %2322 = vmatmul.mubr.bf16.gmra.mxu0 %v7563_v26 }
 0x31f   : > { %v1657_v57 = vsel %vm9029_vm10, %v7305_v53, %v5810_v30  ;;  %v1656_v34 = vsel %vm9029_vm10, %v7311_v10, %v5809_v41  ;;  %v5983_v53 = vld [vmem:[%s8953_s6 + $0xf0] sm:$0xff]   ;;  %v7623_v30 = vld [vmem:[#allocation2 + $0x40] ss:$8 sps:$4 sm:$0xff]  }
 0x320   : > { %v5435_v46 = vpack.c.bf16 %v7317_v36, %v1657_v57  ;;  %v5434_v6 = vpack.c.bf16 %v7323_v40, %v1656_v34  ;;  %v5813_v20 = vpop.permute.xlu1 %5812  ;;  %2626 = vmatpush1.bf16.msra.mxu1 %v5983_v53  ;;  %v6016_v57 = vld [vmem:[%s8953_s6 + $0x108] sm:$0xff]  }
 0x321   : > { %v5815_v10 = vunpack.i.h.bf16 %v5813_v20  ;;  %v5814_v36 = vunpack.i.l.bf16 %v5813_v20  ;;  %2627 = vmatprep.subr.bf16.mxu1 %v9074_v50 }
 0x322   : > { %1804 = vst.msk [vmem:[#allocation2 + $0x68] sm:$0xff] %vm6727_vm14, %v5435_v46  ;;  %1803 = vst.msk [vmem:[#allocation2 + $0x60] sm:$0xff] %vm6727_vm14, %v5434_v6  ;;  %v6018_v46 = vld [vmem:[%s8953_s6 + $0x100] sm:$0xff]  }
 0x323   : > { %v1659_v40 = vsel %vm9029_vm10, %v7353_v54, %v5815_v10  ;;  %v1658_v63 = vsel %vm9029_vm10, %v7271_v16, %v5814_v36  ;;  %v7573_v16 = vld [vmem:[#allocation2 + $0x34] ss:$8 sps:$4 sm:$0xff]   ;;  %v5991_v54 = vld [vmem:[%s8953_s6 + $0xe0] sm:$0xff]  }
 0x324   : > { %v5437_v9 = vpack.c.bf16 %v7389_v35, %v1659_v40  ;;  %v5436_v44 = vpack.c.bf16 %v7359_v25, %v1658_v63  ;;  %5138 = vmatprep.mubr.msk.bf16.mxu1 %vm9029_vm10, %v7573_v16  ;;  %5163 = vmatprep.mubr.msk.bf16.mxu0 %vm9029_vm10, %v7573_v16 }
 0x325   : > { %2628 = vmatpush1.bf16.msra.mxu1 %v5987_v15 }
 0x326   : > { %1806 = vst.msk [vmem:[#allocation2 + $0x78] sm:$0xff] %vm6727_vm14, %v5437_v9  ;;  %1805 = vst.msk [vmem:[#allocation2 + $0x70] sm:$0xff] %vm6727_vm14, %v5436_v44  ;;  %2629 = vmatprep.subr.bf16.mxu1 %v9074_v50  ;;  %2125 = vmatmul.mubr.bf16.gmra.mxu1 %v7588_v62 }
 0x327   : > { %2330 = vmatmul.mubr.bf16.gmra.mxu0 %v7588_v62  ;;  %5139 = vmatprep.mubr.msk.bf16.mxu1 %vm9029_vm10, %v7594_v1 }
 0x328   : > { %5164 = vmatprep.mubr.msk.bf16.mxu0 %vm9029_vm10, %v7594_v1 }
 0x329   : > { %2630 = vmatpush1.bf16.msra.mxu1 %v5991_v54  ;;  %v5997_v41 = vld [vmem:[#allocation2 + $0x64] ss:$8 sps:$4 sm:$0xff]   ;;  %v6000_v43 = vld [vmem:[#allocation2 + $0x60] ss:$8 sps:$4 sm:$0xff]  }
 0x32a   : > { %2631 = vmatprep.subr.bf16.mxu1 %v9074_v50 }
 0x32d   : > { %2632 = vmatpush1.bf16.msra.mxu1 %v5995_v5  ;;  %v6002_v34 = vld [vmem:[#allocation2 + $0x74] ss:$8 sps:$4 sm:$0xff]   ;;  %v6005_v20 = vld [vmem:[#allocation2 + $0x70] ss:$8 sps:$4 sm:$0xff]  }
 0x32e   : > { %v5818_v25 = vpop.permute.xlu0 %5817  ;;  %2633 = vmatprep.subr.bf16.mxu1 %v9074_v50  ;;  %2133 = vmatmul.mubr.bf16.gmra.mxu1 %v7623_v30 }
 0x32f   : > { %v5820_v35 = vunpack.i.h.bf16 %v5818_v25  ;;  %v5819_v28 = vunpack.i.l.bf16 %v5818_v25  ;;  %2338 = vmatmul.mubr.bf16.gmra.mxu0 %v7623_v30 }
 0x331   : > { %v1661_v4 = vsel %vm9029_vm10, %v7393_v17, %v5820_v35  ;;  %v1660_v58 = vsel %vm9029_vm10, %v7397_v0, %v5819_v28  ;;  %v5999_v0 = vld [vmem:[%s8953_s6 + $0xd0] sm:$0xff]  }
 0x332   : > { %v5439_v56 = vpack.c.bf16 %v7448_v45, %v1661_v4  ;;  %v5438_v37 = vpack.c.bf16 %v7401_v48, %v1660_v58  ;;  %v5828_v17 = vpop.permute.xlu0 %5827  ;;  %2634 = vmatpush1.bf16.msra.mxu1 %v5999_v0 }
 0x333   : > { %v5823_v48 = vpop.permute.xlu1 %5822  ;;  %v5830_v45 = vunpack.i.h.bf16 %v5828_v17  ;;  %v5829_v38 = vunpack.i.l.bf16 %v5828_v17  ;;  %2635 = vmatprep.subr.bf16.mxu1 %v9074_v50 }
 0x334   : > { %1808 = vst.msk [vmem:[#allocation2 + $0x88] sm:$0xff] %vm6727_vm14, %v5439_v56  ;;  %1807 = vst.msk [vmem:[#allocation2 + $0x80] sm:$0xff] %vm6727_vm14, %v5438_v37  ;;  %v5825_v19 = vunpack.i.h.bf16 %v5823_v48  ;;  %v5824_v21 = vunpack.i.l.bf16 %v5823_v48 }
 0x335   : > { %v1665_v29 = vsel %vm9029_vm10, %v7421_v32, %v5830_v45  ;;  %v1664_v39 = vsel %vm9029_vm10, %v7425_v7, %v5829_v38  ;;  %v6001_v32 = vld [vmem:[%s8953_s6 + $0xc8] sm:$0xff]  }
 0x336   : > { %v1663_v18 = vsel %vm9029_vm10, %v7436_v31, %v5825_v19  ;;  %v1662_v49 = vsel %vm9029_vm10, %v7440_v42, %v5824_v21  ;;  %v5442_v51 = vpack.c.bf16 %v7431_v55, %v1664_v39  ;;  %v5443_v47 = vpack.c.bf16 %v7331_v33, %v1665_v29  ;;  %v7634_v42 = vld [vmem:[#allocation2 + $0x54] ss:$8 sps:$4 sm:$0xff]   ;;  %v2756_v33 = vld [vmem:[%s523_s25] sm:$0x1]  ;;  %2636 = vmatpush1.bf16.msra.mxu1 %v6001_v32 }
 0x337   : > { %v5441_v7 = vpack.c.bf16 %v7415_v59, %v1663_v18  ;;  %v5440_v31 = vpack.c.bf16 %v7444_v3, %v1662_v49  ;;  %5140 = vmatprep.mubr.msk.bf16.mxu1 %vm9029_vm10, %v7634_v42  ;;  %5165 = vmatprep.mubr.msk.bf16.mxu0 %vm9029_vm10, %v7634_v42  ;;  %v6004_v59 = vld [vmem:[%s8953_s6 + $0xc0] sm:$0xff]   ;;  %v5236_v55 = vmul.f32 -1.442695, %v2756_v33  ;;  %v7655_v3 = vld [vmem:[#allocation2 + $0x50] ss:$8 sps:$4 sm:$0xff]  }
 0x338   : > { %1811 = vst.msk [vmem:[#allocation2 + $0xa0] sm:$0xff] %vm6727_vm14, %v5442_v51  ;;  %1812 = vst.msk [vmem:[#allocation2 + $0xa8] sm:$0xff] %vm6727_vm14, %v5443_v47  ;;  %2637 = vmatprep.subr.bf16.mxu1 %v9074_v50  ;;  %2141 = vmatmul.mubr.bf16.gmra.mxu1 %v7655_v3 }
 0x339   : > { %1810 = vst.msk [vmem:[#allocation2 + $0x98] sm:$0xff] %vm6727_vm14, %v5441_v7  ;;  %1809 = vst.msk [vmem:[#allocation2 + $0x90] sm:$0xff] %vm6727_vm14, %v5440_v31  ;;  %2346 = vmatmul.mubr.bf16.gmra.mxu0 %v7655_v3  ;;  %6147 = vpow2.f32 %v5236_v55  ;;  %5141 = vmatprep.mubr.msk.bf16.mxu1 %vm9029_vm10, %v5997_v41 }
 0x33a   : > { %2638 = vmatpush1.bf16.msra.mxu1 %v6004_v59  ;;  %5166 = vmatprep.mubr.msk.bf16.mxu0 %vm9029_vm10, %v5997_v41 }
 0x33b   : > { %2647 = vmatprep.subr.bf16.mxu1 %v9074_v50  ;;  %v6006_v53 = vld [vmem:[#allocation2 + $0x84] ss:$8 sps:$4 sm:$0xff]   ;;  %v6009_v36 = vld [vmem:[#allocation2 + $0x80] ss:$8 sps:$4 sm:$0xff]  }
 0x33e   : > { %2648 = vmatpush2.bf16.msra.mxu1 %v6008_v61 }
 0x33f   : > { %2649 = vmatprep.subr.bf16.mxu1 %v9074_v50  ;;  %v6014_v9 = vld [vmem:[#allocation2 + $0xa4] ss:$8 sps:$4 sm:$0xff]   ;;  %v6017_v54 = vld [vmem:[#allocation2 + $0xa0] ss:$8 sps:$4 sm:$0xff]  }
 0x340   : > { %2149 = vmatmul.mubr.bf16.gmra.mxu1 %v6000_v43  ;;  %v6010_v40 = vld [vmem:[#allocation2 + $0x94] ss:$8 sps:$4 sm:$0xff]   ;;  %v6013_v63 = vld [vmem:[#allocation2 + $0x90] ss:$8 sps:$4 sm:$0xff]  }
 0x341   : > { %2354 = vmatmul.mubr.bf16.gmra.mxu0 %v6000_v43  ;;  %5142 = vmatprep.mubr.msk.bf16.mxu1 %vm9029_vm10, %v6002_v34 }
 0x342   : > { %2650 = vmatpush2.bf16.msra.mxu1 %v6012_v52  ;;  %5167 = vmatprep.mubr.msk.bf16.mxu0 %vm9029_vm10, %v6002_v34 }
 0x343   : > { %2651 = vmatprep.subr.bf16.mxu1 %v9074_v50 }
 0x346   : > { %2652 = vmatpush2.bf16.msra.mxu1 %v6016_v57  ;;  %v6148_v6 = vpop.eup %6147 }
 0x347   : > { %2653 = vmatprep.subr.bf16.mxu1 %v9074_v50  ;;  %v2760_v10 = vadd.f32 1.0, %v6148_v6 }
 0x348   : > { %2157 = vmatmul.mubr.bf16.gmra.mxu1 %v6005_v20 }
 0x349   : > { %2362 = vmatmul.mubr.bf16.gmra.mxu0 %v6005_v20  ;;  %5143 = vmatprep.mubr.msk.bf16.mxu1 %vm9029_vm10, %v6006_v53  ;;  %6149 = vrcp.f32 %v2760_v10 }
 0x34a   : > { %2654 = vmatpush2.bf16.msra.mxu1 %v6018_v46  ;;  %5168 = vmatprep.mubr.msk.bf16.mxu0 %vm9029_vm10, %v6006_v53 }
 0x350   : > { %2165 = vmatmul.mubr.bf16.gmra.mxu1 %v6009_v36 }
 0x351   : > { %2370 = vmatmul.mubr.bf16.gmra.mxu0 %v6009_v36  ;;  %5144 = vmatprep.mubr.msk.bf16.mxu1 %vm9029_vm10, %v6010_v40 }
 0x352   : > { %5169 = vmatprep.mubr.msk.bf16.mxu0 %vm9029_vm10, %v6010_v40 }
 0x356   : > { %v6150_v44 = vpop.eup %6149 }
 0x357   : > { %v2763_v15 = vmul.f32 %v6150_v44, %v2756_v33 }
 0x358   : > { %2173 = vmatmul.mubr.bf16.gmra.mxu1 %v6013_v63 }
 0x359   : > { %2378 = vmatmul.mubr.bf16.gmra.mxu0 %v6013_v63  ;;  %5145 = vmatprep.mubr.msk.bf16.mxu1 %vm9029_vm10, %v6014_v9 }
 0x35a   : > { %5613 = vmatprep.mubr.msk.f32.mxu0 %vm9032_vm2, %v9075_v8 }
 0x360   : > { %2181 = vmatmul.mubr.bf16.gmra.mxu1 %v6017_v54 }
 0x361   : > { %5614 = vmatmul.mubr.msk.f32.vlgmr.msra.gmra.mxu0 %vm9029_vm10, %v2763_v15  ;;  %5226 = vmatprep.mubr.msk.bf16.mxu1 %vm9029_vm10, %v7543_v14  ;;  %v6019_v14 = vld [vmem:[#allocation2 + $0xb4] ss:$8 sps:$4 sm:$0xff]  }
 0x362   : > { %5624 = vmatprep.mubr.msk.f32.mxu0 %vm9032_vm2, %v9075_v8 }
 0x368   : > { %2656 = vmatmul.mubr.bf16.vlgmr.msra.gmra.mxu1 %v7563_v26  ;;  %v6021_v26 = vld [vmem:[#allocation2 + $0xb0] ss:$8 sps:$4 sm:$0xff]  }
 0x369   : > { %5227 = vmatprep.mubr.msk.bf16.mxu1 %vm9029_vm10, %v7573_v16 }
 0x36a   : > { %v7691_v25 = vpop.f32.mrf.mxu0 }
 0x36c   : > { %v2309_v35 = vpop.f32.mrf.mxu0 }
 0x36e   : > { %v7693_v28 = vpop.f32.mrf.mxu0 }
 0x370   : > { %v2312_v5 = vpop.f32.mrf.mxu0  ;;  %2664 = vmatmul.mubr.bf16.gmra.mxu1 %v7588_v62 }
 0x371   : > { %5228 = vmatprep.mubr.msk.bf16.mxu1 %vm9029_vm10, %v7594_v1 }
 0x378   : > { %2672 = vmatmul.mubr.bf16.gmra.mxu1 %v7623_v30 }
 0x379   : > { %5229 = vmatprep.mubr.msk.bf16.mxu1 %vm9029_vm10, %v7634_v42 }
 0x380   : > { %2680 = vmatmul.mubr.bf16.gmra.mxu1 %v7655_v3 }
 0x381   : > { %5230 = vmatprep.mubr.msk.bf16.mxu1 %vm9029_vm10, %v5997_v41 }
 0x388   : > { %2688 = vmatmul.mubr.bf16.gmra.mxu1 %v6000_v43 }
 0x389   : > { %5231 = vmatprep.mubr.msk.bf16.mxu1 %vm9029_vm10, %v6002_v34 }
 0x390   : > { %2696 = vmatmul.mubr.bf16.gmra.mxu1 %v6005_v20 }
 0x391   : > { %5232 = vmatprep.mubr.msk.bf16.mxu1 %vm9029_vm10, %v6006_v53 }
 0x398   : > { %2704 = vmatmul.mubr.bf16.gmra.mxu1 %v6009_v36 }
 0x399   : > { %5233 = vmatprep.mubr.msk.bf16.mxu1 %vm9029_vm10, %v6010_v40 }
 0x3a0   : > { %2712 = vmatmul.mubr.bf16.gmra.mxu1 %v6013_v63 }
 0x3a1   : > { %5234 = vmatprep.mubr.msk.bf16.mxu1 %vm9029_vm10, %v6014_v9 }
 0x3a8   : > { %2720 = vmatmul.mubr.bf16.gmra.mxu1 %v6017_v54 }
 0x3a9   : > { %5235 = vmatprep.mubr.msk.bf16.mxu1 %vm9029_vm10, %v6019_v14 }
 0x3b0   : > { %2728 = vmatmul.mubr.bf16.gmra.mxu1 %v6021_v26 }
 0x3d6   : > { %v7711_v16 = vpop.f32.mrf.mxu1  ;;  %v2315_v62 = vpop.f32.mrf.mxu0 }
 0x3d8   : > { %v2112_v4 = vpop.f32.mrf.mxu1  ;;  %v2317_v58 = vpop.f32.mrf.mxu0 }
 0x3d9   : > { %v2918_v58 = vmul.u32 4, %v6360_v11 }
 0x3da   : > { %v7713_v1 = vpop.f32.mrf.mxu1  ;;  %v2318_v56 = vpop.f32.mrf.mxu0 }
 0x3db   : > { %vm2922_vm14 = vcmp.ge.s32.totalorder %v6379_v22, %v2918_v58  ;;  %vm2921_vm0 = vcmp.ge.s32.totalorder %v6382_v23, %v2918_v58  ;;  %vm2920_vm9 = vcmp.ge.s32.totalorder %v6385_v24, %v2918_v58  ;;  %vm2919_vm12 = vcmp.ge.s32.totalorder %v6362_v12, %v2918_v58 }
 0x3dc   : > { %v2115_v37 = vpop.f32.mrf.mxu1  ;;  %v2320_v17 = vpop.f32.mrf.mxu0 }
 0x3de   : > { %v2118_v0 = vpop.f32.mrf.mxu1  ;;  %v2323_v48 = vpop.f32.mrf.mxu0 }
 0x3df   : > { %v7715_v45 = vadd.f32 %v2315_v62, %v2118_v0 }
 0x3e0   : > { %v2120_v38 = vpop.f32.mrf.mxu1  ;;  %v2325_v19 = vpop.f32.mrf.mxu0 }
 0x3e2   : > { %v2121_v21 = vpop.f32.mrf.mxu1  ;;  %v2326_v29 = vpop.f32.mrf.mxu0 }
 0x3e3   : > { %v7717_v39 = vadd.f32 %v2318_v56, %v2121_v21  ;;  %v2923_v56 = vmul.u32 4, %v6365_v13  ;;  %v9126_v13 = vmov 1.0  }
 0x3e4   : > { %v2123_v18 = vpop.f32.mrf.mxu1  ;;  %v2328_v49 = vpop.f32.mrf.mxu0 }
 0x3e5   : > { %vm2927_vm10 = vcmp.lt.s32.totalorder %v6379_v22, %v2923_v56  ;;  %vm2926_vm2 = vcmp.lt.s32.totalorder %v6382_v23, %v2923_v56  ;;  %vm2925_vm1 = vcmp.lt.s32.totalorder %v6385_v24, %v2923_v56  ;;  %vm2924_vm11 = vcmp.lt.s32.totalorder %v6362_v12, %v2923_v56 }
 0x3e6   : > { %v2126_v51 = vpop.f32.mrf.mxu1  ;;  %vm2931_vm3 = vmand %vm2922_vm14, %vm2927_vm10 }
 0x3e7   : > { %v2331_v47 = vpop.f32.mrf.mxu0  ;;  %v7719_v30 = vadd.f32 %v2323_v48, %v2126_v51  ;;  %5617 = vmatpush3.msk.msra.mxu0 %vm2931_vm3, %v9126_v13  ;;  %vm2930_vm8 = vmand %vm2921_vm0, %vm2926_vm2 }
 0x3e8   : > { %v2128_v32 = vpop.f32.mrf.mxu1  ;;  %5618 = vmatprep.subr.mxu0 %v9075_v8  ;;  %vm2929_vm6 = vmand %vm2920_vm9, %vm2925_vm1 }
 0x3e9   : > { %v2333_v7 = vpop.f32.mrf.mxu0  ;;  %5619 = vmatpush3.msk.msra.mxu0 %vm2930_vm8, %v9126_v13  ;;  %vm2928_vm10 = vmand %vm2919_vm12, %vm2924_vm11  ;;  %vm9132_vm11 = vcmask 261120  }
 0x3ea   : > { %v2129_v31 = vpop.f32.mrf.mxu1  ;;  %5620 = vmatprep.subr.mxu0 %v9075_v8  ;;  %vm9133_vm8 = vmmov %vm9132_vm11 }
 0x3eb   : > { %v2334_v42 = vpop.f32.mrf.mxu0  ;;  %v7721_v33 = vadd.f32 %v2326_v29, %v2129_v31  ;;  %5621 = vmatpush3.msk.msra.mxu0 %vm2929_vm6, %v9126_v13  ;;  %vm9134_vm0 = vmmov %vm9133_vm8 }
 0x3ec   : > { %v2131_v59 = vpop.f32.mrf.mxu1  ;;  %5622 = vmatprep.subr.mxu0 %v9075_v8  ;;  %vm9135_vm1 = vmmov %vm9134_vm0 }
 0x3ed   : > { %v2336_v55 = vpop.f32.mrf.mxu0  ;;  %5623 = vmatpush3.msk.msra.mxu0 %vm2928_vm10, %v9126_v13  ;;  %vm9138_vm6 = vmmov %vm9134_vm0 }
 0x3ee   : > { %v2134_v3 = vpop.f32.mrf.mxu1  ;;  %5627 = vmatprep.subr.mxu0 %v9075_v8  ;;  %vm9139_vm12 = vmmov %vm9134_vm0 }
 0x3ef   : > { %v2339_v61 = vpop.f32.mrf.mxu0  ;;  %v7723_v41 = vadd.f32 %v2331_v47, %v2134_v3  ;;  %vm9140_vm14 = vmmov %vm9134_vm0 }
 0x3f0   : > { %v2136_v52 = vpop.f32.mrf.mxu1  ;;  %vm9142_vm10 = vmmov %vm9134_vm0 }
 0x3f1   : > { %v2341_v43 = vpop.f32.mrf.mxu0 }
 0x3f2   : > { %v2137_v57 = vpop.f32.mrf.mxu1 }
 0x3f3   : > { %v2342_v34 = vpop.f32.mrf.mxu0  ;;  %v7725_v46 = vadd.f32 %v2334_v42, %v2137_v57 }
 0x3f4   : > { %v2139_v6 = vpop.f32.mrf.mxu1 }
 0x3f5   : > { %v2344_v20 = vpop.f32.mrf.mxu0 }
 0x3f8   : > { %v2142_v53 = vpop.f32.mrf.mxu1 }
 0x3f9   : > { %v2347_v10 = vpop.f32.mrf.mxu0  ;;  %v7727_v36 = vadd.f32 %v2339_v61, %v2142_v53 }
 0x3fa   : > { %v2144_v40 = vpop.f32.mrf.mxu1 }
 0x3fb   : > { %v2349_v63 = vpop.f32.mrf.mxu0 }
 0x3fc   : > { %v2145_v9 = vpop.f32.mrf.mxu1 }
 0x3fd   : > { %v2350_v44 = vpop.f32.mrf.mxu0  ;;  %v7729_v15 = vadd.f32 %v2342_v34, %v2145_v9 }
 0x3fe   : > { %v2147_v54 = vpop.f32.mrf.mxu1 }
 0x3ff   : > { %v2352_v35 = vpop.f32.mrf.mxu0 }
 0x400   : > { %v2150_v5 = vpop.f32.mrf.mxu1 }
 0x401   : > { %v2355_v14 = vpop.f32.mrf.mxu0  ;;  %v7731_v26 = vadd.f32 %v2347_v10, %v2150_v5 }
 0x402   : > { %v2152_v62 = vpop.f32.mrf.mxu1 }
 0x403   : > { %v2357_v4 = vpop.f32.mrf.mxu0 }
 0x404   : > { %v2153_v37 = vpop.f32.mrf.mxu1 }
 0x405   : > { %v2358_v17 = vpop.f32.mrf.mxu0  ;;  %v7735_v0 = vadd.f32 %v2350_v44, %v2153_v37 }
 0x406   : > { %v2155_v48 = vpop.f32.mrf.mxu1 }
 0x407   : > { %v2360_v38 = vpop.f32.mrf.mxu0 }
 0x408   : > { %v2158_v19 = vpop.f32.mrf.mxu1 }
 0x409   : > { %v2363_v22 = vpop.f32.mrf.mxu0  ;;  %v7747_v21 = vadd.f32 %v2355_v14, %v2158_v19 }
 0x40a   : > { %v2160_v23 = vpop.f32.mrf.mxu1 }
 0x40b   : > { %v2365_v29 = vpop.f32.mrf.mxu0 }
 0x40c   : > { %v2161_v24 = vpop.f32.mrf.mxu1 }
 0x40d   : > { %v2366_v18 = vpop.f32.mrf.mxu0  ;;  %v7753_v49 = vadd.f32 %v2358_v17, %v2161_v24 }
 0x40e   : > { %v2163_v51 = vpop.f32.mrf.mxu1 }
 0x40f   : > { %v2368_v47 = vpop.f32.mrf.mxu0 }
 0x410   : > { %v2166_v32 = vpop.f32.mrf.mxu1 }
 0x411   : > { %v2371_v7 = vpop.f32.mrf.mxu0  ;;  %v7757_v31 = vadd.f32 %v2363_v22, %v2166_v32  ;;  %v2311_v32 = vadd.f32 %v7693_v28, %v7713_v1 }
 0x412   : > { %v2168_v42 = vpop.f32.mrf.mxu1 }
 0x413   : > { %v2373_v59 = vpop.f32.mrf.mxu0  ;;  %v2308_v42 = vadd.f32 %v7691_v25, %v7711_v16 }
 0x414   : > { %v2169_v55 = vpop.f32.mrf.mxu1 }
 0x415   : > { %v2374_v3 = vpop.f32.mrf.mxu0  ;;  %v7759_v61 = vadd.f32 %v2366_v18, %v2169_v55 }
 0x416   : > { %v2171_v52 = vpop.f32.mrf.mxu1 }
 0x417   : > { %v2376_v43 = vpop.f32.mrf.mxu0  ;;  %v7776_v52 = vld [vmem:[%s8955_s8] ss:$0 sm:$0xff] }
 0x418   : > { %v2174_v57 = vpop.f32.mrf.mxu1 }
 0x419   : > { %v2379_v34 = vpop.f32.mrf.mxu0  ;;  %v7761_v6 = vadd.f32 %v2371_v7, %v2174_v57 }
 0x41a   : > { %v2176_v20 = vpop.f32.mrf.mxu1 }
 0x41b   : > { %v2381_v53 = vpop.f32.mrf.mxu0 }
 0x41c   : > { %v2177_v10 = vpop.f32.mrf.mxu1 }
 0x41d   : > { %v2382_v40 = vpop.f32.mrf.mxu0  ;;  %v7763_v63 = vadd.f32 %v2374_v3, %v2177_v10 }
 0x41e   : > { %v2179_v9 = vpop.f32.mrf.mxu1 }
 0x41f   : > { %v2384_v44 = vpop.f32.mrf.mxu0 }
 0x420   : > { %v2182_v54 = vpop.f32.mrf.mxu1 }
 0x421   : > { %v2841_v35 = vpop.f32.mrf.mxu0  ;;  %v7765_v5 = vadd.f32 %v2379_v34, %v2182_v54 }
 0x422   : > { %v2184_v14 = vpop.f32.mrf.mxu1  ;;  %v7783_v25 = vrot.slane %v2841_v35, %v6784_v27 }
 0x423   : > { %v5615_v62 = vpop.f32.mrf.mxu0 }
 0x424   : > { %v2185_v4 = vpop.f32.mrf.mxu1 }
 0x425   : > { %v7767_v58 = vadd.f32 %v2382_v40, %v2185_v4 }
 0x426   : > { %v2187_v56 = vpop.f32.mrf.mxu1 }
 0x428   : > { %v2657_v37 = vpop.f32.mrf.mxu1 }
 0x429   : > { %v2736_v3 = vadd.f32 %v2657_v37, %v2308_v42  ;;  %v9127_v37 = vld [vmem:[#allocation18_spill] sm:$0xff] }
 0x42a   : > { %v2659_v17 = vpop.f32.mrf.mxu1  ;;  %vm9128_vm2 = vcmp.eq.s32.totalorder %v9127_v37, 1 }
 0x42b   : > { %v2852_v1 = vadd.f32 %v7776_v52, %v2736_v3 }
 0x42c   : > { %v2660_v48 = vpop.f32.mrf.mxu1 }
 0x42d   : > { %v2737_v59 = vadd.f32 %v2660_v48, %v2311_v32  ;;  %v2876_v44 = vadd.f32 %v7783_v25, %v2852_v1 }
 0x42e   : > { %v2662_v38 = vpop.f32.mrf.mxu1 }
 0x42f   : > { %v2853_v34 = vadd.f32 %v7776_v52, %v2737_v59  ;;  %v7801_v17 = vsel %vm9128_vm2, %v2876_v44, 0.0  ;;  %v9129_v38 = vld [vmem:[#allocation16_spill] sm:$0xff]  ;;  %vm9144_vm2 = vmmov %vm9134_vm0 }
 0x430   : > { %v2665_v19 = vpop.f32.mrf.mxu1  ;;  %vm9130_vm9 = vcmp.eq.s32.totalorder %v9129_v38, 1  ;;  %v2947_v32 = vsel %vm9132_vm11, %v7801_v17, 0.0  ;;  %vm9147_vm11 = vmmov %vm9134_vm0 }
 0x431   : > { %v2738_v43 = vadd.f32 %v2665_v19, %v7715_v45  ;;  %v2877_v10 = vadd.f32 %v7783_v25, %v2853_v34 }
 0x432   : > { %v2667_v22 = vpop.f32.mrf.mxu1 }
 0x433   : > { %v2854_v16 = vadd.f32 %v7776_v52, %v2738_v43  ;;  %v7794_v35 = vsel %vm1445_vm15, %v2877_v10, 0.0 }
 0x434   : > { %v2668_v23 = vpop.f32.mrf.mxu1 }
 0x435   : > { %v2739_v20 = vadd.f32 %v2668_v23, %v7717_v39  ;;  %v2878_v39 = vadd.f32 %v7783_v25, %v2854_v16 }
 0x436   : > { %v2670_v29 = vpop.f32.mrf.mxu1 }
 0x437   : > { %v2855_v45 = vadd.f32 %v7776_v52, %v2739_v20  ;;  %v7808_v19 = vsel %vm9130_vm9, %v2878_v39, 0.0  ;;  %v9136_v20 = vld [vmem:[#allocation17_spill] sm:$0xff]  ;;  %vm9146_vm9 = vmmov %vm9134_vm0 }
 0x438   : > { %v2673_v24 = vpop.f32.mrf.mxu1  ;;  %v2994_v42 = vmul.f32 %v7808_v19, %v7808_v19  ;;  %vm9137_vm3 = vcmp.eq.s32.totalorder %v9136_v20, 1 }
 0x439   : > { %v2740_v40 = vadd.f32 %v2673_v24, %v7719_v30  ;;  %v2879_v30 = vadd.f32 %v7783_v25, %v2855_v45 }
 0x43a   : > { %v2675_v18 = vpop.f32.mrf.mxu1 }
 0x43b   : > { %v2856_v62 = vadd.f32 %v7776_v52, %v2740_v40  ;;  %v2992_v18 = vmul.f32 %v7801_v17, %v7801_v17 }
 0x43c   : > { %v2676_v51 = vpop.f32.mrf.mxu1 }
 0x43d   : > { %v2741_v54 = vadd.f32 %v2676_v51, %v7721_v33  ;;  %v2993_v33 = vmul.f32 %v7794_v35, %v7794_v35  ;;  %v7818_v51 = vsel %vm1447_vm5, %v2879_v30, 0.0  ;;  %v3012_v10 = vsel %vm9138_vm6, %v2992_v18, 0.0 }
 0x43e   : > { %v2678_v47 = vpop.f32.mrf.mxu1  ;;  %v2995_v34 = vmul.f32 %v7818_v51, %v7818_v51  ;;  %v2952_v44 = vsel %vm9140_vm14, %v7818_v51, 0.0  ;;  %vm9155_vm14 = vmmov %vm9134_vm0 }
 0x43f   : > { %v2857_v22 = vadd.f32 %v7776_v52, %v2741_v54 }
 0x440   : > { %v2681_v7 = vpop.f32.mrf.mxu1 }
 0x441   : > { %v2742_v4 = vadd.f32 %v2681_v7, %v7723_v41  ;;  %v2880_v41 = vadd.f32 %v7783_v25, %v2856_v62  ;;  %v2948_v7 = vsel %vm9133_vm8, %v7794_v35, 0.0  ;;  %v2881_v3 = vadd.f32 %v7783_v25, %v2857_v22 }
 0x442   : > { %v2683_v55 = vpop.f32.mrf.mxu1 }
 0x443   : > { %v2858_v29 = vadd.f32 %v7776_v52, %v2742_v4  ;;  %v2950_v55 = vsel %vm9135_vm1, %v7808_v19, 0.0  ;;  %v7850_v4 = vsel %vm1449_vm7, %v2881_v3, 0.0  ;;  %vm9150_vm1 = vmmov %vm9134_vm0 }
 0x444   : > { %v2684_v57 = vpop.f32.mrf.mxu1 }
 0x445   : > { %v2743_v48 = vadd.f32 %v2684_v57, %v7725_v46  ;;  %v2882_v1 = vadd.f32 %v7783_v25, %v2858_v29 }
 0x446   : > { %v2686_v28 = vpop.f32.mrf.mxu1 }
 0x447   : > { %v2859_v59 = vadd.f32 %v7776_v52, %v2743_v48  ;;  %v7836_v28 = vsel %vm9137_vm3, %v2880_v41, 0.0  ;;  %vm9151_vm3 = vmmov %vm9134_vm0 }
 0x448   : > { %v2689_v53 = vpop.f32.mrf.mxu1 }
 0x449   : > { %v2744_v24 = vadd.f32 %v2689_v53, %v7727_v36  ;;  %v3013_v36 = vsel %vm9134_vm0, %v2993_v33, 0.0  ;;  %v2949_v53 = vadd.f32 %v2948_v7, %v2947_v32  ;;  %v2883_v39 = vadd.f32 %v7783_v25, %v2859_v59 }
 0x44a   : > { %v2691_v9 = vpop.f32.mrf.mxu1  ;;  %v7856_v33 = vsel %vm1450_vm4, %v2882_v1, 0.0  ;;  %v2997_v32 = vmul.f32 %v7850_v4, %v7850_v4 }
 0x44b   : > { %v2860_v16 = vadd.f32 %v7776_v52, %v2744_v24  ;;  %v3014_v9 = vadd.f32 %v3013_v36, %v3012_v10  ;;  %v2951_v54 = vadd.f32 %v2950_v55, %v2949_v53  ;;  %v2998_v55 = vmul.f32 %v7856_v33, %v7856_v33 }
 0x44c   : > { %v2692_v14 = vpop.f32.mrf.mxu1 }
 0x44d   : > { %v2745_v43 = vadd.f32 %v2692_v14, %v7729_v15  ;;  %v3015_v15 = vsel %vm9139_vm12, %v2994_v42, 0.0  ;;  %v2996_v14 = vmul.f32 %v7836_v28, %v7836_v28  ;;  %v2884_v22 = vadd.f32 %v7783_v25, %v2860_v16  ;;  %vm9154_vm12 = vmmov %vm9134_vm0 }
 0x44e   : > { %v2694_v56 = vpop.f32.mrf.mxu1  ;;  %v3016_v41 = vadd.f32 %v3015_v15, %v3014_v9  ;;  %v2953_v29 = vadd.f32 %v2952_v44, %v2951_v54  ;;  %v7867_v42 = vsel %vm1451_vm13, %v2883_v39, 0.0  ;;  %v3021_v15 = vsel %vm9134_vm0, %v2997_v32, 0.0  ;;  %v9156_v32 = vld [vmem:[#allocation23_spill] sm:$0xff] }
 0x44f   : > { %v2861_v30 = vadd.f32 %v7776_v52, %v2745_v43  ;;  %v3017_v56 = vsel %vm9142_vm10, %v2995_v34, 0.0  ;;  %v9148_v34 = vld [vmem:[#allocation21_spill] sm:$0xff]  ;;  %v2999_v10 = vmul.f32 %v7867_v42, %v7867_v42  ;;  %v2958_v44 = vsel %vm9150_vm1, %v7856_v33, 0.0 }
 0x450   : > { %v2697_v23 = vpop.f32.mrf.mxu1  ;;  %v3018_v36 = vadd.f32 %v3017_v56, %v3016_v41  ;;  %vm9149_vm8 = vcmp.eq.s32.totalorder %v9148_v34, 1  ;;  %vm9157_vm10 = vcmp.eq.s32.totalorder %v9156_v32, 1 }
 0x451   : > { %v2746_v40 = vadd.f32 %v2697_v23, %v7731_v26  ;;  %v2885_v3 = vadd.f32 %v7783_v25, %v2861_v30  ;;  %v7878_v1 = vsel %vm9149_vm8, %v2884_v22, 0.0  ;;  %v9152_v30 = vld [vmem:[#allocation26_spill] sm:$0xff]  ;;  %v2960_v22 = vsel %vm9154_vm12, %v7867_v42, 0.0 }
 0x452   : > { %v2699_v47 = vpop.f32.mrf.mxu1  ;;  %vm9153_vm6 = vcmp.eq.s32.totalorder %v9152_v30, 1 }
 0x453   : > { %v2862_v24 = vadd.f32 %v7776_v52, %v2746_v40  ;;  %v2954_v47 = vsel %vm9144_vm2, %v7836_v28, 0.0  ;;  %vm9158_vm2 = vmmov %vm9134_vm0 }
 0x454   : > { %v2700_v57 = vpop.f32.mrf.mxu1  ;;  %v2955_v53 = vadd.f32 %v2954_v47, %v2953_v29  ;;  %v3025_v47 = vsel %vm9155_vm14, %v2999_v10, 0.0  ;;  %vm9169_vm14 = vmmov %vm9134_vm0 }
 0x455   : > { %v2747_v23 = vadd.f32 %v2700_v57, %v7735_v0  ;;  %v3019_v0 = vsel %vm9146_vm9, %v2996_v14, 0.0  ;;  %v2956_v57 = vsel %vm9147_vm11, %v7850_v4, 0.0  ;;  %v2886_v40 = vadd.f32 %v7783_v25, %v2862_v24  ;;  %vm9159_vm9 = vmmov %vm9134_vm0 }
 0x456   : > { %v2702_v45 = vpop.f32.mrf.mxu1  ;;  %v3020_v9 = vadd.f32 %v3019_v0, %v3018_v36  ;;  %v2957_v54 = vadd.f32 %v2956_v57, %v2955_v53  ;;  %v3023_v14 = vsel %vm9151_vm3, %v2998_v55, 0.0  ;;  %v2962_v0 = vsel %vm9158_vm2, %v7878_v1, 0.0  ;;  %vm9160_vm11 = vmmov %vm9134_vm0 }
 0x457   : > { %v2863_v16 = vadd.f32 %v7776_v52, %v2747_v23  ;;  %vm9165_vm3 = vmmov %vm9134_vm0 }
 0x458   : > { %v2705_v26 = vpop.f32.mrf.mxu1  ;;  %v3022_v24 = vadd.f32 %v3021_v15, %v3020_v9  ;;  %vm9172_vm2 = vmmov %vm9134_vm0 }
 0x459   : > { %v2748_v59 = vadd.f32 %v2705_v26, %v7747_v21  ;;  %v7894_v26 = vsel %vm9153_vm6, %v2885_v3, 0.0  ;;  %v2887_v23 = vadd.f32 %v7783_v25, %v2863_v16  ;;  %vm9166_vm6 = vmmov %vm9134_vm0 }
 0x45a   : > { %v2707_v18 = vpop.f32.mrf.mxu1  ;;  %v3001_v55 = vmul.f32 %v7894_v26, %v7894_v26 }
 0x45b   : > { %v2864_v39 = vadd.f32 %v7776_v52, %v2748_v59  ;;  %v2959_v18 = vadd.f32 %v2958_v44, %v2957_v54  ;;  %v7904_v59 = vsel %vm9157_vm10, %v2886_v40, 0.0  ;;  %v9161_v40 = vld [vmem:[#allocation28_spill] sm:$0xff] }
 0x45c   : > { %v2708_v43 = vpop.f32.mrf.mxu1  ;;  %v3002_v10 = vmul.f32 %v7904_v59, %v7904_v59  ;;  %vm9162_vm8 = vcmp.eq.s32.totalorder %v9161_v40, 1 }
 0x45d   : > { %v2749_v21 = vadd.f32 %v2708_v43, %v7753_v49  ;;  %v3000_v49 = vmul.f32 %v7878_v1, %v7878_v1  ;;  %v2888_v3 = vadd.f32 %v7783_v25, %v2864_v39  ;;  %v2961_v57 = vadd.f32 %v2960_v22, %v2959_v18 }
 0x45e   : > { %v2710_v45 = vpop.f32.mrf.mxu1 }
 0x45f   : > { %v2865_v41 = vadd.f32 %v7776_v52, %v2749_v21  ;;  %v3027_v16 = vsel %vm9159_vm9, %v3000_v49, 0.0  ;;  %v2964_v21 = vsel %vm9160_vm11, %v7894_v26, 0.0  ;;  %v7919_v45 = vsel %vm9162_vm8, %v2887_v23, 0.0  ;;  %v9163_v49 = vld [vmem:[#allocation25_spill] sm:$0xff]  ;;  %vm9173_vm9 = vmmov %vm9134_vm0 }
 0x460   : > { %v2713_v56 = vpop.f32.mrf.mxu1  ;;  %v2963_v39 = vadd.f32 %v2962_v0, %v2961_v57  ;;  %vm9164_vm1 = vcmp.eq.s32.totalorder %v9163_v49, 1  ;;  %vm9176_vm8 = vmmov %vm9134_vm0 }
 0x461   : > { %v2750_v29 = vadd.f32 %v2713_v56, %v7757_v31  ;;  %v3024_v31 = vadd.f32 %v3023_v14, %v3022_v24  ;;  %v2889_v9 = vadd.f32 %v7783_v25, %v2865_v41  ;;  %v3029_v14 = vsel %vm9134_vm0, %v3001_v55, 0.0 }
 0x462   : > { %v2715_v36 = vpop.f32.mrf.mxu1  ;;  %v7926_v56 = vsel %vm9164_vm1, %v2888_v3, 0.0  ;;  %v2965_v23 = vadd.f32 %v2964_v21, %v2963_v39  ;;  %v2966_v41 = vsel %vm9165_vm3, %v7904_v59, 0.0  ;;  %vm9177_vm1 = vcmp.eq.s32.totalorder %v7378_v2, 1  ;;  %vm9178_vm3 = vmmov %vm9134_vm0  ;;  %v9182_v2 = vld [vmem:[#allocation31_spill] sm:$0xff] }
 0x463   : > { %v2866_v43 = vadd.f32 %v7776_v52, %v2750_v29  ;;  %v3026_v44 = vadd.f32 %v3025_v47, %v3024_v31  ;;  %v3031_v47 = vsel %vm9166_vm6, %v3002_v10, 0.0  ;;  %v9167_v36 = vld [vmem:[#allocation29_spill] sm:$0xff]  ;;  %v2968_v31 = vsel %vm9169_vm14, %v7919_v45, 0.0  ;;  %vm9179_vm6 = vmmov %vm9134_vm0 }
 0x464   : > { %v2716_v53 = vpop.f32.mrf.mxu1  ;;  %vm9168_vm12 = vcmp.eq.s32.totalorder %v9167_v36, 1  ;;  %v3004_v57 = vmul.f32 %v7926_v56, %v7926_v56  ;;  %v2967_v21 = vadd.f32 %v2966_v41, %v2965_v23  ;;  %vm9181_vm14 = vmmov %vm9134_vm0 }
 0x465   : > { %v2751_v15 = vadd.f32 %v2716_v53, %v7759_v61  ;;  %v2890_v22 = vadd.f32 %v7783_v25, %v2866_v43  ;;  %v3028_v24 = vadd.f32 %v3027_v16, %v3026_v44  ;;  %v3003_v61 = vmul.f32 %v7919_v45, %v7919_v45  ;;  %v9170_v53 = vld [vmem:[#allocation32_spill] sm:$0xff] }
 0x466   : > { %v2718_v54 = vpop.f32.mrf.mxu1  ;;  %v7937_v0 = vsel %vm9168_vm12, %v2889_v9, 0.0  ;;  %vm9171_vm10 = vcmp.eq.s32.totalorder %v9170_v53, 1  ;;  %v3035_v41 = vsel %vm9176_vm8, %v3004_v57, 0.0  ;;  %vm9180_vm12 = vmmov %vm9134_vm0 }
 0x467   : > { %v2867_v29 = vadd.f32 %v7776_v52, %v2751_v15  ;;  %v3030_v43 = vadd.f32 %v3029_v14, %v3028_v24  ;;  %v7947_v10 = vsel %vm9171_vm10, %v2890_v22, 0.0  ;;  %v3033_v44 = vsel %vm9172_vm2, %v3003_v61, 0.0  ;;  %vm9184_vm2 = vmmov %vm9134_vm0 }
 0x468   : > { %v2721_v18 = vpop.f32.mrf.mxu1  ;;  %v3005_v39 = vmul.f32 %v7937_v0, %v7937_v0  ;;  %v2969_v14 = vadd.f32 %v2968_v31, %v2967_v21  ;;  %v2972_v61 = vsel %vm9134_vm0, %v7937_v0, 0.0  ;;  %vm9183_vm10 = vcmp.eq.s32.totalorder %v9182_v2, 1  ;;  %vm9187_vm8 = vmmov %vm9134_vm0 }
 0x469   : > { %v2891_v55 = vadd.f32 %v7783_v25, %v2867_v29  ;;  %v2752_v3 = vadd.f32 %v2721_v18, %v7761_v6  ;;  %v3032_v15 = vadd.f32 %v3031_v47, %v3030_v43  ;;  %v2970_v6 = vsel %vm9173_vm9, %v7926_v56, 0.0  ;;  %v9174_v29 = vld [vmem:[#allocation30_spill] sm:$0xff]  ;;  %vm9185_vm9 = vmmov %vm9134_vm0 }
 0x46a   : > { %v2723_v16 = vpop.f32.mrf.mxu1  ;;  %vm9175_vm11 = vcmp.eq.s32.totalorder %v9174_v29, 1  ;;  %v3006_v18 = vmul.f32 %v7947_v10, %v7947_v10  ;;  %v2971_v43 = vadd.f32 %v2970_v6, %v2969_v14 }
 0x46b   : > { %v2868_v9 = vadd.f32 %v7776_v52, %v2752_v3  ;;  %v7957_v24 = vsel %vm9175_vm11, %v2891_v55, 0.0  ;;  %v3034_v3 = vadd.f32 %v3033_v44, %v3032_v15  ;;  %v3037_v16 = vsel %vm9178_vm3, %v3005_v39, 0.0  ;;  %vm9186_vm11 = vmmov %vm9134_vm0 }
 0x46c   : > { %v2724_v54 = vpop.f32.mrf.mxu1  ;;  %v3007_v57 = vmul.f32 %v7957_v24, %v7957_v24  ;;  %v3039_v6 = vsel %vm9180_vm12, %v3006_v18, 0.0  ;;  %v2976_v14 = vsel %vm9181_vm14, %v7957_v24, 0.0 }
 0x46d   : > { %v2892_v22 = vadd.f32 %v7783_v25, %v2868_v9  ;;  %v2753_v23 = vadd.f32 %v2724_v54, %v7763_v63  ;;  %v2974_v63 = vsel %vm9179_vm6, %v7947_v10, 0.0  ;;  %v3036_v9 = vadd.f32 %v3035_v41, %v3034_v3 }
 0x46e   : > { %v2726_v47 = vpop.f32.mrf.mxu1  ;;  %v2973_v54 = vadd.f32 %v2972_v61, %v2971_v43  ;;  %v3041_v61 = vsel %vm9184_vm2, %v3007_v57, 0.0 }
 0x46f   : > { %v7968_v31 = vsel %vm9177_vm1, %v2892_v22, 0.0  ;;  %v2869_v55 = vadd.f32 %v7776_v52, %v2753_v23  ;;  %v3038_v23 = vadd.f32 %v3037_v16, %v3036_v9  ;;  %vm9190_vm1 = vmmov %vm9184_vm2  ;;  %vm9197_vm2 = vcmask 1040384  }
 0x470   : > { %v2729_v21 = vpop.f32.mrf.mxu1  ;;  %v3008_v39 = vmul.f32 %v7968_v31, %v7968_v31  ;;  %v2975_v47 = vadd.f32 %v2974_v63, %v2973_v54  ;;  %vm9191_vm3 = vmmov %vm9190_vm1 }
 0x471   : > { %v2893_v15 = vadd.f32 %v7783_v25, %v2869_v55  ;;  %v2754_v44 = vadd.f32 %v2729_v21, %v7765_v5  ;;  %v2978_v5 = vsel %vm9185_vm9, %v7968_v31, 0.0  ;;  %v3040_v43 = vadd.f32 %v3039_v6, %v3038_v23  ;;  %vm9192_vm6 = vmmov %vm9190_vm1 }
 0x472   : > { %v2731_v22 = vpop.f32.mrf.mxu1  ;;  %v2977_v55 = vadd.f32 %v2976_v14, %v2975_v47  ;;  %v3043_v21 = vsel %vm9186_vm11, %v3008_v39, 0.0  ;;  %vm9195_vm14 = vmmov %vm9190_vm1  ;;  %vm9199_vm11 = vmmov 0  }
 0x473   : > { %v7985_v36 = vsel %vm9183_vm10, %v2893_v15, 0.0  ;;  %v2870_v41 = vadd.f32 %v7776_v52, %v2754_v44  ;;  %v3042_v57 = vadd.f32 %v3041_v61, %v3040_v43  ;;  %v9188_v44 = vld [vmem:[#allocation33_spill] sm:$0xff]  ;;  %vm9196_vm10 = vmmov %vm9190_vm1 }
 0x474   : > { %v3009_v18 = vmul.f32 %v7985_v36, %v7985_v36  ;;  %v2732_v3 = vpop.f32.mrf.mxu1  ;;  %v2980_v9 = vsel %vm9187_vm8, %v7985_v36, 0.0  ;;  %v2979_v15 = vadd.f32 %v2978_v5, %v2977_v55  ;;  %vm9189_vm0 = vcmp.eq.s32.totalorder %v9188_v44, 1  ;;  %vm9198_vm9 = vmmov %vm9190_vm1 }
 0x475   : > { %v2894_v16 = vadd.f32 %v7783_v25, %v2870_v41  ;;  %v2755_v63 = vadd.f32 %v2732_v3, %v7767_v58  ;;  %v3044_v39 = vadd.f32 %v3043_v21, %v3042_v57  ;;  %v9193_v3 = vld [vmem:[#allocation27_spill] sm:$0xff] }
 0x476   : > { %v2734_v54 = vpop.f32.mrf.mxu1  ;;  %v3045_v6 = vsel %vm9190_vm1, %v3009_v18, 0.0  ;;  %v2981_v23 = vadd.f32 %v2980_v9, %v2979_v15  ;;  %vm9194_vm12 = vcmp.eq.s32.totalorder %v9193_v3, 1 }
 0x477   : > { %v8000_v22 = vsel %vm9189_vm0, %v2894_v16, 0.0  ;;  %v2871_v2 = vadd.f32 %v7776_v52, %v2755_v63  ;;  %v3046_v61 = vadd.f32 %v3045_v6, %v3044_v39 }
 0x478   : > { %v2982_v14 = vsel %vm9191_vm3, %v8000_v22, 0.0  ;;  %v3010_v58 = vmul.f32 %v8000_v22, %v8000_v22  ;;  %vm9201_vm3 = vmmov %vm9197_vm2 }
 0x479   : > { %v2895_v47 = vadd.f32 %v7783_v25, %v2871_v2  ;;  %v2983_v5 = vadd.f32 %v2982_v14, %v2981_v23 }
 0x47a   : > { %v3047_v41 = vsel %vm9192_vm6, %v3010_v58, 0.0  ;;  %vm9202_vm6 = vcmask 64512  }
 0x47b   : > { %v8012_v43 = vsel %vm9194_vm12, %v2895_v47, 0.0  ;;  %v3048_v55 = vadd.f32 %v3047_v41, %v3046_v61  ;;  %v2940_v41 = vmul.u32 4, %v6362_v12  ;;  %v9200_v61 = vld [vmem:[#allocation14_spill] sm:$0xff]  ;;  %vm3753_vm12 = vcmask 781312  }
 0x47c   : > { %v2984_v52 = vsel %vm9195_vm14, %v8012_v43, 0.0  ;;  %v3011_v18 = vmul.f32 %v8012_v43, %v8012_v43  ;;  %3754 = vst.msk [vmem:[#allocation3] sm:$0xf] %vm3753_vm12, %v9074_v50  ;;  %3755 = vst.msk [vmem:[#allocation3 + $0x4] sm:$0xf] %vm3753_vm12, %v9074_v50  ;;  %vm9204_vm14 = vcmp.eq.s32.totalorder %v9129_v38, 1 }
 0x47d   : > { %v2985_v16 = vadd.f32 %v2984_v52, %v2983_v5  ;;  %v2942_v5 = vmul.u32 4, %v9200_v61  ;;  %vm2941_vm8 = vcmp.ge.s32.totalorder %v6360_v11, %v2940_v41  ;;  %3756 = vst.msk [vmem:[#allocation3 + $0x58] sm:$0xf] %vm3753_vm12, %v9074_v50  ;;  %3757 = vst.msk [vmem:[#allocation3 + $0x5c] sm:$0xf] %vm3753_vm12, %v9074_v50 }
 0x47e   : > { %v3049_v63 = vsel %vm9196_vm10, %v3011_v18, 0.0  ;;  %vm9205_vm10 = vcmp.eq.s32.totalorder %v9127_v37, 1  ;;  %v8783_v37 = vld [vmem:[%s8961_s14] ss:$0 sm:$0xff] }
 0x47f   : > { %v2986_v21 = vrot.slane %v2985_v16, 4  ;;  %v3050_v2 = vadd.f32 %v3049_v63, %v3048_v55  ;;  %vm2943_vm0 = vcmp.lt.s32.totalorder %v6360_v11, %v2942_v5  ;;  %v6022_v11 = vld [vmem:[%s8958_s11 + $0x28] sm:$0xff]  }
 0x480   : > { %vm2944_vm1 = vmand %vm2941_vm8, %vm2943_vm0  ;;  %5664 = vmatprep.subr.bf16.mxu1 %v6022_v11 }
 0x481   : > { %v2987_v25 = vadd.f32 %v2986_v21, %v2985_v16  ;;  %v3051_v9 = vrot.slane %v3050_v2, 4  ;;  %5665 = vmatpush3.bf16.msra.mxu1 %v6022_v11 }
 0x483   : > { %v2988_v54 = vrot.slane %v2987_v25, 2  ;;  %v3052_v57 = vadd.f32 %v3051_v9, %v3050_v2  ;;  %v6027_v9 = vld [vmem:[%s8958_s11 + $0x50] sm:$0xff]  }
 0x485   : > { %v2989_v15 = vadd.f32 %v2988_v54, %v2987_v25  ;;  %v3053_v6 = vrot.slane %v3052_v57, 2  ;;  %v6025_v25 = vld [vmem:[%s8958_s11 + $0x58] sm:$0xff]  }
 0x486   : > { %v6024_v54 = vld [vmem:[%s8958_s11 + $0x18] sm:$0xff]  }
 0x487   : > { %v2990_v14 = vrot.slane %v2989_v15, 1  ;;  %v3054_v58 = vadd.f32 %v3053_v6, %v3052_v57  ;;  %v6026_v57 = vld [vmem:[%s8958_s11 + $0x10] sm:$0xff]  }
 0x489   : > { %v3055_v39 = vrot.slane %v3054_v58, 1  ;;  %v2991_v23 = vadd.f32 %v2990_v14, %v2989_v15  ;;  %v9203_v14 = vsub.s32 1, %v6362_v12 }
 0x48b   : > { %v3056_v47 = vadd.f32 %v3055_v39, %v3054_v58 }
 0x48d   : > { %v3057_v3 = vsel %vm9197_vm2, %v2991_v23, %v3056_v47  ;;  %vm9206_vm2 = vcmp.lt.s32.totalorder %v6362_v12, 7 }
 0x48e   : > { %5625 = vmatmul.mubr.msk.f32.vlgmr.msra.gmra.mxu0 %vm9198_vm9, %v3057_v3  ;;  %vm9207_vm9 = vcmp.eq.s32.totalorder %v9136_v20, 1  ;;  %vm9209_vm8 = vmmov %vm9206_vm2 }
 0x48f   : > { %5629 = vmatprep.mubr.msk.f32.mxu0 %vm9199_vm11, %v9075_v8  ;;  %5628 = vmatpush3.msk.msra.mxu0 %vm2944_vm1, %v9126_v13  ;;  %v6023_v13 = vld [vmem:[%s8958_s11 + $0x20] sm:$0xff]   ;;  %vm9208_vm11 = vmmov %vm9206_vm2  ;;  %vm9211_vm1 = vcmp.eq.s32.totalorder %v9148_v34, 1 }
 0x490   : > { %5632 = vmatprep.subr.bf16.mxu0 %v6025_v25  ;;  %5666 = vmatprep.subr.bf16.mxu1 %v6023_v13  ;;  %vm9210_vm0 = vmmov %vm9206_vm2 }
 0x491   : > { %5667 = vmatpush3.bf16.msra.mxu1 %v6023_v13 }
 0x492   : > { %5668 = vmatprep.subr.bf16.mxu1 %v6024_v54 }
 0x495   : > { %5669 = vmatpush3.bf16.msra.mxu1 %v6024_v54 }
 0x496   : > { %5670 = vmatprep.subr.bf16.mxu1 %v6026_v57 }
 0x499   : > { %5671 = vmatpush3.bf16.msra.mxu1 %v6026_v57 }
 0x54e   : > { %v3127_v52 = vpop.f32.mrf.mxu0 }
 0x54f   : > { %v3131_v18 = vmul.f32 0.00390625, %v3127_v52 }
 0x550   : > { %v5626_v55 = vpop.f32.mrf.mxu0 }
 0x551   : > { %v3132_v16 = vmul.f32 %v3131_v18, %v3131_v18 }
 0x553   : > { %v3134_v63 = vrot.slane %v3132_v16, 7 }
 0x555   : > { %v3136_v3 = vsub.f32 %v3131_v18, %v3134_v63 }
 0x557   : > { %v3137_v21 = vadd.f32 1e-06, %v3136_v3 }
 0x559   : > { %6151 = vrsqrt.f32 %v3137_v21 }
 0x566   : > { %v6152_v8 = vpop.eup %6151 }
 0x567   : > { %v3139_v2 = vsel %vm9201_vm3, %v3131_v18, %v6152_v8  ;;  %vm9212_vm3 = vcmp.eq.s32.totalorder %v9156_v32, 1 }
 0x568   : > { %5630 = vmatmul.mubr.msk.f32.vlgmr.msra.gmra.mxu0 %vm9202_vm6, %v3139_v2  ;;  %vm9213_vm6 = vmmov %vm9210_vm0 }
 0x569   : > { %5633 = vmatpush3.bf16.msra.mxu0 %v6025_v25 }
 0x56a   : > { %5634 = vmatprep.subr.bf16.mxu0 %v6027_v9 }
 0x56d   : > { %5635 = vmatpush3.bf16.msra.mxu0 %v6027_v9 }
 0x628   : > { %v3209_v15 = vpop.f32.mrf.mxu0 }
 0x629   : > { %v8049_v6 = vrot.slane %v3209_v15, %v6784_v27  ;;  %v8053_v58 = vrot.slane %v3209_v15, %v9203_v14  ;;  %v8066_v27 = vld [vmem:[%s8956_s9] ss:$0 sm:$0xff] }
 0x62a   : > { %v5631_v39 = vpop.f32.mrf.mxu0 }
 0x62b   : > { %v3219_v23 = vsub.f32 %v7808_v19, %v8049_v6  ;;  %v3220_v47 = vsub.f32 %v7818_v51, %v8049_v6  ;;  %v3217_v41 = vsub.f32 %v7801_v17, %v8049_v6  ;;  %v3218_v61 = vsub.f32 %v7794_v35, %v8049_v6 }
 0x62c   : > { %v3221_v5 = vsub.f32 %v7836_v28, %v8049_v6  ;;  %v3223_v19 = vsub.f32 %v7856_v33, %v8049_v6  ;;  %v3224_v51 = vsub.f32 %v7867_v42, %v8049_v6  ;;  %v3222_v17 = vsub.f32 %v7850_v4, %v8049_v6  ;;  %v8083_v28 = vld [vmem:[%s8957_s10] ss:$0 sm:$0xff] }
 0x62d   : > { %v3243_v52 = vmul.f32 %v8053_v58, %v3219_v23  ;;  %v3244_v35 = vmul.f32 %v8053_v58, %v3220_v47  ;;  %v3241_v18 = vmul.f32 %v8053_v58, %v3217_v41  ;;  %v3242_v55 = vmul.f32 %v8053_v58, %v3218_v61 }
 0x62e   : > { %v3245_v33 = vmul.f32 %v8053_v58, %v3221_v5  ;;  %v3247_v42 = vmul.f32 %v8053_v58, %v3223_v19  ;;  %v3248_v16 = vmul.f32 %v8053_v58, %v3224_v51  ;;  %v3246_v4 = vmul.f32 %v8053_v58, %v3222_v17 }
 0x62f   : > { %v3269_v63 = vmul.f32 %v8066_v27, %v3243_v52  ;;  %v3270_v3 = vmul.f32 %v8066_v27, %v3244_v35  ;;  %v3267_v21 = vmul.f32 %v8066_v27, %v3241_v18  ;;  %v3268_v8 = vmul.f32 %v8066_v27, %v3242_v55 }
 0x630   : > { %v3271_v2 = vmul.f32 %v8066_v27, %v3245_v33  ;;  %v3273_v11 = vmul.f32 %v8066_v27, %v3247_v42  ;;  %v3274_v13 = vmul.f32 %v8066_v27, %v3248_v16  ;;  %v3272_v25 = vmul.f32 %v8066_v27, %v3246_v4 }
 0x631   : > { %v8098_v9 = vadd.f32 %v8083_v28, %v3269_v63  ;;  %v8101_v54 = vadd.f32 %v8083_v28, %v3270_v3  ;;  %v8104_v57 = vadd.f32 %v8083_v28, %v3267_v21  ;;  %v8107_v15 = vadd.f32 %v8083_v28, %v3268_v8 }
 0x632   : > { %v8110_v14 = vadd.f32 %v8083_v28, %v3271_v2  ;;  %v8113_v39 = vadd.f32 %v8083_v28, %v3273_v11  ;;  %v8116_v23 = vadd.f32 %v8083_v28, %v3274_v13  ;;  %v8119_v47 = vadd.f32 %v8083_v28, %v3272_v25 }
 0x633   : > { %v5255_v41 = vmul.f32 -1.442695, %v8098_v9  ;;  %v5256_v61 = vmul.f32 -1.442695, %v8101_v54  ;;  %v5253_v5 = vmul.f32 -1.442695, %v8104_v57  ;;  %v3225_v19 = vsub.f32 %v7878_v1, %v8049_v6 }
 0x634   : > { %v5254_v51 = vmul.f32 -1.442695, %v8107_v15  ;;  %v5257_v17 = vmul.f32 -1.442695, %v8110_v14  ;;  %v5259_v52 = vmul.f32 -1.442695, %v8113_v39  ;;  %v3227_v35 = vsub.f32 %v7904_v59, %v8049_v6 }
 0x635   : > { %6153 = vpow2.f32 %v5255_v41  ;;  %v5260_v18 = vmul.f32 -1.442695, %v8116_v23  ;;  %v5258_v55 = vmul.f32 -1.442695, %v8119_v47  ;;  %v3249_v33 = vmul.f32 %v8053_v58, %v3225_v19 }
 0x636   : > { %6155 = vpow2.f32 %v5256_v61  ;;  %v3228_v1 = vsub.f32 %v7919_v45, %v8049_v6  ;;  %v3251_v42 = vmul.f32 %v8053_v58, %v3227_v35  ;;  %v3226_v16 = vsub.f32 %v7894_v26, %v8049_v6 }
 0x637   : > { %6157 = vpow2.f32 %v5253_v5  ;;  %v3275_v4 = vmul.f32 %v8066_v27, %v3249_v33  ;;  %v3229_v59 = vsub.f32 %v7926_v56, %v8049_v6  ;;  %v3231_v63 = vsub.f32 %v7947_v10, %v8049_v6 }
 0x638   : > { %6159 = vpow2.f32 %v5254_v51  ;;  %v3252_v3 = vmul.f32 %v8053_v58, %v3228_v1  ;;  %v3277_v21 = vmul.f32 %v8066_v27, %v3251_v42  ;;  %v3250_v45 = vmul.f32 %v8053_v58, %v3226_v16 }
 0x639   : > { %6161 = vpow2.f32 %v5257_v17  ;;  %v8148_v8 = vadd.f32 %v8083_v28, %v3275_v4  ;;  %v3253_v26 = vmul.f32 %v8053_v58, %v3229_v59  ;;  %v3255_v25 = vmul.f32 %v8053_v58, %v3231_v63 }
 0x63a   : > { %6163 = vpow2.f32 %v5259_v52  ;;  %v3278_v2 = vmul.f32 %v8066_v27, %v3252_v3  ;;  %v8153_v56 = vadd.f32 %v8083_v28, %v3277_v21  ;;  %v3276_v10 = vmul.f32 %v8066_v27, %v3250_v45 }
 0x63b   : > { %6165 = vpow2.f32 %v5260_v18  ;;  %v5261_v11 = vmul.f32 -1.442695, %v8148_v8  ;;  %v3279_v13 = vmul.f32 %v8066_v27, %v3253_v26  ;;  %v3281_v51 = vmul.f32 %v8066_v27, %v3255_v25 }
 0x63c   : > { %6167 = vpow2.f32 %v5258_v55  ;;  %v8160_v41 = vadd.f32 %v8083_v28, %v3278_v2  ;;  %v5263_v61 = vmul.f32 -1.442695, %v8153_v56  ;;  %v8164_v5 = vadd.f32 %v8083_v28, %v3276_v10 }
 0x63d   : > { %6169 = vpow2.f32 %v5261_v11  ;;  %v8167_v19 = vadd.f32 %v8083_v28, %v3279_v13  ;;  %v3232_v18 = vsub.f32 %v7957_v24, %v8049_v6  ;;  %v8176_v55 = vadd.f32 %v8083_v28, %v3281_v51 }
 0x63e   : > { %6171 = vpow2.f32 %v5263_v61  ;;  %v5264_v17 = vmul.f32 -1.442695, %v8160_v41  ;;  %v5262_v52 = vmul.f32 -1.442695, %v8164_v5  ;;  %v3230_v42 = vsub.f32 %v7937_v0, %v8049_v6 }
 0x63f   : > { %v5265_v35 = vmul.f32 -1.442695, %v8167_v19  ;;  %v5267_v33 = vmul.f32 -1.442695, %v8176_v55  ;;  %v3256_v59 = vmul.f32 %v8053_v58, %v3232_v18  ;;  %v3233_v63 = vsub.f32 %v7968_v31, %v8049_v6 }
 0x640   : > { %6173 = vpow2.f32 %v5264_v17  ;;  %v3235_v26 = vsub.f32 %v8000_v22, %v8049_v6  ;;  %v3236_v2 = vsub.f32 %v8012_v43, %v8049_v6  ;;  %v3254_v11 = vmul.f32 %v8053_v58, %v3230_v42 }
 0x641   : > { %6175 = vpow2.f32 %v5262_v52  ;;  %v3282_v25 = vmul.f32 %v8066_v27, %v3256_v59  ;;  %v3257_v61 = vmul.f32 %v8053_v58, %v3233_v63 }
 0x642   : > { %v6154_v1 = vpop.eup %6153  ;;  %6177 = vpow2.f32 %v5265_v35  ;;  %v3259_v43 = vmul.f32 %v8053_v58, %v3235_v26  ;;  %v3260_v35 = vmul.f32 %v8053_v58, %v3236_v2 }
 0x643   : > { %v6156_v16 = vpop.eup %6155  ;;  %v3375_v4 = vadd.f32 1.0, %v6154_v1  ;;  %6179 = vpow2.f32 %v5267_v33  ;;  %v3280_v1 = vmul.f32 %v8066_v27, %v3254_v11  ;;  %v3283_v59 = vmul.f32 %v8066_v27, %v3257_v61 }
 0x644   : > { %v6158_v24 = vpop.eup %6157  ;;  %v3376_v3 = vadd.f32 1.0, %v6156_v16 }
 0x645   : > { %v6160_v21 = vpop.eup %6159  ;;  %6181 = vrcp.f32 %v3375_v4  ;;  %v3373_v45 = vadd.f32 1.0, %v6158_v24  ;;  %v8195_v4 = vadd.f32 %v8083_v28, %v3282_v25  ;;  %v3234_v24 = vsub.f32 %v7985_v36, %v8049_v6  ;;  %v6028_v25 = vld [vmem:[%s8958_s11 + $0x48] sm:$0xff]  }
 0x646   : > { %v6162_v0 = vpop.eup %6161  ;;  %6183 = vrcp.f32 %v3376_v3  ;;  %v3374_v10 = vadd.f32 1.0, %v6160_v21  ;;  %v3285_v21 = vmul.f32 %v8066_v27, %v3259_v43  ;;  %5636 = vmatprep.subr.bf16.mxu0 %v6028_v25 }
 0x647   : > { %v6164_v13 = vpop.eup %6163  ;;  %6185 = vrcp.f32 %v3373_v45  ;;  %v3377_v31 = vadd.f32 1.0, %v6162_v0  ;;  %v3286_v45 = vmul.f32 %v8066_v27, %v3260_v35  ;;  %v8203_v0 = vadd.f32 %v8083_v28, %v3280_v1  ;;  %5637 = vmatpush3.bf16.msra.mxu0 %v6028_v25 }
 0x648   : > { %v6166_v51 = vpop.eup %6165  ;;  %6187 = vrcp.f32 %v3374_v10  ;;  %v3379_v17 = vadd.f32 1.0, %v6164_v13  ;;  %v5268_v13 = vmul.f32 -1.442695, %v8195_v4  ;;  %v3258_v6 = vmul.f32 %v8053_v58, %v3234_v24 }
 0x649   : > { %v6168_v52 = vpop.eup %6167  ;;  %6189 = vrcp.f32 %v3377_v31  ;;  %v3380_v22 = vadd.f32 1.0, %v6166_v51  ;;  %v8207_v31 = vadd.f32 %v8083_v28, %v3283_v59  ;;  %v8214_v51 = vadd.f32 %v8083_v28, %v3285_v21 }
 0x64a   : > { %v6170_v18 = vpop.eup %6169  ;;  %6191 = vrcp.f32 %v3379_v17  ;;  %v3378_v33 = vadd.f32 1.0, %v6168_v52  ;;  %v8217_v17 = vadd.f32 %v8083_v28, %v3286_v45  ;;  %v5266_v52 = vmul.f32 -1.442695, %v8203_v0 }
 0x64b   : > { %v6172_v42 = vpop.eup %6171  ;;  %6193 = vrcp.f32 %v3380_v22  ;;  %v3381_v16 = vadd.f32 1.0, %v6170_v18  ;;  %v5269_v35 = vmul.f32 -1.442695, %v8207_v31  ;;  %v3284_v1 = vmul.f32 %v8066_v27, %v3258_v6 }
 0x64c   : > { %6195 = vrcp.f32 %v3378_v33  ;;  %v3383_v63 = vadd.f32 1.0, %v6172_v42  ;;  %v8238_v59 = vmul.f32 -1.442695, %v8214_v51 }
 0x64d   : > { %v6174_v3 = vpop.eup %6173  ;;  %6197 = vrcp.f32 %v3381_v16 }
 0x64e   : > { %v6176_v26 = vpop.eup %6175  ;;  %v3384_v2 = vadd.f32 1.0, %v6174_v3  ;;  %6199 = vrcp.f32 %v3383_v63 }
 0x64f   : > { %v6178_v10 = vpop.eup %6177  ;;  %v3382_v11 = vadd.f32 1.0, %v6176_v26 }
 0x650   : > { %6201 = vrcp.f32 %v3384_v2  ;;  %v3385_v36 = vadd.f32 1.0, %v6178_v10  ;;  %v6180_v61 = vpop.eup %6179 }
 0x651   : > { %6203 = vrcp.f32 %v3382_v11  ;;  %v8263_v11 = vadd.f32 %v8083_v28, %v3284_v1  ;;  %v6030_v28 = vld [vmem:[%s8958_s11 + $0x8] sm:$0xff]  }
 0x652   : > { %v6182_v58 = vpop.eup %6181  ;;  %6205 = vrcp.f32 %v3385_v36  ;;  %5672 = vmatprep.subr.bf16.mxu1 %v6030_v28 }
 0x653   : > { %v6184_v22 = vpop.eup %6183  ;;  %v3435_v43 = vmul.f32 %v6182_v58, %v8098_v9  ;;  %6207 = vpow2.f32 %v5268_v13  ;;  %v8241_v9 = vmul.f32 -1.442695, %v8217_v17  ;;  %v6029_v13 = vld [vmem:[%s8958_s11 + $0x40] sm:$0xff]   ;;  %5673 = vmatpush3.bf16.msra.mxu1 %v6030_v28 }
 0x654   : > { %v6186_v18 = vpop.eup %6185  ;;  %v3436_v33 = vmul.f32 %v6184_v22, %v8101_v54  ;;  %6209 = vpow2.f32 %v5266_v52  ;;  %v3387_v52 = vadd.f32 1.0, %v6180_v61  ;;  %5638 = vmatprep.subr.bf16.mxu0 %v6029_v13 }
 0x655   : > { %v6188_v42 = vpop.eup %6187  ;;  %v8234_v50 = vsel %vm9204_vm14, %v3435_v43, 0.0  ;;  %v3433_v16 = vmul.f32 %v6186_v18, %v8104_v57  ;;  %6211 = vpow2.f32 %v5269_v35  ;;  %5639 = vmatpush3.bf16.msra.mxu0 %v6029_v13  ;;  %vm9214_vm14 = vmmov %vm9210_vm0 }
 0x656   : > { %v6190_v63 = vpop.eup %6189  ;;  %v8245_v54 = vsel %vm1447_vm5, %v3436_v33, 0.0  ;;  %v3515_v27 = vrot.slane %v8234_v50, 1  ;;  %v3434_v24 = vmul.f32 %v6188_v42, %v8107_v15  ;;  %6213 = vrcp.f32 %v3387_v52 }
 0x657   : > { %v6192_v3 = vpop.eup %6191  ;;  %v3516_v21 = vrot.slane %v8245_v54, 1  ;;  %v5836_v57 = vpack.i.bf16 %v8245_v54, %v8234_v50  ;;  %v8254_v45 = vsel %vm9205_vm10, %v3433_v16, 0.0  ;;  %v3437_v15 = vmul.f32 %v6190_v63, %v8110_v14  ;;  %v6031_v14 = vld [vmem:[%s8958_s11 + $0x38] sm:$0xff]  }
 0x658   : > { %v6194_v26 = vpop.eup %6193  ;;  %v8258_v2 = vsel %vm1445_vm15, %v3434_v24, 0.0  ;;  %v9041_v10 = vrot.slane %v8254_v45, 1  ;;  %v3439_v35 = vmul.f32 %v6192_v3, %v8113_v39  ;;  %5640 = vmatprep.subr.bf16.mxu0 %v6031_v14  ;;  %vm9215_vm10 = vcmp.eq.s32.totalorder %v9161_v40, 1 }
 0x659   : > { %v6196_v36 = vpop.eup %6195  ;;  %5837 = vrot.lane.b32.xlu0 %v5836_v57, %s6241_s24  ;;  %v3514_v6 = vrot.slane %v8258_v2, 1  ;;  %v5831_v25 = vpack.i.bf16 %v8258_v2, %v8254_v45  ;;  %v3549_v58 = vsel %vm9206_vm2, %v3515_v27, %v3516_v21  ;;  %v8282_v43 = vsel %vm9207_vm9, %v3437_v15, 0.0  ;;  %5641 = vmatpush3.bf16.msra.mxu0 %v6031_v14  ;;  %vm9216_vm2 = vmmov %vm9210_vm0 }
 0x65a   : > { %v6198_v22 = vpop.eup %6197  ;;  %v3440_v18 = vmul.f32 %v6194_v26, %v8116_v23  ;;  %v3438_v33 = vmul.f32 %v6196_v36, %v8119_v47  ;;  %v3517_v61 = vrot.slane %v8282_v43, 1  ;;  %v8298_v47 = vsel %vm1450_vm4, %v3439_v35, 0.0  ;;  %vm9217_vm9 = vmmov %vm9210_vm0 }
 0x65b   : > { %5832 = vrot.lane.b32.xlu1 %v5831_v25, %s6241_s24  ;;  %v3550_v1 = vsel %vm9208_vm11, %v3514_v6, %v3515_v27  ;;  %v3551_v42 = vsel %vm9209_vm8, %v9041_v10, %v3514_v6  ;;  %v3441_v16 = vmul.f32 %v6198_v22, %v8148_v8  ;;  %v6200_v39 = vpop.eup %6199  ;;  %v3475_v8 = vrot.slane %v8234_v50, 7 }
 0x65c   : > { %v5841_v23 = vpack.i.bf16 %v3550_v1, %v3551_v42  ;;  %v8302_v63 = vsel %vm1451_vm13, %v3440_v18, 0.0  ;;  %v8306_v27 = vsel %vm1449_vm7, %v3438_v33, 0.0  ;;  %v3548_v3 = vsel %vm9210_vm0, %v3516_v21, %v3517_v61  ;;  %v6032_v1 = vld [vmem:[%s8958_s11 + $0x30] sm:$0xff]   ;;  %v6033_v42 = vld [vmem:[%s8958_s11] sm:$0xff]  }
 0x65d   : > { %v6202_v24 = vpop.eup %6201  ;;  %v8312_v57 = vmul.f32 -1.442695, %v8263_v11  ;;  %v3476_v15 = vrot.slane %v8245_v54, 7  ;;  %v5851_v36 = vpack.i.bf16 %v3548_v3, %v3549_v58  ;;  %v3519_v6 = vrot.slane %v8298_v47, 1  ;;  %5642 = vmatprep.subr.bf16.mxu0 %v6032_v1  ;;  %5674 = vmatprep.subr.bf16.mxu1 %v6033_v42 }
 0x65e   : > { %v6204_v26 = vpop.eup %6203  ;;  %v3520_v22 = vrot.slane %v8302_v63, 1  ;;  %v3518_v21 = vrot.slane %v8306_v27, 1  ;;  %v8322_v52 = vsel %vm9211_vm1, %v3441_v16, 0.0  ;;  %v3443_v28 = vmul.f32 %v6200_v39, %v8153_v56  ;;  %5643 = vmatpush3.bf16.msra.mxu0 %v6032_v1  ;;  %5675 = vmatpush3.bf16.msra.mxu1 %v6033_v42  ;;  %vm9220_vm1 = vmmov %vm9210_vm0 }
 0x65f   : > { %v6206_v25 = vpop.eup %6205  ;;  %5842 = vrot.lane.b32.xlu1 %v5841_v23, %s6246_s23  ;;  %v3474_v35 = vrot.slane %v8258_v2, 7  ;;  %5852 = vrot.lane.b32.xlu0 %v5851_v36, %s6246_s23  ;;  %v3521_v58 = vrot.slane %v8322_v52, 1  ;;  %v3444_v18 = vmul.f32 %v6202_v24, %v8160_v41  ;;  %v3442_v33 = vmul.f32 %v6204_v26, %v8164_v5  ;;  %v8345_v5 = vld [vmem:[%s8958_s11 + $0x88] sm:$0xff]  }
 0x660   : > { %v6208_v56 = vpop.eup %6207  ;;  %v5846_v2 = vpack.i.bf16 %v8306_v27, %v8282_v43  ;;  %v3463_v16 = vsel %vm9212_vm3, %v3443_v28, 0.0  ;;  %v3445_v41 = vmul.f32 %v6206_v25, %v8167_v19  ;;  %v5856_v39 = vpack.i.bf16 %v8302_v63, %v8298_v47  ;;  %5696 = vmatprep.subr.bf16.mxu0 %v8345_v5  ;;  %vm9221_vm3 = vmmov %vm9210_vm0 }
 0x661   : > { %v3546_v23 = vsel %vm9213_vm6, %v3518_v21, %v3519_v6  ;;  %v3547_v24 = vsel %vm9214_vm14, %v3517_v61, %v3518_v21  ;;  %v8355_v3 = vsel %vm9215_vm10, %v3444_v18, 0.0  ;;  %v6210_v19 = vpop.eup %6209  ;;  %v3479_v26 = vrot.slane %v8298_v47, 7  ;;  %vm9222_vm6 = vmmov %vm9210_vm0 }
 0x662   : > { %v3544_v36 = vsel %vm9216_vm2, %v3520_v22, %v3521_v58  ;;  %v3545_v25 = vsel %vm9217_vm9, %v3519_v6, %v3520_v22  ;;  %v3524_v28 = vrot.slane %v8355_v3, 1  ;;  %v6212_v61 = vpop.eup %6211  ;;  %v3523_v21 = vrot.slane %v3463_v16, 1 }
 0x663   : > { %5847 = vrot.lane.b32.xlu1 %v5846_v2, %s6241_s24  ;;  %5857 = vrot.lane.b32.xlu0 %v5856_v39, %s6241_s24  ;;  %vm9218_vm11 = vcmp.eq.s32.totalorder %v9152_v30, 1  ;;  %vm9219_vm8 = vcmp.eq.s32.totalorder %v9163_v49, 1  ;;  %v3388_v2 = vadd.f32 1.0, %v6208_v56  ;;  %v3478_v10 = vrot.slane %v8306_v27, 7 }
 0x664   : > { %v3462_v18 = vsel %vm9218_vm11, %v3442_v33, 0.0  ;;  %v8369_v47 = vsel %vm9219_vm8, %v3445_v41, 0.0  ;;  %v5861_v14 = vpack.i.bf16 %v3546_v23, %v3547_v24  ;;  %v5871_v1 = vpack.i.bf16 %v3544_v36, %v3545_v25  ;;  %v6214_v36 = vpop.eup %6213 }
 0x665   : > { %v3522_v6 = vrot.slane %v3462_v18, 1  ;;  %v3525_v22 = vrot.slane %v8369_v47, 1  ;;  %v3483_v39 = vrot.slane %v3463_v16, 7  ;;  %6215 = vrcp.f32 %v3388_v2 }
 0x666   : > { %v3386_v13 = vadd.f32 1.0, %v6210_v19  ;;  %v3484_v33 = vrot.slane %v8355_v3, 7  ;;  %v5876_v41 = vpack.i.bf16 %v8355_v3, %v3463_v16  ;;  %v3482_v56 = vrot.slane %v3462_v18, 7  ;;  %v6034_v19 = vld [vmem:[#allocation3] sm:$0xff]  }
 0x667   : > { %5862 = vrot.lane.b32.xlu1 %v5861_v14, %s6246_s23  ;;  %v3389_v42 = vadd.f32 1.0, %v6212_v61  ;;  %5872 = vrot.lane.b32.xlu0 %v5871_v1, %s6246_s23  ;;  %v5866_v27 = vpack.i.bf16 %v3462_v18, %v8322_v52  ;;  %v3540_v23 = vsel %vm9210_vm0, %v3524_v28, %v3525_v22  ;;  %v3541_v24 = vsel %vm9220_vm1, %v3523_v21, %v3524_v28 }
 0x668   : > { %6217 = vrcp.f32 %v3386_v13  ;;  %v3542_v14 = vsel %vm9221_vm3, %v3522_v6, %v3523_v21  ;;  %v3543_v16 = vsel %vm9222_vm6, %v3521_v58, %v3522_v6  ;;  %vm9223_vm14 = vcmp.lt.s32.totalorder %v6362_v12, 1 }
 0x669   : > { %6219 = vrcp.f32 %v3389_v42  ;;  %v8395_v3 = vsel %vm9223_vm14, %v3475_v8, %v3476_v15  ;;  %vm9224_vm10 = vmmov %vm9223_vm14  ;;  %v9225_v58 = vrot.slane %v8254_v45, 7  ;;  %v9227_v28 = vrot.slane %v8302_v63, 7 }
 0x66a   : > { %6221 = vpow2.f32 %v8238_v59  ;;  %v8402_v13 = vsel %vm9224_vm10, %v3474_v35, %v3475_v8  ;;  %vm9226_vm2 = vmmov %vm9224_vm10  ;;  %v3477_v59 = vrot.slane %v8282_v43, 7  ;;  %vm3991_vm1 = vcmask 785408  }
 0x66b   : > { %v8408_v25 = vsel %vm9226_vm2, %v9225_v58, %v3474_v35  ;;  %vm9228_vm9 = vmmov %vm9226_vm2  ;;  %5867 = vrot.lane.b32.xlu1 %v5866_v27, %s6241_s24  ;;  %6223 = vpow2.f32 %v8241_v9  ;;  %5877 = vrot.lane.b32.xlu0 %v5876_v41, %s6241_s24  ;;  %v3481_v9 = vrot.slane %v8322_v52, 7  ;;  %v5881_v21 = vpack.i.bf16 %v3542_v14, %v3543_v16 }
 0x66c   : > { %v8414_v61 = vsel %vm9228_vm9, %v3479_v26, %v9227_v28  ;;  %vm9229_vm11 = vmmov %vm9226_vm2  ;;  %6225 = vpow2.f32 %v8312_v57  ;;  %5676 = vmatprep.mubr.msk.bf16.mxu1 %vm3991_vm1, %v6034_v19  ;;  %v3485_v57 = vrot.slane %v8369_v47, 7  ;;  %v5891_v18 = vpack.i.bf16 %v3540_v23, %v3541_v24 }
 0x66d   : > { %v8420_v50 = vsel %vm9229_vm11, %v3478_v10, %v3479_v26  ;;  %vm9230_vm8 = vmmov %vm9226_vm2  ;;  %v9235_v2 = vmov %v9227_v28  ;;  %v3447_v54 = vmul.f32 %v6214_v36, %v8176_v55  ;;  %vm9238_vm9 = vcmp.eq.s32.totalorder %v9170_v53, 1  ;;  %v9240_v36 = vld [vmem:[#allocation29_spill] sm:$0xff] }
 0x66e   : > { %v8425_v8 = vsel %vm9230_vm8, %v3483_v39, %v3484_v33  ;;  %vm9231_vm0 = vmmov %vm9226_vm2  ;;  %vm9239_vm11 = vcmp.eq.s32.totalorder %v9174_v29, 1  ;;  %vm9241_vm8 = vcmp.eq.s32.totalorder %v9240_v36, 1 }
 0x66f   : > { %v8431_v35 = vsel %vm9231_vm0, %v3482_v56, %v3483_v39  ;;  %vm9232_vm3 = vmmov %vm9231_vm0  ;;  %5882 = vrot.lane.b32.xlu1 %v5881_v21, %s6246_s23  ;;  %5892 = vrot.lane.b32.xlu0 %v5891_v18, %s6246_s23  ;;  %v3467_v1 = vsel %vm9238_vm9, %v3447_v54, 0.0  ;;  %v9242_v18 = vld [vmem:[#allocation34_spill] sm:$0xff] }
 0x670   : > { %v8436_v26 = vsel %vm9232_vm3, %v3477_v59, %v3478_v10  ;;  %vm9233_vm6 = vmmov %vm9231_vm0  ;;  %v3487_v42 = vrot.slane %v3467_v1, 7  ;;  %v3527_v27 = vrot.slane %v3467_v1, 1  ;;  %vm9244_vm3 = vcmp.lt.s32.totalorder %v6362_v12, 7 }
 0x671   : > { %v8442_v43 = vsel %vm9233_vm6, %v3476_v15, %v3477_v59  ;;  %vm9234_vm14 = vmmov %vm9231_vm0 }
 0x672   : > { %v8448_v52 = vsel %vm9234_vm14, %v3481_v9, %v3482_v56  ;;  %vm9236_vm10 = vmmov %vm9231_vm0  ;;  %v6216_v6 = vpop.eup %6215 }
 0x673   : > { %v8454_v10 = vsel %vm9236_vm10, %v9235_v2, %v3481_v9  ;;  %vm9237_vm2 = vmmov %vm9231_vm0  ;;  %v3448_v63 = vmul.f32 %v6216_v6, %v8195_v4  ;;  %vm9243_vm0 = vcmp.eq.s32.totalorder %v9242_v18, 1  ;;  %v8788_v18 = vld [vmem:[%s8959_s12] ss:$0 sm:$0xff] }
 0x674   : > { %v8460_v15 = vsel %vm9237_vm2, %v3484_v33, %v3485_v57  ;;  %vm9245_vm6 = vmmov %vm9244_vm3 }
 0x675   : > { %v6218_v39 = vpop.eup %6217  ;;  %v3468_v56 = vsel %vm9239_vm11, %v3448_v63, 0.0  ;;  %vm9246_vm14 = vmmov %vm9244_vm3 }
 0x676   : > { %v6220_v41 = vpop.eup %6219  ;;  %v3446_v55 = vmul.f32 %v6218_v39, %v8203_v0  ;;  %v3488_v33 = vrot.slane %v3468_v56, 7  ;;  %v3528_v24 = vrot.slane %v3468_v56, 1  ;;  %v5896_v14 = vpack.i.bf16 %v3468_v56, %v3467_v1  ;;  %vm9247_vm10 = vmmov %vm9237_vm2 }
 0x677   : > { %v6222_v23 = vpop.eup %6221  ;;  %v3449_v16 = vmul.f32 %v6220_v41, %v8207_v31  ;;  %vm9248_vm2 = vmmov %vm9244_vm3 }
 0x678   : > { %v6224_v19 = vpop.eup %6223  ;;  %v3466_v58 = vsel %vm9241_vm8, %v3446_v55, 0.0  ;;  %v3391_v4 = vadd.f32 1.0, %v6222_v23  ;;  %5897 = vrot.lane.b32.xlu0 %v5896_v14, %s6241_s24  ;;  %v3537_v54 = vsel %vm9244_vm3, %v3527_v27, %v3528_v24  ;;  %v8487_v39 = vsel %vm9247_vm10, %v3487_v42, %v3488_v33  ;;  %vm9249_vm9 = vmmov %vm9247_vm10 }
 0x679   : > { %v6226_v28 = vpop.eup %6225  ;;  %v3486_v59 = vrot.slane %v3466_v58, 7  ;;  %v3526_v9 = vrot.slane %v3466_v58, 1  ;;  %v5886_v21 = vpack.i.bf16 %v3466_v58, %v8369_v47  ;;  %v3469_v0 = vsel %vm9243_vm0, %v3449_v16, 0.0  ;;  %vm9250_vm11 = vmmov %vm9249_vm9 }
 0x67a   : > { %v3529_v2 = vrot.slane %v3469_v0, 1  ;;  %v3392_v31 = vadd.f32 1.0, %v6224_v19  ;;  %6227 = vrcp.f32 %v3391_v4  ;;  %v3390_v63 = vadd.f32 1.0, %v6226_v28  ;;  %vm9251_vm8 = vmmov %vm9249_vm9 }
 0x67b   : > { %5887 = vrot.lane.b32.xlu1 %v5886_v21, %s6241_s24  ;;  %v3538_v6 = vsel %vm9245_vm6, %v3526_v9, %v3527_v27  ;;  %v3539_v1 = vsel %vm9246_vm14, %v3525_v22, %v3526_v9  ;;  %v8493_v55 = vsel %vm9249_vm9, %v3486_v59, %v3487_v42  ;;  %v8497_v47 = vsel %vm9250_vm11, %v3485_v57, %v3486_v59  ;;  %v8508_v42 = vld [vmem:[%s8960_s13 + $0x18] sm:$0xff]   ;;  %vm9257_vm14 = vmmov %vm9248_vm2 }
 0x67c   : > { %v3536_v41 = vsel %vm9248_vm2, %v3528_v24, %v3529_v2  ;;  %v5901_v56 = vpack.i.bf16 %v3538_v6, %v3539_v1  ;;  %6229 = vrcp.f32 %v3392_v31  ;;  %v3489_v22 = vrot.slane %v3469_v0, 7  ;;  %5756 = vmatprep.subr.bf16.mxu1 %v8508_v42  ;;  %v9253_v59 = vld [vmem:[#allocation27_spill] sm:$0xff]  ;;  %vm9259_vm10 = vmmov %vm9248_vm2 }
 0x67d   : > { %v5911_v27 = vpack.i.bf16 %v3536_v41, %v3537_v54  ;;  %6231 = vrcp.f32 %v3390_v63  ;;  %vm9252_vm0 = vcmp.eq.s32.totalorder %v9188_v44, 1  ;;  %vm9254_vm3 = vcmp.eq.s32.totalorder %v9253_v59, 1  ;;  %v9255_v6 = vld [vmem:[#allocation31_spill] sm:$0xff]  ;;  %vm9261_vm2 = vmmov %vm9251_vm8 }
 0x67e   : > { %v8503_v23 = vsel %vm9251_vm8, %v3488_v33, %v3489_v22  ;;  %vm9256_vm6 = vcmp.eq.s32.totalorder %v9255_v6, 1  ;;  %vm9262_vm9 = vmmov %vm9261_vm2 }
 0x67f   : > { %5912 = vrot.lane.b32.xlu0 %v5911_v27, %s6246_s23  ;;  %5902 = vrot.lane.b32.xlu1 %v5901_v56, %s6246_s23  ;;  %v9258_v56 = vrot.slane %v8254_v45, 1  ;;  %v9260_v27 = vrot.slane %v8254_v45, 7  ;;  %vm9263_vm11 = vmmov %vm9259_vm10 }
 0x680   : > { %vm9264_vm8 = vmmov %vm9259_vm10 }
 0x687   : > { %v6228_v24 = vpop.eup %6227 }
 0x688   : > { %v3451_v57 = vmul.f32 %v6228_v24, %v8214_v51 }
 0x689   : > { %v6230_v14 = vpop.eup %6229 }
 0x68a   : > { %v6232_v16 = vpop.eup %6231  ;;  %v3452_v19 = vmul.f32 %v6230_v14, %v8217_v17  ;;  %v3471_v58 = vsel %vm9252_vm0, %v3451_v57, 0.0  ;;  %vm9265_vm0 = vmmov %vm9261_vm2 }
 0x68b   : > { %v3491_v4 = vrot.slane %v3471_v58, 7  ;;  %v3531_v33 = vrot.slane %v3471_v58, 1  ;;  %v3450_v28 = vmul.f32 %v6232_v16, %v8263_v11 }
 0x68c   : > { %v3472_v9 = vsel %vm9254_vm3, %v3452_v19, 0.0  ;;  %vm9266_vm3 = vmmov %vm9265_vm0 }
 0x68d   : > { %v3492_v21 = vrot.slane %v3472_v9, 7  ;;  %v3532_v54 = vrot.slane %v3472_v9, 1  ;;  %v5916_v31 = vpack.i.bf16 %v3472_v9, %v3471_v58  ;;  %v3470_v51 = vsel %vm9256_vm6, %v3450_v28, 0.0 }
 0x68e   : > { %v3490_v1 = vrot.slane %v3470_v51, 7  ;;  %v3530_v63 = vrot.slane %v3470_v51, 1  ;;  %v5906_v41 = vpack.i.bf16 %v3470_v51, %v3469_v0  ;;  %vm9267_vm6 = vcmask 261120  }
 0x68f   : > { %5917 = vrot.lane.b32.xlu0 %v5916_v31, %s6241_s24  ;;  %v3533_v17 = vsel %vm9257_vm14, %v3531_v33, %v3532_v54  ;;  %v3552_v11 = vsel %vm9259_vm10, %v3532_v54, %v9258_v56  ;;  %v3512_v24 = vsel %vm9261_vm2, %v3492_v21, %v9260_v27  ;;  %v8533_v57 = vsel %vm9262_vm9, %v3491_v4, %v3492_v21  ;;  %vm9268_vm14 = vmmov %vm9267_vm6 }
 0x690   : > { %5907 = vrot.lane.b32.xlu1 %v5906_v41, %s6241_s24  ;;  %v3534_v0 = vsel %vm9263_vm11, %v3530_v63, %v3531_v33  ;;  %v3535_v14 = vsel %vm9264_vm8, %v3529_v2, %v3530_v63  ;;  %v8542_v16 = vsel %vm9265_vm0, %v3490_v1, %v3491_v4  ;;  %v5926_v45 = vpack.i.bf16 %v3552_v11, %v3533_v17  ;;  %vm9269_vm10 = vmmov %vm9267_vm6 }
 0x691   : > { %v8546_v19 = vsel %vm9266_vm3, %v3489_v22, %v3490_v1  ;;  %v5921_v58 = vpack.i.bf16 %v3534_v0, %v3535_v14  ;;  %vm9270_vm2 = vmmov %vm9267_vm6  ;;  %vm9271_vm9 = vcmask 523264  }
 0x692   : > { %vm9272_vm11 = vmmov %vm9271_vm9 }
 0x693   : > { %5927 = vrot.lane.b32.xlu0 %v5926_v45, %s6246_s23  ;;  %vm9273_vm8 = vmmov %vm9271_vm9 }
 0x694   : > { %5922 = vrot.lane.b32.xlu1 %v5921_v58, %s6246_s23  ;;  %vm9274_vm0 = vmmov %vm9273_vm8 }
 0x695   : > { %vm9275_vm3 = vmmov %vm9270_vm2 }
 0x6cb   : > { %v5838_v28 = vpop.permute.xlu0 %5837 }
 0x6cc   : > { %v5840_v54 = vunpack.i.h.bf16 %v5838_v28  ;;  %v5839_v2 = vunpack.i.l.bf16 %v5838_v28 }
 0x6cd   : > { %v5833_v9 = vpop.permute.xlu1 %5832 }
 0x6ce   : > { %v5835_v33 = vunpack.i.h.bf16 %v5833_v9  ;;  %v5834_v21 = vunpack.i.l.bf16 %v5833_v9  ;;  %v3715_v17 = vsel %vm9269_vm10, %v8402_v13, %v5839_v2  ;;  %v3716_v56 = vsel %vm9270_vm2, %v8395_v3, %v5840_v54  ;;  %vm9278_vm10 = vmmov %vm9270_vm2 }
 0x6d0   : > { %v3713_v41 = vsel %vm9267_vm6, %v3512_v24, %v5834_v21  ;;  %v3714_v12 = vsel %vm9268_vm14, %v8408_v25, %v5835_v33  ;;  %vm9276_vm6 = vmmov %vm9270_vm2 }
 0x6d1   : > { %v5843_v31 = vpop.permute.xlu1 %5842  ;;  %v5853_v51 = vpop.permute.xlu0 %5852  ;;  %vm9277_vm14 = vmmov %vm9270_vm2 }
 0x6d2   : > { %v5845_v4 = vunpack.i.h.bf16 %v5843_v31  ;;  %v5844_v63 = vunpack.i.l.bf16 %v5843_v31  ;;  %v5855_v22 = vunpack.i.h.bf16 %v5853_v51  ;;  %v5854_v1 = vunpack.i.l.bf16 %v5853_v51  ;;  %vm9279_vm2 = vmmov %vm9274_vm0 }
 0x6d4   : > { %v3733_v11 = vsel %vm9271_vm9, %v3713_v41, %v5844_v63  ;;  %v3734_v27 = vsel %vm9272_vm11, %v3714_v12, %v5845_v4  ;;  %v3735_v0 = vsel %vm9273_vm8, %v3715_v17, %v5854_v1  ;;  %v3736_v14 = vsel %vm9274_vm0, %v3716_v56, %v5855_v22  ;;  %vm9280_vm9 = vmmov %vm9274_vm0 }
 0x6d5   : > { %v5444_v24 = vpack.c.bf16 %v3733_v11, %v3733_v11  ;;  %v5445_v45 = vpack.c.bf16 %v3734_v27, %v3734_v27  ;;  %v5848_v58 = vpop.permute.xlu1 %5847  ;;  %v5446_v25 = vpack.c.bf16 %v3735_v0, %v3735_v0  ;;  %v5447_v28 = vpack.c.bf16 %v3736_v14, %v3736_v14  ;;  %v5858_v9 = vpop.permute.xlu0 %5857  ;;  %vm9281_vm11 = vmmov %vm9274_vm0 }
 0x6d6   : > { %v5850_v13 = vunpack.i.h.bf16 %v5848_v58  ;;  %v5849_v3 = vunpack.i.l.bf16 %v5848_v58  ;;  %v5860_v33 = vunpack.i.h.bf16 %v5858_v9  ;;  %v5859_v21 = vunpack.i.l.bf16 %v5858_v9  ;;  %vm9282_vm8 = vmmov %vm9274_vm0 }
 0x6d7   : > { %3838 = vst.msk [vmem:[#allocation3 + $0x8] sm:$0xf] %vm3753_vm12, %v5444_v24  ;;  %3839 = vst.msk [vmem:[#allocation3 + $0xc] sm:$0xf] %vm3753_vm12, %v5445_v45 }
 0x6d8   : > { %3840 = vst.msk [vmem:[#allocation3 + $0x10] sm:$0xf] %vm3753_vm12, %v5446_v25  ;;  %3841 = vst.msk [vmem:[#allocation3 + $0x14] sm:$0xf] %vm3753_vm12, %v5447_v28  ;;  %v3718_v4 = vsel %vm9275_vm3, %v8436_v26, %v5850_v13  ;;  %v3717_v63 = vsel %vm9276_vm6, %v8442_v43, %v5849_v3  ;;  %v3720_v22 = vsel %vm9277_vm14, %v8414_v61, %v5860_v33  ;;  %v6038_v43 = vld [vmem:[%s8958_s11 + $0x80] sm:$0xff]   ;;  %v8583_v61 = vld [vmem:[%s8960_s13 + $0x10] sm:$0xff]  }
 0x6d9   : > { %v5863_v54 = vpop.permute.xlu1 %5862  ;;  %v5873_v2 = vpop.permute.xlu0 %5872  ;;  %v3719_v1 = vsel %vm9278_vm10, %v8420_v50, %v5859_v21  ;;  %vm9283_vm0 = vmmov %vm9275_vm3 }
 0x6da   : > { %v5865_v31 = vunpack.i.h.bf16 %v5863_v54  ;;  %v5864_v51 = vunpack.i.l.bf16 %v5863_v54  ;;  %v5875_v41 = vunpack.i.h.bf16 %v5873_v2  ;;  %v5874_v12 = vunpack.i.l.bf16 %v5873_v2  ;;  %vm9284_vm3 = vmmov %vm9283_vm0 }
 0x6db   : > { %vm9285_vm6 = vmmov %vm9283_vm0 }
 0x6dc   : > { %v3737_v17 = vsel %vm9279_vm2, %v3717_v63, %v5864_v51  ;;  %v3738_v56 = vsel %vm9280_vm9, %v3718_v4, %v5865_v31  ;;  %v3739_v11 = vsel %vm9281_vm11, %v3719_v1, %v5874_v12  ;;  %v3740_v27 = vsel %vm9282_vm8, %v3720_v22, %v5875_v41  ;;  %v6041_v41 = vld [vmem:[%s8958_s11 + $0x78] sm:$0xff]   ;;  %vm9286_vm14 = vmmov %vm9283_vm0 }
 0x6dd   : > { %v5448_v26 = vpack.c.bf16 %v3737_v17, %v3737_v17  ;;  %v5449_v0 = vpack.c.bf16 %v3738_v56, %v3738_v56  ;;  %v5868_v14 = vpop.permute.xlu1 %5867  ;;  %v5450_v50 = vpack.c.bf16 %v3739_v11, %v3739_v11  ;;  %v5451_v24 = vpack.c.bf16 %v3740_v27, %v3740_v27  ;;  %v5878_v45 = vpop.permute.xlu0 %5877  ;;  %vm9287_vm10 = vmmov %vm9279_vm2  ;;  %v6045_v27 = vld [vmem:[%s8958_s11 + $0x70] sm:$0xff]  }
 0x6de   : > { %v6036_v58 = vld [vmem:[#allocation3 + $0x8] sm:$0xff]   ;;  %v5870_v25 = vunpack.i.h.bf16 %v5868_v14  ;;  %v5869_v28 = vunpack.i.l.bf16 %v5868_v14  ;;  %v5880_v13 = vunpack.i.h.bf16 %v5878_v45  ;;  %v5879_v3 = vunpack.i.l.bf16 %v5878_v45  ;;  %vm9288_vm9 = vmmov %vm9279_vm2  ;;  %v6053_v45 = vld [vmem:[%s8958_s11 + $0x60] sm:$0xff]  }
 0x6df   : > { %3842 = vst.msk [vmem:[#allocation3 + $0x18] sm:$0xf] %vm3753_vm12, %v5448_v26  ;;  %3843 = vst.msk [vmem:[#allocation3 + $0x1c] sm:$0xf] %vm3753_vm12, %v5449_v0  ;;  %v6037_v9 = vld [vmem:[#allocation3 + $0x10] sm:$0xff]   ;;  %5644 = vmatprep.mubr.msk.bf16.mxu0 %vm3991_vm1, %v6036_v58  ;;  %5677 = vmatmul.mubr.msk.bf16.vlgmr.msra.gmra.mxu1 %vm3991_vm1, %v6036_v58 }
 0x6e0   : > { %3844 = vst.msk [vmem:[#allocation3 + $0x20] sm:$0xf] %vm3753_vm12, %v5450_v50  ;;  %3845 = vst.msk [vmem:[#allocation3 + $0x24] sm:$0xf] %vm3753_vm12, %v5451_v24  ;;  %5645 = vmatmul.mubr.msk.bf16.vlgmr.msra.gmra.mxu0 %vm3991_vm1, %v6037_v9  ;;  %5680 = vmatprep.mubr.msk.bf16.mxu1 %vm3991_vm1, %v6037_v9  ;;  %v3722_v31 = vsel %vm9283_vm0, %v8448_v52, %v5870_v25  ;;  %v3721_v51 = vsel %vm9284_vm3, %v8454_v10, %v5869_v28  ;;  %v6049_v50 = vld [vmem:[%s8958_s11 + $0x68] sm:$0xff]  }
 0x6e1   : > { %v5883_v33 = vpop.permute.xlu1 %5882  ;;  %v5893_v21 = vpop.permute.xlu0 %5892  ;;  %5697 = vmatpush3.bf16.msra.mxu0 %v8345_v5  ;;  %5760 = vmatpush3.bf16.msra.mxu1 %v8508_v42  ;;  %v8606_v5 = vld [vmem:[%s8960_s13 + $0x8] sm:$0xff]   ;;  %v3724_v52 = vsel %vm9285_vm6, %v8425_v8, %v5880_v13  ;;  %v3723_v10 = vsel %vm9286_vm14, %v8431_v35, %v5879_v3  ;;  %vm9289_vm11 = vmmov %vm9279_vm2  ;;  %v8622_v8 = vld [vmem:[%s8960_s13] sm:$0xff]  }
 0x6e2   : > { %v5885_v54 = vunpack.i.h.bf16 %v5883_v33  ;;  %v5884_v2 = vunpack.i.l.bf16 %v5883_v33  ;;  %v5895_v4 = vunpack.i.h.bf16 %v5893_v21  ;;  %v5894_v63 = vunpack.i.l.bf16 %v5893_v21  ;;  %5698 = vmatprep.subr.bf16.mxu0 %v6038_v43  ;;  %5757 = vmatprep.subr.bf16.mxu1 %v8583_v61  ;;  %vm9290_vm8 = vmmov %vm9283_vm0 }
 0x6e3   : > { %vm9291_vm3 = vmmov %vm9283_vm0 }
 0x6e4   : > { %v3741_v12 = vsel %vm9287_vm10, %v3721_v51, %v5884_v2  ;;  %v3742_v22 = vsel %vm9279_vm2, %v3722_v31, %v5885_v54  ;;  %v3743_v1 = vsel %vm9288_vm9, %v3723_v10, %v5894_v63  ;;  %v3744_v17 = vsel %vm9289_vm11, %v3724_v52, %v5895_v4  ;;  %vm9292_vm6 = vmmov %vm9283_vm0 }
 0x6e5   : > { %v5452_v56 = vpack.c.bf16 %v3741_v12, %v3741_v12  ;;  %v5453_v11 = vpack.c.bf16 %v3742_v22, %v3742_v22  ;;  %v5454_v35 = vpack.c.bf16 %v3743_v1, %v3743_v1  ;;  %v5455_v26 = vpack.c.bf16 %v3744_v17, %v3744_v17  ;;  %5699 = vmatpush3.bf16.msra.mxu0 %v6038_v43  ;;  %vm9293_vm14 = vmmov %vm9279_vm2 }
 0x6e6   : > { %v6039_v0 = vld [vmem:[#allocation3 + $0x18] sm:$0xff]   ;;  %5761 = vmatpush3.bf16.msra.mxu1 %v8583_v61  ;;  %5700 = vmatprep.subr.bf16.mxu0 %v6041_v41  ;;  %vm9294_vm10 = vmmov %vm9279_vm2 }
 0x6e7   : > { %3846 = vst.msk [vmem:[#allocation3 + $0x28] sm:$0xf] %vm3753_vm12, %v5452_v56  ;;  %3847 = vst.msk [vmem:[#allocation3 + $0x2c] sm:$0xf] %vm3753_vm12, %v5453_v11  ;;  %v6040_v14 = vld [vmem:[#allocation3 + $0x20] sm:$0xff]   ;;  %5758 = vmatprep.subr.bf16.mxu1 %v8606_v5  ;;  %5648 = vmatprep.mubr.msk.bf16.mxu0 %vm3991_vm1, %v6039_v0 }
 0x6e8   : > { %3848 = vst.msk [vmem:[#allocation3 + $0x30] sm:$0xf] %vm3753_vm12, %v5454_v35  ;;  %3849 = vst.msk [vmem:[#allocation3 + $0x34] sm:$0xf] %vm3753_vm12, %v5455_v26  ;;  %5681 = vmatmul.mubr.msk.bf16.gmra.mxu1 %vm3991_vm1, %v6039_v0  ;;  %5649 = vmatmul.mubr.msk.bf16.gmra.mxu0 %vm3991_vm1, %v6040_v14 }
 0x6e9   : > { %5684 = vmatprep.mubr.msk.bf16.mxu1 %vm3991_vm1, %v6040_v14  ;;  %5701 = vmatpush3.bf16.msra.mxu0 %v6041_v41  ;;  %vm9295_vm9 = vmmov %vm9279_vm2 }
 0x6ea   : > { %5762 = vmatpush3.bf16.msra.mxu1 %v8606_v5  ;;  %v5898_v43 = vpop.permute.xlu0 %5897  ;;  %5702 = vmatprep.subr.bf16.mxu0 %v6045_v27  ;;  %vm9296_vm11 = vmmov %vm9283_vm0 }
 0x6eb   : > { %5759 = vmatprep.subr.bf16.mxu1 %v8622_v8  ;;  %v5900_v25 = vunpack.i.h.bf16 %v5898_v43  ;;  %v5899_v28 = vunpack.i.l.bf16 %v5898_v43 }
 0x6ed   : > { %v5888_v24 = vpop.permute.xlu1 %5887  ;;  %5703 = vmatpush3.bf16.msra.mxu0 %v6045_v27  ;;  %v3728_v4 = vsel %vm9290_vm8, %v8487_v39, %v5900_v25  ;;  %v3727_v63 = vsel %vm9283_vm0, %v8493_v55, %v5899_v28  ;;  %vm9297_vm8 = vmmov %vm9283_vm0 }
 0x6ee   : > { %v6043_v58 = vld [vmem:[#allocation3 + $0x28] sm:$0xff]   ;;  %5763 = vmatpush3.bf16.msra.mxu1 %v8622_v8  ;;  %v5890_v9 = vunpack.i.h.bf16 %v5888_v24  ;;  %v5889_v13 = vunpack.i.l.bf16 %v5888_v24  ;;  %5704 = vmatprep.subr.bf16.mxu0 %v6049_v50 }
 0x6ef   : > { %v6044_v3 = vld [vmem:[#allocation3 + $0x30] sm:$0xff]   ;;  %5652 = vmatprep.mubr.msk.bf16.mxu0 %vm3991_vm1, %v6043_v58 }
 0x6f0   : > { %5685 = vmatmul.mubr.msk.bf16.gmra.mxu1 %vm3991_vm1, %v6043_v58  ;;  %5653 = vmatmul.mubr.msk.bf16.gmra.mxu0 %vm3991_vm1, %v6044_v3  ;;  %v3726_v41 = vsel %vm9291_vm3, %v8497_v47, %v5890_v9  ;;  %v3725_v52 = vsel %vm9292_vm6, %v8460_v15, %v5889_v13  ;;  %vm9298_vm3 = vmmov %vm9283_vm0 }
 0x6f1   : > { %v5913_v33 = vpop.permute.xlu0 %5912  ;;  %v5903_v21 = vpop.permute.xlu1 %5902  ;;  %5688 = vmatprep.mubr.msk.bf16.mxu1 %vm3991_vm1, %v6044_v3  ;;  %5705 = vmatpush3.bf16.msra.mxu0 %v6049_v50  ;;  %vm9299_vm6 = vmmov %vm9279_vm2 }
 0x6f2   : > { %v5915_v54 = vunpack.i.h.bf16 %v5913_v33  ;;  %v5914_v2 = vunpack.i.l.bf16 %v5913_v33  ;;  %v5905_v31 = vunpack.i.h.bf16 %v5903_v21  ;;  %v5904_v51 = vunpack.i.l.bf16 %v5903_v21  ;;  %5706 = vmatprep.subr.bf16.mxu0 %v6053_v45 }
 0x6f4   : > { %v3747_v10 = vsel %vm9293_vm14, %v3727_v63, %v5914_v2  ;;  %v3748_v12 = vsel %vm9294_vm10, %v3728_v4, %v5915_v54  ;;  %v3745_v22 = vsel %vm9279_vm2, %v3725_v52, %v5904_v51  ;;  %v3746_v1 = vsel %vm9295_vm9, %v3726_v41, %v5905_v31  ;;  %vm9300_vm14 = vmmov %vm9279_vm2  ;;  %v6054_v4 = vld [vmem:[#allocation3 + $0x10] sm:$0xff]   ;;  %v9302_v63 = vld [vmem:[#allocation5_spill] sm:$0xff] }
 0x6f5   : > { %v5458_v17 = vpack.c.bf16 %v3747_v10, %v3747_v10  ;;  %v5459_v39 = vpack.c.bf16 %v3748_v12, %v3748_v12  ;;  %v5456_v56 = vpack.c.bf16 %v3745_v22, %v3745_v22  ;;  %v5457_v11 = vpack.c.bf16 %v3746_v1, %v3746_v1  ;;  %5707 = vmatpush3.bf16.msra.mxu0 %v6053_v45  ;;  %vm9301_vm10 = vmmov %vm9279_vm2  ;;  %v6056_v41 = vld [vmem:[#allocation3 + $0x18] sm:$0xff]   ;;  %v6057_v10 = vld [vmem:[#allocation3 + $0x20] sm:$0xff]  }
 0x6f6   : > { %5728 = vmatprep.subr.bf16.mxu0 %v8508_v42  ;;  %vm9303_vm9 = vmmov %vm9279_vm2  ;;  %v9304_v52 = vld [vmem:[#allocation7_spill] sm:$0xff]  ;;  %v9306_v12 = vld [vmem:[#allocation8_spill] sm:$0xff] }
 0x6f7   : > { %3852 = vst.msk [vmem:[#allocation3 + $0x40] sm:$0xf] %vm3753_vm12, %v5458_v17  ;;  %3853 = vst.msk [vmem:[#allocation3 + $0x44] sm:$0xf] %vm3753_vm12, %v5459_v39  ;;  %v6058_v22 = vld [vmem:[#allocation3 + $0x28] sm:$0xff]   ;;  %v6059_v17 = vld [vmem:[#allocation3 + $0x30] sm:$0xff]  }
 0x6f8   : > { %3850 = vst.msk [vmem:[#allocation3 + $0x38] sm:$0xf] %vm3753_vm12, %v5456_v56  ;;  %3851 = vst.msk [vmem:[#allocation3 + $0x3c] sm:$0xf] %vm3753_vm12, %v5457_v11  ;;  %v9308_v1 = vld [vmem:[#allocation9_spill] sm:$0xff]  ;;  %v9310_v39 = vld [vmem:[#allocation10_spill] sm:$0xff] }
 0x6f9   : > { %v9314_v11 = vld [vmem:[#allocation12_spill] sm:$0xff] }
 0x6fe   : > { %v6047_v55 = vld [vmem:[#allocation3 + $0x40] sm:$0xff]  }
 0x6ff   : > { %v6046_v15 = vld [vmem:[#allocation3 + $0x38] sm:$0xff]   ;;  %v6061_v56 = vld [vmem:[#allocation3 + $0x40] sm:$0xff]  }
 0x700   : > { %5656 = vmatprep.mubr.msk.bf16.mxu0 %vm3991_vm1, %v6046_v15  ;;  %5689 = vmatmul.mubr.msk.bf16.gmra.mxu1 %vm3991_vm1, %v6046_v15 }
 0x701   : > { %v5918_v47 = vpop.permute.xlu0 %5917  ;;  %5657 = vmatmul.mubr.msk.bf16.gmra.mxu0 %vm3991_vm1, %v6047_v55  ;;  %5692 = vmatprep.mubr.msk.bf16.mxu1 %vm3991_vm1, %v6047_v55  ;;  %v9316_v55 = vld [vmem:[#allocation13_spill] sm:$0xff] }
 0x702   : > { %v5908_v27 = vpop.permute.xlu1 %5907  ;;  %v5920_v35 = vunpack.i.h.bf16 %v5918_v47  ;;  %v5919_v26 = vunpack.i.l.bf16 %v5918_v47  ;;  %v9318_v47 = vld [vmem:[#allocation4_spill] sm:$0xff] }
 0x703   : > { %v5910_v0 = vunpack.i.h.bf16 %v5908_v27  ;;  %v5909_v14 = vunpack.i.l.bf16 %v5908_v27  ;;  %v9320_v27 = vld [vmem:[#allocation6_spill] sm:$0xff] }
 0x704   : > { %v3732_v58 = vsel %vm9296_vm11, %v8533_v57, %v5920_v35  ;;  %v3731_v25 = vsel %vm9297_vm8, %v8542_v16, %v5919_v26  ;;  %vm9305_vm11 = vmmov %vm9279_vm2 }
 0x705   : > { %v5928_v43 = vpop.permute.xlu0 %5927  ;;  %v3730_v13 = vsel %vm9283_vm0, %v8546_v19, %v5910_v0  ;;  %v3729_v3 = vsel %vm9298_vm3, %v8503_v23, %v5909_v14  ;;  %vm9309_vm8 = vmmov %vm9279_vm2 }
 0x706   : > { %v5930_v50 = vunpack.i.h.bf16 %v5928_v43  ;;  %v5929_v24 = vunpack.i.l.bf16 %v5928_v43  ;;  %v5923_v45 = vpop.permute.xlu1 %5922  ;;  %vm9311_vm0 = vmmov %vm9279_vm2 }
 0x707   : > { %v5925_v28 = vunpack.i.h.bf16 %v5923_v45  ;;  %v5924_v9 = vunpack.i.l.bf16 %v5923_v45  ;;  %vm9313_vm3 = vmmov %vm9311_vm0 }
 0x708   : > { %v3752_v33 = vsel %vm9299_vm6, %v3732_v58, %v5930_v50  ;;  %v3751_v21 = vsel %vm9300_vm14, %v3731_v25, %v5929_v24  ;;  %vm9315_vm6 = vmmov %vm9311_vm0 }
 0x709   : > { %v5463_v54 = vpack.c.bf16 %v3752_v33, %v3752_v33  ;;  %v5462_v2 = vpack.c.bf16 %v3751_v21, %v3751_v21  ;;  %v3749_v31 = vsel %vm9301_vm10, %v3729_v3, %v5924_v9  ;;  %v3750_v57 = vsel %vm9279_vm2, %v3730_v13, %v5925_v28  ;;  %vm9317_vm14 = vmmov %vm9311_vm0 }
 0x70a   : > { %v5460_v51 = vpack.c.bf16 %v3749_v31, %v3749_v31  ;;  %v5461_v16 = vpack.c.bf16 %v3750_v57, %v3750_v57  ;;  %vm9319_vm10 = vmmov %vm9311_vm0 }
 0x70b   : > { %3857 = vst.msk [vmem:[#allocation3 + $0x54] sm:$0xf] %vm3753_vm12, %v5463_v54  ;;  %3856 = vst.msk [vmem:[#allocation3 + $0x50] sm:$0xf] %vm3753_vm12, %v5462_v2 }
 0x70c   : > { %3854 = vst.msk [vmem:[#allocation3 + $0x48] sm:$0xf] %vm3753_vm12, %v5460_v51  ;;  %3855 = vst.msk [vmem:[#allocation3 + $0x4c] sm:$0xf] %vm3753_vm12, %v5461_v16 }
 0x70d   : > { %vm9307_vm12 = vmmov %vm9279_vm2 }
 0x70e   : > { %vm9321_vm2 = vmmov %vm9311_vm0 }
 0x712   : > { %v6052_v23 = vld [vmem:[#allocation3 + $0x50] sm:$0xff]  }
 0x713   : > { %v6050_v19 = vld [vmem:[#allocation3 + $0x48] sm:$0xff]  }
 0x714   : > { %5660 = vmatprep.mubr.msk.bf16.mxu0 %vm3991_vm1, %v6050_v19  ;;  %5693 = vmatmul.mubr.msk.bf16.gmra.mxu1 %vm3991_vm1, %v6050_v19  ;;  %v6062_v15 = vld [vmem:[#allocation3 + $0x48] sm:$0xff]  }
 0x715   : > { %5661 = vmatmul.mubr.msk.bf16.gmra.mxu0 %vm3991_vm1, %v6052_v23  ;;  %5740 = vmatprep.mubr.msk.bf16.mxu1 %vm9303_vm9, %v9302_v63  ;;  %vm9330_vm9 = vcmp.eq.s32.totalorder %v9136_v20, 1 }
 0x716   : > { %5708 = vmatprep.mubr.msk.bf16.mxu0 %vm3991_vm1, %v6054_v4 }
 0x71c   : > { %5741 = vmatmul.mubr.msk.bf16.vlgmr.msra.gmra.mxu1 %vm9305_vm11, %v9304_v52  ;;  %vm9334_vm11 = vcmp.eq.s32.totalorder %v9152_v30, 1 }
 0x71d   : > { %5709 = vmatmul.mubr.msk.bf16.vlgmr.msra.gmra.mxu0 %vm3991_vm1, %v6056_v41  ;;  %5744 = vmatprep.mubr.msk.bf16.mxu1 %vm9307_vm12, %v9306_v12  ;;  %vm9335_vm12 = vcmp.eq.s32.totalorder %v9170_v53, 1 }
 0x71e   : > { %5729 = vmatpush3.bf16.msra.mxu0 %v8508_v42  ;;  %5712 = vmatprep.mubr.msk.bf16.mxu0 %vm3991_vm1, %v6057_v10  ;;  %v6060_v42 = vld [vmem:[#allocation3 + $0x38] sm:$0xff]  }
 0x71f   : > { %5730 = vmatprep.subr.bf16.mxu0 %v8583_v61 }
 0x722   : > { %5731 = vmatpush3.bf16.msra.mxu0 %v8583_v61  ;;  %v9312_v61 = vld [vmem:[#allocation11_spill] sm:$0xff] }
 0x723   : > { %5732 = vmatprep.subr.bf16.mxu0 %v8606_v5 }
 0x724   : > { %5745 = vmatmul.mubr.msk.bf16.gmra.mxu1 %vm9309_vm8, %v9308_v1  ;;  %vm9336_vm8 = vcmp.eq.s32.totalorder %v9163_v49, 1 }
 0x725   : > { %5713 = vmatmul.mubr.msk.bf16.gmra.mxu0 %vm3991_vm1, %v6058_v22  ;;  %5748 = vmatprep.mubr.msk.bf16.mxu1 %vm9311_vm0, %v9310_v39  ;;  %vm9337_vm0 = vcmp.eq.s32.totalorder %v9174_v29, 1  ;;  %v9340_v29 = vld [vmem:[#allocation29_spill] sm:$0xff] }
 0x726   : > { %5716 = vmatprep.mubr.msk.bf16.mxu0 %vm3991_vm1, %v6059_v17  ;;  %5733 = vmatpush3.bf16.msra.mxu0 %v8606_v5  ;;  %v6063_v5 = vld [vmem:[#allocation3 + $0x50] sm:$0xff]  }
 0x727   : > { %5734 = vmatprep.subr.bf16.mxu0 %v8622_v8 }
 0x72a   : > { %5735 = vmatpush3.bf16.msra.mxu0 %v8622_v8  ;;  %v6064_v8 = vld [vmem:[#allocation3 + $0x58] sm:$0xff]  }
 0x72c   : > { %5749 = vmatmul.mubr.msk.bf16.gmra.mxu1 %vm9313_vm3, %v9312_v61  ;;  %vm9341_vm3 = vcmp.eq.s32.totalorder %v9340_v29, 1 }
 0x72d   : > { %5717 = vmatmul.mubr.msk.bf16.gmra.mxu0 %vm3991_vm1, %v6060_v42  ;;  %5752 = vmatprep.mubr.msk.bf16.mxu1 %vm9315_vm6, %v9314_v11 }
 0x72e   : > { %5720 = vmatprep.mubr.msk.bf16.mxu0 %vm3991_vm1, %v6061_v56 }
 0x734   : > { %5753 = vmatmul.mubr.msk.bf16.gmra.mxu1 %vm9317_vm14, %v9316_v55 }
 0x735   : > { %5721 = vmatmul.mubr.msk.bf16.gmra.mxu0 %vm3991_vm1, %v6062_v15 }
 0x736   : > { %5724 = vmatprep.mubr.msk.bf16.mxu0 %vm3991_vm1, %v6063_v5 }
 0x73d   : > { %5725 = vmatmul.mubr.msk.bf16.gmra.mxu0 %vm3991_vm1, %v6064_v8  ;;  %vm4893_vm1 = vcmask 257024  }
 0x73e   : > { %5736 = vmatprep.mubr.msk.bf16.mxu0 %vm9319_vm10, %v9318_v47 }
 0x745   : > { %5737 = vmatmul.mubr.msk.bf16.vlgmr.msra.gmra.mxu0 %vm9321_vm2, %v9320_v27 }
 0x79f   : > { %v5678_v35 = vpop.f32.mrf.mxu1 }
 0x7a0   : > { %v5646_v26 = vpop.f32.mrf.mxu0 }
 0x7a1   : > { %v8724_v0 = vadd.f32 %v5678_v35, %v5646_v26  ;;  %v4213_v14 = vpop.f32.mrf.mxu1 }
 0x7a2   : > { %v4056_v43 = vpop.f32.mrf.mxu0 }
 0x7a3   : > { %9322 = vst [vmem:[#allocation17_spill] sm:$0xff] %v8724_v0  ;;  %v8726_v50 = vadd.f32 %v4213_v14, %v4056_v43  ;;  %v5679_v24 = vpop.f32.mrf.mxu1 }
 0x7a4   : > { %v5647_v45 = vpop.f32.mrf.mxu0 }
 0x7a5   : > { %9323 = vst [vmem:[#allocation22_spill] sm:$0xff] %v8726_v50  ;;  %v8728_v58 = vadd.f32 %v5679_v24, %v5647_v45  ;;  %v4216_v25 = vpop.f32.mrf.mxu1 }
 0x7a6   : > { %v4059_v28 = vpop.f32.mrf.mxu0 }
 0x7a7   : > { %9324 = vst [vmem:[#allocation19_spill] sm:$0xff] %v8728_v58  ;;  %v8730_v9 = vadd.f32 %v4216_v25, %v4059_v28 }
 0x7a8   : > { %v5682_v13 = vpop.f32.mrf.mxu1  ;;  %v5650_v3 = vpop.f32.mrf.mxu0 }
 0x7a9   : > { %9325 = vst [vmem:[#allocation24_spill] sm:$0xff] %v8730_v9  ;;  %v4238_v60 = vadd.f32 %v5682_v13, %v5650_v3 }
 0x7aa   : > { %v4229_v33 = vpop.f32.mrf.mxu1  ;;  %v4072_v21 = vpop.f32.mrf.mxu0 }
 0x7ab   : > { %v4230_v6 = vadd.f32 %v4229_v33, %v4072_v21 }
 0x7ac   : > { %v5683_v54 = vpop.f32.mrf.mxu1  ;;  %v5651_v2 = vpop.f32.mrf.mxu0 }
 0x7ad   : > { %v4241_v58 = vadd.f32 %v5683_v54, %v5651_v2 }
 0x7ae   : > { %v4232_v31 = vpop.f32.mrf.mxu1  ;;  %v4075_v57 = vpop.f32.mrf.mxu0 }
 0x7b0   : > { %v5686_v51 = vpop.f32.mrf.mxu1  ;;  %v5654_v16 = vpop.f32.mrf.mxu0 }
 0x7b2   : > { %v4245_v23 = vpop.f32.mrf.mxu1  ;;  %v4088_v19 = vpop.f32.mrf.mxu0 }
 0x7b4   : > { %v8732_v4 = vpop.f32.mrf.mxu1  ;;  %v8734_v63 = vpop.f32.mrf.mxu0 }
 0x7b6   : > { %v8736_v41 = vpop.f32.mrf.mxu1  ;;  %v8738_v52 = vpop.f32.mrf.mxu0 }
 0x7c0   : > { %v8740_v10 = vpop.f32.mrf.mxu1 }
 0x7c1   : > { %v8742_v12 = vpop.f32.mrf.mxu0 }
 0x7c2   : > { %v8744_v22 = vpop.f32.mrf.mxu1 }
 0x7c3   : > { %v8746_v1 = vpop.f32.mrf.mxu0 }
 0x7c4   : > { %v8748_v17 = vpop.f32.mrf.mxu1 }
 0x7c5   : > { %v8750_v39 = vpop.f32.mrf.mxu0 }
 0x7c6   : > { %v8752_v42 = vpop.f32.mrf.mxu1 }
 0x7c7   : > { %v8754_v61 = vpop.f32.mrf.mxu0 }
 0x7d4   : > { %v8756_v56 = vpop.f32.mrf.mxu1 }
 0x7d5   : > { %v8758_v11 = vpop.f32.mrf.mxu0 }
 0x7d6   : > { %v8760_v15 = vpop.f32.mrf.mxu1 }
 0x7d7   : > { %v8762_v55 = vpop.f32.mrf.mxu0 }
 0x7d8   : > { %v8764_v5 = vpop.f32.mrf.mxu1 }
 0x7d9   : > { %v8766_v8 = vpop.f32.mrf.mxu0 }
 0x7da   : > { %v8768_v47 = vpop.f32.mrf.mxu1 }
 0x7db   : > { %v8770_v27 = vpop.f32.mrf.mxu0 }
 0x7dc   : > { %v5742_v35 = vpop.f32.mrf.mxu1 }
 0x7dd   : > { %v8772_v26 = vpop.f32.mrf.mxu0  ;;  %v4719_v13 = vadd.f32 %v5742_v35, %v8783_v37 }
 0x7de   : > { %9326 = vst [vmem:[#allocation21_spill] sm:$0xff] %v8772_v26  ;;  %v4710_v14 = vpop.f32.mrf.mxu1  ;;  %v4254_v26 = vadd.f32 %v5686_v51, %v5654_v16 }
 0x7df   : > { %v8774_v43 = vpop.f32.mrf.mxu0  ;;  %v4711_v33 = vadd.f32 %v8783_v37, %v4710_v14 }
 0x7e0   : > { %9327 = vst [vmem:[#allocation26_spill] sm:$0xff] %v8774_v43  ;;  %v5743_v24 = vpop.f32.mrf.mxu1  ;;  %v4233_v43 = vadd.f32 %v4232_v31, %v4075_v57 }
 0x7e1   : > { %v8776_v45 = vpop.f32.mrf.mxu0  ;;  %v4722_v0 = vadd.f32 %v5743_v24, %v8783_v37 }
 0x7e2   : > { %9328 = vst [vmem:[#allocation23_spill] sm:$0xff] %v8776_v45  ;;  %v4713_v25 = vpop.f32.mrf.mxu1 }
 0x7e3   : > { %v8778_v28 = vpop.f32.mrf.mxu0  ;;  %v4714_v57 = vadd.f32 %v8783_v37, %v4713_v25 }
 0x7e4   : > { %9329 = vst [vmem:[#allocation28_spill] sm:$0xff] %v8778_v28  ;;  %v5746_v46 = vpop.f32.mrf.mxu1 }
 0x7e5   : > { %v5714_v38 = vpop.f32.mrf.mxu0 }
 0x7e6   : > { %v4560_v59 = vadd.f32 %v5714_v38, %v4238_v60  ;;  %v4726_v9 = vpop.f32.mrf.mxu1 }
 0x7e7   : > { %v4491_v45 = vpop.f32.mrf.mxu0 }
 0x7e8   : > { %v4587_v3 = vadd.f32 %v8788_v18, %v4560_v59  ;;  %v4558_v28 = vadd.f32 %v4491_v45, %v4230_v6  ;;  %v5747_v44 = vpop.f32.mrf.mxu1 }
 0x7e9   : > { %v5715_v50 = vpop.f32.mrf.mxu0 }
 0x7ea   : > { %v4779_v60 = vadd.f32 %v4719_v13, %v4587_v3  ;;  %v4585_v38 = vadd.f32 %v8788_v18, %v4558_v28  ;;  %v4561_v21 = vadd.f32 %v5715_v50, %v4241_v58  ;;  %v4729_v36 = vpop.f32.mrf.mxu1  ;;  %v4246_v58 = vadd.f32 %v4245_v23, %v4088_v19 }
 0x7eb   : > { %v4494_v54 = vpop.f32.mrf.mxu0  ;;  %v4257_v28 = vadd.f32 %v8732_v4, %v8734_v63  ;;  %v4727_v4 = vadd.f32 %v8783_v37, %v4726_v9 }
 0x7ec   : > { %v4799_v59 = vsel %vm1450_vm4, %v4779_v60, 0.0  ;;  %v4777_v6 = vadd.f32 %v4711_v33, %v4585_v38  ;;  %v4588_v2 = vadd.f32 %v8788_v18, %v4561_v21  ;;  %v4559_v31 = vadd.f32 %v4494_v54, %v4233_v43  ;;  %v5750_v50 = vpop.f32.mrf.mxu1 }
 0x7ed   : > { %v5470_v51 = vpack.c.bf16 %v4799_v59, %v4799_v59  ;;  %v5718_v16 = vpop.f32.mrf.mxu0  ;;  %v4735_v43 = vadd.f32 %v5746_v46, %v8783_v37  ;;  %v4270_v54 = vadd.f32 %v8740_v10, %v8742_v12  ;;  %vm9331_vm4 = vcmp.eq.s32.totalorder %v9156_v32, 1 }
 0x7ee   : > { %v4797_v35 = vsel %vm9330_vm9, %v4777_v6, 0.0  ;;  %v4780_v14 = vadd.f32 %v4722_v0, %v4588_v2  ;;  %v4586_v24 = vadd.f32 %v8788_v18, %v4559_v31  ;;  %v4564_v48 = vadd.f32 %v5718_v16, %v4254_v26  ;;  %v4742_v45 = vpop.f32.mrf.mxu1 }
 0x7ef   : > { %4900 = vst.msk [vmem:[%s8799_s17 + $0x18] sm:$0xf] %vm4893_vm1, %v5470_v51  ;;  %v5468_v23 = vpack.c.bf16 %v4797_v35, %v4797_v35  ;;  %v4507_v19 = vpop.f32.mrf.mxu0  ;;  %v4249_v26 = vadd.f32 %v8736_v41, %v8738_v52  ;;  %v4738_v41 = vadd.f32 %v5747_v44, %v8783_v37  ;;  %v4262_v31 = vadd.f32 %v8744_v22, %v8746_v1 }
 0x7f0   : > { %v4800_v25 = vsel %vm1451_vm13, %v4780_v14, 0.0  ;;  %v4778_v20 = vadd.f32 %v4714_v57, %v4586_v24  ;;  %v4591_v0 = vadd.f32 %v8788_v18, %v4564_v48  ;;  %v4562_v13 = vadd.f32 %v4507_v19, %v4246_v58  ;;  %v5751_v3 = vpop.f32.mrf.mxu1 }
 0x7f1   : > { %4898 = vst.msk [vmem:[%s8799_s17 + $0x10] sm:$0xf] %vm4893_vm1, %v5468_v23  ;;  %v5471_v46 = vpack.c.bf16 %v4800_v25, %v4800_v25  ;;  %v5719_v63 = vpop.f32.mrf.mxu0  ;;  %v4730_v58 = vadd.f32 %v8783_v37, %v4729_v36  ;;  %v4273_v35 = vadd.f32 %v8748_v17, %v8750_v39  ;;  %v4751_v22 = vadd.f32 %v5750_v50, %v8783_v37 }
 0x7f2   : > { %v4798_v33 = vsel %vm1449_vm7, %v4778_v20, 0.0  ;;  %v4783_v7 = vadd.f32 %v4735_v43, %v4591_v0  ;;  %v4589_v60 = vadd.f32 %v8788_v18, %v4562_v13  ;;  %v4565_v38 = vadd.f32 %v5719_v63, %v4257_v28  ;;  %v4745_v21 = vpop.f32.mrf.mxu1 }
 0x7f3   : > { %4901 = vst.msk [vmem:[%s8799_s17 + $0x1c] sm:$0xf] %vm4893_vm1, %v5471_v46  ;;  %v5469_v9 = vpack.c.bf16 %v4798_v33, %v4798_v33  ;;  %v4510_v52 = vpop.f32.mrf.mxu0  ;;  %vm9332_vm7 = vcmp.eq.s32.totalorder %v9148_v34, 1  ;;  %vm9333_vm13 = vcmp.eq.s32.totalorder %v9161_v40, 1  ;;  %v4265_v28 = vadd.f32 %v8752_v42, %v8754_v61 }
 0x7f4   : > { %v4803_v59 = vsel %vm9331_vm4, %v4783_v7, 0.0  ;;  %v4781_v62 = vadd.f32 %v4727_v4, %v4589_v60  ;;  %v4592_v6 = vadd.f32 %v8788_v18, %v4565_v38  ;;  %v4563_v2 = vadd.f32 %v4510_v52, %v4249_v26  ;;  %v5754_v51 = vpop.f32.mrf.mxu1  ;;  %v9338_v52 = vld [vmem:[#allocation17_spill] sm:$0xff] }
 0x7f5   : > { %4899 = vst.msk [vmem:[%s8799_s17 + $0x14] sm:$0xf] %vm4893_vm1, %v5469_v9  ;;  %v5474_v44 = vpack.c.bf16 %v4803_v59, %v4803_v59  ;;  %v5722_v10 = vpop.f32.mrf.mxu0  ;;  %v4743_v43 = vadd.f32 %v8783_v37, %v4742_v45  ;;  %v4286_v20 = vadd.f32 %v8756_v56, %v8758_v11  ;;  %v4754_v42 = vadd.f32 %v5751_v3, %v8783_v37  ;;  %v9339_v59 = vld [vmem:[#allocation21_spill] sm:$0xff] }
 0x7f6   : > { %v4801_v12 = vsel %vm9332_vm7, %v4781_v62, 0.0  ;;  %v4784_v32 = vadd.f32 %v4738_v41, %v4592_v6  ;;  %v4590_v57 = vadd.f32 %v8788_v18, %v4563_v2  ;;  %v4568_v16 = vadd.f32 %v5722_v10, %v4270_v54  ;;  %v4758_v23 = vpop.f32.mrf.mxu1 }
 0x7f7   : > { %4904 = vst.msk [vmem:[%s8799_s17 + $0x28] sm:$0xf] %vm4893_vm1, %v5474_v44  ;;  %v5472_v36 = vpack.c.bf16 %v4801_v12, %v4801_v12  ;;  %v4523_v1 = vpop.f32.mrf.mxu0  ;;  %v4278_v4 = vadd.f32 %v8760_v15, %v8762_v55  ;;  %v4746_v46 = vadd.f32 %v8783_v37, %v4745_v21  ;;  %v4289_v60 = vadd.f32 %v8764_v5, %v8766_v8  ;;  %v9342_v12 = vld [vmem:[#allocation22_spill] sm:$0xff] }
 0x7f8   : > { %v4804_v14 = vsel %vm9333_vm13, %v4784_v32, 0.0  ;;  %v4782_v34 = vadd.f32 %v4730_v58, %v4590_v57  ;;  %v4595_v24 = vadd.f32 %v8788_v18, %v4568_v16  ;;  %v4566_v48 = vadd.f32 %v4523_v1, %v4262_v31  ;;  %v5755_v63 = vpop.f32.mrf.mxu1  ;;  %v9344_v16 = vld [vmem:[#allocation33_spill] sm:$0xff] }
 0x7f9   : > { %4902 = vst.msk [vmem:[%s8799_s17 + $0x20] sm:$0xf] %vm4893_vm1, %v5472_v36  ;;  %v5475_v17 = vpack.c.bf16 %v4804_v14, %v4804_v14  ;;  %v5723_v39 = vpop.f32.mrf.mxu0  ;;  %v4767_v15 = vadd.f32 %v5754_v51, %v8783_v37  ;;  %v4281_v9 = vadd.f32 %v8768_v47, %v8770_v27  ;;  %v4556_v5 = vadd.f32 %v9339_v59, %v9338_v52  ;;  %v9343_v47 = vld [vmem:[#allocation26_spill] sm:$0xff] }
 0x7fa   : > { %v4802_v50 = vsel %vm9334_vm11, %v4782_v34, 0.0  ;;  %v4787_v40 = vadd.f32 %v4751_v22, %v4595_v24  ;;  %v4593_v19 = vadd.f32 %v8788_v18, %v4566_v48  ;;  %v4569_v25 = vadd.f32 %v5723_v39, %v4273_v35  ;;  %v4761_v2 = vpop.f32.mrf.mxu1  ;;  %v9346_v34 = vld [vmem:[#allocation19_spill] sm:$0xff]  ;;  %v9348_v39 = vld [vmem:[#allocation34_spill] sm:$0xff] }
 0x7fb   : > { %4905 = vst.msk [vmem:[%s8799_s17 + $0x2c] sm:$0xf] %vm4893_vm1, %v5475_v17  ;;  %v5473_v61 = vpack.c.bf16 %v4802_v50, %v4802_v50  ;;  %v4526_v45 = vpop.f32.mrf.mxu0  ;;  %v4759_v8 = vadd.f32 %v8783_v37, %v4758_v23  ;;  %v4554_v27 = vadd.f32 %v9343_v47, %v9342_v12  ;;  %v4770_v32 = vadd.f32 %v5755_v63, %v8783_v37  ;;  %v9347_v24 = vld [vmem:[#allocation23_spill] sm:$0xff] }
 0x7fc   : > { %v4807_v0 = vsel %vm9335_vm12, %v4787_v40, 0.0  ;;  %v4785_v30 = vadd.f32 %v4743_v43, %v4593_v19  ;;  %v4596_v13 = vadd.f32 %v8788_v18, %v4569_v25  ;;  %v4567_v26 = vadd.f32 %v4526_v45, %v4265_v28  ;;  %v9354_v63 = vld [vmem:[#allocation31_spill] sm:$0xff] }
 0x7fd   : > { %4903 = vst.msk [vmem:[%s8799_s17 + $0x24] sm:$0xf] %vm4893_vm1, %v5473_v61  ;;  %v5478_v56 = vpack.c.bf16 %v4807_v0, %v4807_v0  ;;  %v5726_v11 = vpop.f32.mrf.mxu0  ;;  %vm9345_vm6 = vcmp.eq.s32.totalorder %v9344_v16, 1  ;;  %v4583_v14 = vadd.f32 %v8788_v18, %v4556_v5  ;;  %v4557_v48 = vadd.f32 %v9347_v24, %v9346_v34 }
 0x7fe   : > { %v4805_v3 = vsel %vm9336_vm8, %v4785_v30, 0.0  ;;  %v4788_v53 = vadd.f32 %v4754_v42, %v4596_v13  ;;  %v4594_v33 = vadd.f32 %v8788_v18, %v4567_v26  ;;  %v4572_v7 = vadd.f32 %v5726_v11, %v4286_v20  ;;  %v9350_v20 = vld [vmem:[#allocation24_spill] sm:$0xff]  ;;  %v9352_v30 = vld [vmem:[#allocation27_spill] sm:$0xff] }
 0x7ff   : > { %4908 = vst.msk [vmem:[%s8799_s17 + $0x38] sm:$0xf] %vm4893_vm1, %v5478_v56  ;;  %v5476_v55 = vpack.c.bf16 %v4805_v3, %v4805_v3  ;;  %v4539_v38 = vpop.f32.mrf.mxu0  ;;  %v4762_v28 = vadd.f32 %v8783_v37, %v4761_v2  ;;  %vm9349_vm14 = vcmp.eq.s32.totalorder %v9348_v39, 1  ;;  %v4581_v25 = vadd.f32 %v8788_v18, %v4554_v27  ;;  %v9351_v42 = vld [vmem:[#allocation28_spill] sm:$0xff] }
 0x800   : > { %v4808_v21 = vsel %vm9337_vm0, %v4788_v53, 0.0  ;;  %v4786_v49 = vadd.f32 %v4746_v46, %v4594_v33  ;;  %v4599_v54 = vadd.f32 %v8788_v18, %v4572_v7  ;;  %v4570_v41 = vadd.f32 %v4539_v38, %v4278_v4  ;;  %v9356_v33 = vld [vmem:[#allocation16_spill] sm:$0xff] }
 0x801   : > { %4906 = vst.msk [vmem:[%s8799_s17 + $0x30] sm:$0xf] %vm4893_vm1, %v5476_v55  ;;  %v5479_v62 = vpack.c.bf16 %v4808_v21, %v4808_v21  ;;  %v5727_v6 = vpop.f32.mrf.mxu0  ;;  %v4555_v61 = vadd.f32 %v9351_v42, %v9350_v20  ;;  %vm9353_vm10 = vcmp.eq.s32.totalorder %v9352_v30, 1  ;;  %v4584_v56 = vadd.f32 %v8788_v18, %v4557_v48 }
 0x802   : > { %v4806_v31 = vsel %vm9341_vm3, %v4786_v49, 0.0  ;;  %v4791_v58 = vadd.f32 %v4767_v15, %v4599_v54  ;;  %v4597_v44 = vadd.f32 %v8788_v18, %v4570_v41  ;;  %v4573_v10 = vadd.f32 %v5727_v6, %v4289_v60  ;;  %v9358_v54 = vld [vmem:[#allocation18_spill] sm:$0xff] }
 0x803   : > { %4909 = vst.msk [vmem:[%s8799_s17 + $0x3c] sm:$0xf] %vm4893_vm1, %v5479_v62  ;;  %v5477_v57 = vpack.c.bf16 %v4806_v31, %v4806_v31  ;;  %v4542_v51 = vpop.f32.mrf.mxu0  ;;  %vm9355_vm2 = vcmp.eq.s32.totalorder %v9354_v63, 1  ;;  %vm9357_vm9 = vcmp.eq.s32.totalorder %v9356_v33, 1  ;;  %v4582_v49 = vadd.f32 %v8788_v18, %v4555_v61 }
 0x804   : > { %v4811_v35 = vsel %vm9345_vm6, %v4791_v58, 0.0  ;;  %v4789_v22 = vadd.f32 %v4759_v8, %v4597_v44  ;;  %v4600_v36 = vadd.f32 %v8788_v18, %v4573_v10  ;;  %v4571_v1 = vadd.f32 %v4542_v51, %v4281_v9 }
 0x805   : > { %4907 = vst.msk [vmem:[%s8799_s17 + $0x34] sm:$0xf] %vm4893_vm1, %v5477_v57  ;;  %v5482_v43 = vpack.c.bf16 %v4811_v35, %v4811_v35  ;;  %v5738_v17 = vpop.f32.mrf.mxu0  ;;  %vm9359_vm4 = vcmp.eq.s32.totalorder %v9358_v54, 1 }
 0x806   : > { %v4809_v50 = vsel %vm9349_vm14, %v4789_v22, 0.0  ;;  %v4792_v40 = vadd.f32 %v4770_v32, %v4600_v36  ;;  %v4598_v23 = vadd.f32 %v8788_v18, %v4571_v1  ;;  %v4703_v19 = vadd.f32 %v5738_v17, %v8783_v37 }
 0x807   : > { %4912 = vst.msk [vmem:[%s8799_s17 + $0x48] sm:$0xf] %vm4893_vm1, %v5482_v43  ;;  %v5480_v45 = vpack.c.bf16 %v4809_v50, %v4809_v50  ;;  %v4694_v0 = vpop.f32.mrf.mxu0 }
 0x808   : > { %v4812_v13 = vsel %vm9353_vm10, %v4792_v40, 0.0  ;;  %v4790_v26 = vadd.f32 %v4762_v28, %v4598_v23  ;;  %v4775_v4 = vadd.f32 %v4703_v19, %v4583_v14  ;;  %v4695_v46 = vadd.f32 %v8783_v37, %v4694_v0 }
 0x809   : > { %4910 = vst.msk [vmem:[%s8799_s17 + $0x40] sm:$0xf] %vm4893_vm1, %v5480_v45  ;;  %v5483_v11 = vpack.c.bf16 %v4812_v13, %v4812_v13  ;;  %v5739_v3 = vpop.f32.mrf.mxu0 }
 0x80a   : > { %v4810_v53 = vsel %vm9355_vm2, %v4790_v26, 0.0  ;;  %v4795_v7 = vsel %vm9357_vm9, %v4775_v4, 0.0  ;;  %v4773_v60 = vadd.f32 %v4695_v46, %v4581_v25  ;;  %v4706_v15 = vadd.f32 %v5739_v3, %v8783_v37 }
 0x80b   : > { %4913 = vst.msk [vmem:[%s8799_s17 + $0x4c] sm:$0xf] %vm4893_vm1, %v5483_v11  ;;  %v5481_v55 = vpack.c.bf16 %v4810_v53, %v4810_v53  ;;  %v5466_v38 = vpack.c.bf16 %v4795_v7, %v4795_v7  ;;  %v4697_v21 = vpop.f32.mrf.mxu0 }
 0x80c   : > { %v4793_v41 = vsel %vm9359_vm4, %v4773_v60, 0.0  ;;  %v4776_v9 = vadd.f32 %v4706_v15, %v4584_v56  ;;  %v4698_v52 = vadd.f32 %v8783_v37, %v4697_v21 }
 0x80d   : > { %4911 = vst.msk [vmem:[%s8799_s17 + $0x44] sm:$0xf] %vm4893_vm1, %v5481_v55  ;;  %4896 = vst.msk [vmem:[%s8799_s17 + $0x8] sm:$0xf] %vm4893_vm1, %v5466_v38  ;;  %v5464_v59 = vpack.c.bf16 %v4793_v41, %v4793_v41 }
 0x80e   : > { %v4796_v8 = vsel %vm1447_vm5, %v4776_v9, 0.0  ;;  %v4774_v62 = vadd.f32 %v4698_v52, %v4582_v49 }
 0x80f   : > { %4894 = vst.msk [vmem:[%s8799_s17] sm:$0xf] %vm4893_vm1, %v5464_v59  ;;  %v5467_v6 = vpack.c.bf16 %v4796_v8, %v4796_v8 }
 0x810   : > { %v4794_v18 = vsel %vm1445_vm15, %v4774_v62, 0.0 }
 0x811   : > { %4897 = vst.msk [vmem:[%s8799_s17 + $0xc] sm:$0xf] %vm4893_vm1, %v5467_v6  ;;  %v5465_v29 = vpack.c.bf16 %v4794_v18, %v4794_v18 }
 0x813   : > { %4895 = vst.msk [vmem:[%s8799_s17 + $0x4] sm:$0xf] %vm4893_vm1, %v5465_v29 }
 0x814 PF: > { %s25_s18 = sadd.s32 1, %s6239_s18  }
 0x815   : > { %p22_p4 = scmp.ge.s32.totalorder %s25_s18, 4  }
 0x817   :  { %24 = sbr.rel (!%p22_p4) target bundleno = 1 (0x1), region = 120 }

</bundles_post_ra>
